<compile_context>
chip_gen: v7x
topology: tpu7x:2x2x1
jax: 0.10.0
libtpu: 0.0.40
codegen_flags: <defaults>
</compile_context>

<pallas_src>
import jax
import jax.numpy as jnp
from jax.experimental import pallas as pl
from jax.experimental.pallas import tpu as pltpu

NUM_CLASSES = 1
IN_FEATURES = 512 * 2 * 2          # 2048
HIDDEN = (1024, 512, 128)
BATCH_TILE = 256                   # fixed batch tile -> VMEM bounded as B grows
SUBLANE_BF16 = 16                  # bf16 packs 16 rows per vreg sublane group


def _round_up(x, m):
    return ((x + m - 1) // m) * m


def _pick_k_block():
    """Fewer, bigger W1 chunks on v7x (per-step overhead ~ chunk DMA time at
    ~3.2 TB/s); smaller chunks on v5e/v6e to keep the priming DMA short."""
    try:
        kind = jax.devices()[0].device_kind.lower()
    except Exception:
        return 512
    return 1024 if "v7" in kind else 512


def _mlp_kernel(x_ref, w1_ref, b1_ref, w2_hbm, b2_ref, w3_hbm, b3_ref,
                w4_ref, b4_ref, o_ref,
                acc_ref, w2_vmem, w3_vmem, dma_sems):
    k = pl.program_id(1)

    # W2/W3 live in HBM (memory_space=pl.ANY); stream them into VMEM scratch
    # concurrently with the K-blocked W1 pipeline instead of paying for them
    # in the step-0 priming DMA.
    w2_cp = pltpu.make_async_copy(w2_hbm, w2_vmem, dma_sems.at[0])
    w3_cp = pltpu.make_async_copy(w3_hbm, w3_vmem, dma_sems.at[1])

    @pl.when(k == 0)
    def _():
        acc_ref[...] = jnp.zeros_like(acc_ref)
        w2_cp.start()
        w3_cp.start()

    # Layer-1 partial product for this K chunk (bf16 x bf16 -> f32 on MXU).
    # x arrives f32; cast the chunk here (saves a wrapper-side cast HLO).
    acc_ref[...] += jnp.dot(x_ref[...].astype(jnp.bfloat16), w1_ref[...],
                            preferred_element_type=jnp.float32)

    @pl.when(k == pl.num_programs(1) - 1)
    def _():
        h1 = jnp.maximum(acc_ref[...] + b1_ref[...], 0.0).astype(jnp.bfloat16)
        w2_cp.wait()
        h2 = jnp.dot(h1, w2_vmem[...], preferred_element_type=jnp.float32)
        h2 = jnp.maximum(h2 + b2_ref[...], 0.0).astype(jnp.bfloat16)
        w3_cp.wait()
        h3 = jnp.dot(h2, w3_vmem[...], preferred_element_type=jnp.float32)
        h3 = jnp.maximum(h3 + b3_ref[...], 0.0)                    # (BM,128) f32
        # Final Linear(128, 1): VPU broadcast-mul + lane reduction instead of
        # a degenerate N=1 MXU matmul.
        w4 = w4_ref[...].astype(jnp.float32)                       # (1, 128)
        out = jnp.sum(h3 * w4, axis=-1, keepdims=True) + b4_ref[...]
        o_ref[...] = out.astype(o_ref.dtype)


def init_params(key):
    """Init matching DrivingNN._weight_init / _bias_init; weights stored bf16."""
    dims = [IN_FEATURES, HIDDEN[0], HIDDEN[1], HIDDEN[2], NUM_CLASSES]
    params = []
    for i in range(4):
        fan_in, fan_out = dims[i], dims[i + 1]
        key, sub = jax.random.split(key)
        std = jnp.sqrt(2.0 / (fan_in + fan_out))
        # PyTorch weight layout is (out, in); generate then transpose to (in, out).
        w_pt = std * jax.random.normal(sub, (fan_out, fan_in), dtype=jnp.float32)
        if i < 3:
            w = w_pt.T.astype(jnp.bfloat16)               # (in, out) for x @ W
        else:
            w = w_pt.astype(jnp.bfloat16)                 # (1, 128) row for VPU dot
        b = jnp.zeros((1, fan_out), dtype=jnp.float32)    # _bias_init -> zeros
        params.append((w, b))
    return params


def driving_nn_forward(x_nchw, params):
    """x_nchw: (B, 512, 2, 2) float32 -> (B, NUM_CLASSES) float32."""
    B = x_nchw.shape[0]
    # x.view(-1, num_flat_features(x)) : row-major flatten over C,H,W.
    x_flat = x_nchw.reshape(B, -1)
    assert x_flat.shape[1] == IN_FEATURES

    # Pad batch to a multiple of 16 (bf16 vreg packing); tile at 256 rows so
    # VMEM stays fixed for any B and a "parallel" batch axis can be split
    # across v7x's two TensorCores.
    B_pad = _round_up(max(B, SUBLANE_BF16), SUBLANE_BF16)
    if B_pad > BATCH_TILE:
        B_pad = _round_up(B_pad, BATCH_TILE)
        bm = BATCH_TILE
    else:
        bm = B_pad
    if B_pad != B:
        x_flat = jnp.pad(x_flat, ((0, B_pad - B), (0, 0)))

    (w1, b1), (w2, b2), (w3, b3), (w4, b4) = params

    k_block = _pick_k_block()
    assert IN_FEATURES % k_block == 0
    n_k = IN_FEATURES // k_block
    n_b = B_pad // bm

    grid_spec = pltpu.PrefetchScalarGridSpec(
        num_scalar_prefetch=0,
        grid=(n_b, n_k),
        in_specs=[
            pl.BlockSpec((bm, k_block), lambda b, k: (b, k)),          # x chunk (f32)
            pl.BlockSpec((k_block, HIDDEN[0]), lambda b, k: (k, 0)),   # W1 chunk
            pl.BlockSpec((1, HIDDEN[0]), lambda b, k: (0, 0)),         # b1
            pl.BlockSpec(memory_space=pl.ANY),                         # W2 (HBM, manual DMA)
            pl.BlockSpec((1, HIDDEN[1]), lambda b, k: (0, 0)),         # b2
            pl.BlockSpec(memory_space=pl.ANY),                         # W3 (HBM, manual DMA)
            pl.BlockSpec((1, HIDDEN[2]), lambda b, k: (0, 0)),         # b3
            pl.BlockSpec((1, HIDDEN[2]), lambda b, k: (0, 0)),         # W4 row
            pl.BlockSpec((1, NUM_CLASSES), lambda b, k: (0, 0)),       # b4
        ],
        out_specs=pl.BlockSpec((bm, NUM_CLASSES), lambda b, k: (b, 0)),
        scratch_shapes=[
            pltpu.VMEM((bm, HIDDEN[0]), jnp.float32),          # layer-1 accumulator
            pltpu.VMEM((HIDDEN[0], HIDDEN[1]), jnp.bfloat16),  # W2 landing buffer
            pltpu.VMEM((HIDDEN[1], HIDDEN[2]), jnp.bfloat16),  # W3 landing buffer
            pltpu.SemaphoreType.DMA((2,)),
        ],
    )

    out = pl.pallas_call(
        _mlp_kernel,
        out_shape=jax.ShapeDtypeStruct((B_pad, NUM_CLASSES), jnp.float32),
        grid_spec=grid_spec,
        compiler_params=pltpu.CompilerParams(
            dimension_semantics=("parallel", "arbitrary"),   # batch || , K reduction
            vmem_limit_bytes=24 * 1024 * 1024,               # worst case ~8 MiB used
        ),
    )(x_flat, w1, b1, w2, b2, w3, b3, w4, b4)
    return out[:B]


def reference_forward(x_nchw, params):
    """Plain JAX reference with the same bf16 casts / f32 accumulation."""
    (w1, b1), (w2, b2), (w3, b3), (w4, b4) = params
    h = x_nchw.reshape(x_nchw.shape[0], -1).astype(jnp.bfloat16)
    h = jnp.maximum(jnp.dot(h, w1, preferred_element_type=jnp.float32) + b1, 0.0)
    h = jnp.maximum(jnp.dot(h.astype(jnp.bfloat16), w2,
                            preferred_element_type=jnp.float32) + b2, 0.0)
    h = jnp.maximum(jnp.dot(h.astype(jnp.bfloat16), w3,
                            preferred_element_type=jnp.float32) + b3, 0.0)
    return jnp.sum(h * w4.astype(jnp.float32), axis=-1, keepdims=True) + b4


if __name__ == "__main__":
    key = jax.random.PRNGKey(0)
    k_params, k_x = jax.random.split(key)

    params = init_params(k_params)

    B = 8
    x = jax.random.normal(k_x, (B, 512, 2, 2), dtype=jnp.float32)

    out = driving_nn_forward(x, params)
    out = jax.block_until_ready(out)

    ref = reference_forward(x, params)
    assert out.shape == (B, NUM_CLASSES)
    max_err = jnp.max(jnp.abs(out - ref))
    assert jnp.allclose(out, ref, atol=1e-2, rtol=1e-2), (
        f"mismatch vs reference, max abs err = {max_err:.3e}")

    print("KERNEL_OK")
</pallas_src>

<mosaic_0001>
module attributes {stable_mosaic.version = 11 : i64} {
  func.func @_mlp_kernel(%arg0: i32, %arg1: i32, %arg2: memref<16x512xf32, #tpu.memory_space<vmem>>, %arg3: memref<512x1024xbf16, #tpu.memory_space<vmem>>, %arg4: memref<1x1024xf32, #tpu.memory_space<vmem>>, %arg5: memref<1024x512xbf16, #tpu.memory_space<any>>, %arg6: memref<1x512xf32, #tpu.memory_space<vmem>>, %arg7: memref<512x128xbf16, #tpu.memory_space<any>>, %arg8: memref<1x128xf32, #tpu.memory_space<vmem>>, %arg9: memref<1x128xbf16, #tpu.memory_space<vmem>>, %arg10: memref<1x1xf32, #tpu.memory_space<vmem>>, %arg11: memref<16x1xf32, #tpu.memory_space<vmem>>, %arg12: memref<16x1024xf32, #tpu.memory_space<vmem>>, %arg13: memref<1024x512xbf16, #tpu.memory_space<vmem>>, %arg14: memref<512x128xbf16, #tpu.memory_space<vmem>>, %arg15: memref<2x!tpu.dma_semaphore, #tpu.memory_space<semaphore_mem>>) attributes {dimension_semantics = [#tpu.dimension_semantics<parallel>, #tpu.dimension_semantics<arbitrary>], iteration_bounds = array<i64: 1, 4>, scalar_prefetch = 0 : i64, scratch_operands = 4 : i64, tpu.core_type = #tpu.core_type<tc>, window_params = [{transform_indices = @transform_0, window_bounds = array<i64: 16, 512>}, {transform_indices = @transform_1, window_bounds = array<i64: 512, 1024>}, {pipeline_mode = #tpu.pipeline_mode<synchronous>, transform_indices = @transform_2, window_bounds = array<i64: 1, 1024>}, {}, {pipeline_mode = #tpu.pipeline_mode<synchronous>, transform_indices = @transform_4, window_bounds = array<i64: 1, 512>}, {}, {pipeline_mode = #tpu.pipeline_mode<synchronous>, transform_indices = @transform_6, window_bounds = array<i64: 1, 128>}, {pipeline_mode = #tpu.pipeline_mode<synchronous>, transform_indices = @transform_7, window_bounds = array<i64: 1, 128>}, {pipeline_mode = #tpu.pipeline_mode<synchronous>, transform_indices = @transform_8, window_bounds = array<i64: 1, 1>}, {transform_indices = @transform_9, window_bounds = array<i64: 16, 1>}]} {
    %c0_i32 = arith.constant 0 : i32
    %0 = arith.cmpi eq, %arg1, %c0_i32 : i32
    %1 = arith.extui %0 : i1 to i32
    %c0_i32_0 = arith.constant 0 : i32
    %c1_i32 = arith.constant 1 : i32
    %c0_i32_1 = arith.constant 0 : i32
    %2 = arith.cmpi ne, %1, %c0_i32_1 : i32
    scf.if %2 {
      %cst_12 = arith.constant 0.000000e+00 : f32
      %13 = vector.broadcast %cst_12 : f32 to vector<16x1024xf32>
      %c0_13 = arith.constant 0 : index
      %c0_14 = arith.constant 0 : index
      %14 = vector.load %arg12[%c0_13, %c0_14] : memref<16x1024xf32, #tpu.memory_space<vmem>>, vector<16x1024xf32>
      tpu.vector_store %arg12[%c0_13, %c0_14], %13 {strides = array<i32>} : memref<16x1024xf32, #tpu.memory_space<vmem>>, vector<16x1024xf32>,
      %15 = tpu.memref_slice %arg15[%c0_i32_0] : memref<2x!tpu.dma_semaphore, #tpu.memory_space<semaphore_mem>> -> memref<1x!tpu.dma_semaphore, #tpu.memory_space<semaphore_mem>>
      %16 = tpu.memref_squeeze %15 : memref<1x!tpu.dma_semaphore, #tpu.memory_space<semaphore_mem>> -> memref<!tpu.dma_semaphore, #tpu.memory_space<semaphore_mem>>
      tpu.enqueue_dma source(%arg5 : memref<1024x512xbf16, #tpu.memory_space<any>>) target(%arg13 : memref<1024x512xbf16, #tpu.memory_space<vmem>>) target_semaphore(%16 : memref<!tpu.dma_semaphore, #tpu.memory_space<semaphore_mem>>)
      %17 = tpu.memref_slice %arg15[%c1_i32] : memref<2x!tpu.dma_semaphore, #tpu.memory_space<semaphore_mem>> -> memref<1x!tpu.dma_semaphore, #tpu.memory_space<semaphore_mem>>
      %18 = tpu.memref_squeeze %17 : memref<1x!tpu.dma_semaphore, #tpu.memory_space<semaphore_mem>> -> memref<!tpu.dma_semaphore, #tpu.memory_space<semaphore_mem>>
      tpu.enqueue_dma source(%arg7 : memref<512x128xbf16, #tpu.memory_space<any>>) target(%arg14 : memref<512x128xbf16, #tpu.memory_space<vmem>>) target_semaphore(%18 : memref<!tpu.dma_semaphore, #tpu.memory_space<semaphore_mem>>)
    } else {
    }
    %c0 = arith.constant 0 : index
    %c0_2 = arith.constant 0 : index
    %3 = vector.load %arg12[%c0, %c0_2] : memref<16x1024xf32, #tpu.memory_space<vmem>>, vector<16x1024xf32>
    %c0_3 = arith.constant 0 : index
    %c0_4 = arith.constant 0 : index
    %4 = vector.load %arg2[%c0_3, %c0_4] : memref<16x512xf32, #tpu.memory_space<vmem>>, vector<16x512xf32>
    %5 = arith.truncf %4 : vector<16x512xf32> to vector<16x512xbf16>
    %c0_5 = arith.constant 0 : index
    %c0_6 = arith.constant 0 : index
    %6 = vector.load %arg3[%c0_5, %c0_6] : memref<512x1024xbf16, #tpu.memory_space<vmem>>, vector<512x1024xbf16>
    %cst = arith.constant dense<0.000000e+00> : vector<16x1024xf32>
    %7 = tpu.matmul %5, %6, %cst {dimension_numbers = #tpu.dot_dimension_numbers<[1], [0], [0], [1], [0, 0, 1, 1], [], []>} : vector<16x512xbf16>, vector<512x1024xbf16>, vector<16x1024xf32> -> vector<16x1024xf32>
    %8 = arith.addf %3, %7 : vector<16x1024xf32>
    %c0_7 = arith.constant 0 : index
    %c0_8 = arith.constant 0 : index
    %9 = vector.load %arg12[%c0_7, %c0_8] : memref<16x1024xf32, #tpu.memory_space<vmem>>, vector<16x1024xf32>
    tpu.vector_store %arg12[%c0_7, %c0_8], %8 {strides = array<i32>} : memref<16x1024xf32, #tpu.memory_space<vmem>>, vector<16x1024xf32>,
    %c3_i32 = arith.constant 3 : i32
    %10 = arith.cmpi eq, %arg1, %c3_i32 : i32
    %11 = arith.extui %10 : i1 to i32
    %c0_i32_9 = arith.constant 0 : i32
    %c1_i32_10 = arith.constant 1 : i32
    %c0_i32_11 = arith.constant 0 : i32
    %12 = arith.cmpi ne, %11, %c0_i32_11 : i32
    scf.if %12 {
      %c0_12 = arith.constant 0 : index
      %c0_13 = arith.constant 0 : index
      %13 = vector.load %arg12[%c0_12, %c0_13] : memref<16x1024xf32, #tpu.memory_space<vmem>>, vector<16x1024xf32>
      %c0_14 = arith.constant 0 : index
      %c0_15 = arith.constant 0 : index
      %14 = vector.load %arg4[%c0_14, %c0_15] : memref<1x1024xf32, #tpu.memory_space<vmem>>, vector<1x1024xf32>
      %15 = vector.broadcast %14 : vector<1x1024xf32> to vector<16x1024xf32>
      %16 = arith.addf %13, %15 : vector<16x1024xf32>
      %cst_16 = arith.constant 0.000000e+00 : f32
      %17 = vector.broadcast %cst_16 : f32 to vector<16x1024xf32>
      %18 = arith.maximumf %16, %17 : vector<16x1024xf32>
      %19 = arith.truncf %18 : vector<16x1024xf32> to vector<16x1024xbf16>
      %20 = tpu.memref_slice %arg15[%c0_i32_9] : memref<2x!tpu.dma_semaphore, #tpu.memory_space<semaphore_mem>> -> memref<1x!tpu.dma_semaphore, #tpu.memory_space<semaphore_mem>>
      %21 = tpu.memref_squeeze %20 : memref<1x!tpu.dma_semaphore, #tpu.memory_space<semaphore_mem>> -> memref<!tpu.dma_semaphore, #tpu.memory_space<semaphore_mem>>
      tpu.wait_dma2 semaphore(%21 : memref<!tpu.dma_semaphore, #tpu.memory_space<semaphore_mem>>) src(%arg5 : memref<1024x512xbf16, #tpu.memory_space<any>>) dst(%arg13 : memref<1024x512xbf16, #tpu.memory_space<vmem>>)
      %c0_17 = arith.constant 0 : index
      %c0_18 = arith.constant 0 : index
      %22 = vector.load %arg13[%c0_17, %c0_18] : memref<1024x512xbf16, #tpu.memory_space<vmem>>, vector<1024x512xbf16>
      %cst_19 = arith.constant dense<0.000000e+00> : vector<16x512xf32>
      %23 = tpu.matmul %19, %22, %cst_19 {dimension_numbers = #tpu.dot_dimension_numbers<[1], [0], [0], [1], [0, 0, 1, 1], [], []>} : vector<16x1024xbf16>, vector<1024x512xbf16>, vector<16x512xf32> -> vector<16x512xf32>
      %c0_20 = arith.constant 0 : index
      %c0_21 = arith.constant 0 : index
      %24 = vector.load %arg6[%c0_20, %c0_21] : memref<1x512xf32, #tpu.memory_space<vmem>>, vector<1x512xf32>
      %25 = vector.broadcast %24 : vector<1x512xf32> to vector<16x512xf32>
      %26 = arith.addf %23, %25 : vector<16x512xf32>
      %cst_22 = arith.constant 0.000000e+00 : f32
      %27 = vector.broadcast %cst_22 : f32 to vector<16x512xf32>
      %28 = arith.maximumf %26, %27 : vector<16x512xf32>
      %29 = arith.truncf %28 : vector<16x512xf32> to vector<16x512xbf16>
      %30 = tpu.memref_slice %arg15[%c1_i32_10] : memref<2x!tpu.dma_semaphore, #tpu.memory_space<semaphore_mem>> -> memref<1x!tpu.dma_semaphore, #tpu.memory_space<semaphore_mem>>
      %31 = tpu.memref_squeeze %30 : memref<1x!tpu.dma_semaphore, #tpu.memory_space<semaphore_mem>> -> memref<!tpu.dma_semaphore, #tpu.memory_space<semaphore_mem>>
      tpu.wait_dma2 semaphore(%31 : memref<!tpu.dma_semaphore, #tpu.memory_space<semaphore_mem>>) src(%arg7 : memref<512x128xbf16, #tpu.memory_space<any>>) dst(%arg14 : memref<512x128xbf16, #tpu.memory_space<vmem>>)
      %c0_23 = arith.constant 0 : index
      %c0_24 = arith.constant 0 : index
      %32 = vector.load %arg14[%c0_23, %c0_24] : memref<512x128xbf16, #tpu.memory_space<vmem>>, vector<512x128xbf16>
      %cst_25 = arith.constant dense<0.000000e+00> : vector<16x128xf32>
      %33 = tpu.matmul %29, %32, %cst_25 {dimension_numbers = #tpu.dot_dimension_numbers<[1], [0], [0], [1], [0, 0, 1, 1], [], []>} : vector<16x512xbf16>, vector<512x128xbf16>, vector<16x128xf32> -> vector<16x128xf32>
      %c0_26 = arith.constant 0 : index
      %c0_27 = arith.constant 0 : index
      %34 = vector.load %arg8[%c0_26, %c0_27] : memref<1x128xf32, #tpu.memory_space<vmem>>, vector<1x128xf32>
      %35 = vector.broadcast %34 : vector<1x128xf32> to vector<16x128xf32>
      %36 = arith.addf %33, %35 : vector<16x128xf32>
      %cst_28 = arith.constant 0.000000e+00 : f32
      %37 = vector.broadcast %cst_28 : f32 to vector<16x128xf32>
      %38 = arith.maximumf %36, %37 : vector<16x128xf32>
      %c0_29 = arith.constant 0 : index
      %c0_30 = arith.constant 0 : index
      %39 = vector.load %arg9[%c0_29, %c0_30] : memref<1x128xbf16, #tpu.memory_space<vmem>>, vector<1x128xbf16>
      %40 = arith.extf %39 : vector<1x128xbf16> to vector<1x128xf32>
      %41 = vector.broadcast %40 : vector<1x128xf32> to vector<16x128xf32>
      %42 = arith.mulf %38, %41 : vector<16x128xf32>
      %cst_31 = arith.constant dense<0.000000e+00> : vector<16xf32>
      %43 = vector.multi_reduction <add>, %42, %cst_31 [1] : vector<16x128xf32> to vector<16xf32>
      %44 = vector.shape_cast %43 : vector<16xf32> to vector<16x1xf32>
      %c0_32 = arith.constant 0 : index
      %c0_33 = arith.constant 0 : index
      %45 = vector.load %arg10[%c0_32, %c0_33] : memref<1x1xf32, #tpu.memory_space<vmem>>, vector<1x1xf32>
      %46 = vector.broadcast %45 : vector<1x1xf32> to vector<16x1xf32>
      %47 = arith.addf %44, %46 : vector<16x1xf32>
      %c0_34 = arith.constant 0 : index
      %c0_35 = arith.constant 0 : index
      %48 = vector.load %arg11[%c0_34, %c0_35] : memref<16x1xf32, #tpu.memory_space<vmem>>, vector<16x1xf32>
      tpu.vector_store %arg11[%c0_34, %c0_35], %47 {strides = array<i32>} : memref<16x1xf32, #tpu.memory_space<vmem>>, vector<16x1xf32>,
    } else {
    }
    return
  }
  func.func @transform_0(%arg0: i32, %arg1: i32) -> (i32, i32) {
    %c0_i32 = arith.constant 0 : i32
    return %arg0, %arg1 : i32, i32
  }
  func.func @transform_1(%arg0: i32, %arg1: i32) -> (i32, i32) {
    %c0_i32 = arith.constant 0 : i32
    %c0_i32_0 = arith.constant 0 : i32
    return %arg1, %c0_i32 : i32, i32
  }
  func.func @transform_2(%arg0: i32, %arg1: i32) -> (i32, i32) {
    %c0_i32 = arith.constant 0 : i32
    %c0_i32_0 = arith.constant 0 : i32
    %c0_i32_1 = arith.constant 0 : i32
    return %c0_i32, %c0_i32_0 : i32, i32
  }
  func.func @transform_4(%arg0: i32, %arg1: i32) -> (i32, i32) {
    %c0_i32 = arith.constant 0 : i32
    %c0_i32_0 = arith.constant 0 : i32
    %c0_i32_1 = arith.constant 0 : i32
    return %c0_i32, %c0_i32_0 : i32, i32
  }
  func.func @transform_6(%arg0: i32, %arg1: i32) -> (i32, i32) {
    %c0_i32 = arith.constant 0 : i32
    %c0_i32_0 = arith.constant 0 : i32
    %c0_i32_1 = arith.constant 0 : i32
    return %c0_i32, %c0_i32_0 : i32, i32
  }
  func.func @transform_7(%arg0: i32, %arg1: i32) -> (i32, i32) {
    %c0_i32 = arith.constant 0 : i32
    %c0_i32_0 = arith.constant 0 : i32
    %c0_i32_1 = arith.constant 0 : i32
    return %c0_i32, %c0_i32_0 : i32, i32
  }
  func.func @transform_8(%arg0: i32, %arg1: i32) -> (i32, i32) {
    %c0_i32 = arith.constant 0 : i32
    %c0_i32_0 = arith.constant 0 : i32
    %c0_i32_1 = arith.constant 0 : i32
    return %c0_i32, %c0_i32_0 : i32, i32
  }
  func.func @transform_9(%arg0: i32, %arg1: i32) -> (i32, i32) {
    %c0_i32 = arith.constant 0 : i32
    %c0_i32_0 = arith.constant 0 : i32
    return %arg0, %c0_i32 : i32, i32
  }
}

</mosaic_0001>

<bundles_post_ra>
// kernel: tpu_custom_call.1
= control target key start
LH: loop header
LB: loop body
LE: loop exit
PB: predicated region body
PF: predicated region fallthrough
CT: control target
= control target key end

     0   :  { %s4974_s0 = inlined_call_operand.hbm [shape: f32[16,2048], index: 0, kind: input, shape index: {}]   ;;  %s4975_s1 = inlined_call_operand.hbm [shape: bf16[2048,1024], index: 1, kind: input, shape index: {}]   ;;  %s4976_s2 = inlined_call_operand.hbm [shape: f32[1,1024], index: 2, kind: input, shape index: {}]   ;;  %s4977_s3 = inlined_call_operand.hbm [shape: bf16[1024,512], index: 3, kind: input, shape index: {}]   ;;  %s4978_s4 = inlined_call_operand.hbm [shape: f32[1,512], index: 4, kind: input, shape index: {}]   ;;  %s4979_s5 = inlined_call_operand.hbm [shape: bf16[512,128], index: 5, kind: input, shape index: {}]   ;;  %s4980_s6 = inlined_call_operand.hbm [shape: f32[1,128], index: 6, kind: input, shape index: {}]   ;;  %s4981_s7 = inlined_call_operand.hbm [shape: bf16[1,128], index: 7, kind: input, shape index: {}]   ;;  %s4982_s8 = inlined_call_operand.<no memory space> [shape: f32[1,1], index: 8, kind: input, shape index: {}]   ;;  %s4983_s9 = inlined_call_operand.vmem [shape: f32[16,1], index: 9, kind: output, shape index: {}]  }
   0x1   :  { %4990 = sst [smem:[#allocation31_spill]] %s4974_s0  ;;  %v14_v0 = vstv %s4982_s8 }
   0x2   :  { %4991 = sst [smem:[#allocation32_spill]] %s4976_s2  ;;  %15 = vst [vmem:[#allocation6] sm:$0x1] %v14_v0 }
   0x3   :  { %4992 = sst [smem:[#allocation33_spill]] %s4978_s4 }
   0x4   :  { %4993 = sst [smem:[#allocation34_spill]] %s4980_s6 }
   0x5   :  { %4994 = sst [smem:[#allocation35_spill]] %s4981_s7 }
   0x6   :  { %16 = vsyncpa [#allocation8], 0 }
   0x7   :  { %18 = vsyncpa [#allocation8 + $0x1], 0 }
   0x8   :  { %19 = vsyncpa [#allocation10], 0 }
   0x9   :  { %21 = vsyncpa [#allocation10 + $0x1], 0 }
   0xa   :  { %22 = vsyncpa [#allocation13], 0 }
   0xb   :  { %23 = vsyncpa [#allocation16], 0  ;;  %s4303_s11 = smov 0   ;;  %s4305_s12 = smov 0  }
   0xc   :  { %s4307_s13 = smov 0   ;;  %s4309_s14 = smov 0  }
   0xd   :  { %s4311_s15 = smov 0   ;;  %s4313_s16 = smov 0  }
   0xe LB: > { %s4988_s8 = sadd.s32 4294967295, %s4228_s16   ;;  %p63_p0 = scmp.ne.s32.totalorder %s4212_s12, %s4208_s11  ;;  %s4228_s16 = sphi %s4313_s16, %s29_s16   ;;  %s4224_s15 = sphi %s4311_s15, %s5016_s15   ;;  %s4220_s14 = sphi %s4309_s14, %s5015_s14   ;;  %s4216_s13 = sphi %s4307_s13, %s5014_s13   ;;  %s4212_s12 = sphi %s4305_s12, %s5013_s12   ;;  %s4208_s11 = sphi %s4303_s11, %s5012_s11  }
   0xf   : > { %p4335_p1 = scmp.eq.s32.totalorder %s4988_s8, 0  ;;  %p3466_p2 = scmp.ge.s32.totalorder %s4228_s16, 1 }
  0x10   : > { %p231_p3 = scmp.lt.s32.totalorder %s4228_s16, 5  ;;  %s4230_s20 = smov [#allocation11]  }
  0x11   : > { %s4995_s17 = scalar_select %p4335_p1, 1, 0 }
  0x12   : > { %p4343_p4 = por %p4335_p1, %p63_p0  ;;  %p4347_p5 = pnand %p3466_p2, %p231_p3 }
  0x13   : > { %s244_s21 = sshll.u32 %s4230_s20, 4  ;;  %s4231_s22 = smov [#allocation12]   ;;  %s245_s21 = int_to_ptr.vmem [resolvable:$true] %s244_s21 }
  0x14   : > { %s4996_s18 = scalar_select %p4343_p4, 1, 0 }
  0x15   : > { %s4997_s19 = scalar_select %p4347_p5, 1, 0 }
  0x16   : > { %p3869_p6 = pneg %p4347_p5  ;;  %s255_s23 = sshll.u32 %s4231_s22, 4  ;;  %s4359_s23 = int_to_ptr.vmem [resolvable:$true] %s255_s23 }
  0x17   : > { %s4232_s25 = smov [#allocation14]   ;;  %s4999_s2 = sld [smem:[#allocation32_spill]] }
  0x18   : > { %p4355_p7 = pnand %p3869_p6, %p4335_p1  ;;  %s266_s26 = sshll.u32 %s4232_s25, 4  ;;  %s4361_s26 = int_to_ptr.vmem [resolvable:$true] %s266_s26 }
  0x1a   : > { %p4371_p9 = pneg %p4355_p7 }
  0x1d   : > { %s3964_s29 = scalar_lea.hbm %s4999_s2, 128 }
  0x1e   : > { %p3965_p8 = scmp.ne.s32.totalorder %s4999_s2, %s3964_s29  ;;  %p3971_p12 = scmp.lt.u32.totalorder %s3964_s29, %s4999_s2 }
  0x20   : > { %p3967_p10 = pnand %p4371_p9, %p3965_p8 }
  0x22   : > { %p3968_p11 = pneg %p3967_p10 }
  0x24   : > { %p3973_p13 = pnand %p3971_p12, %p3968_p11 }
  0x26   : > { %3976 = shalt.err (!%p3973_p13)
}
  0x27   : > { %s3977_s25 = scalar_lea.vmem %s245_s21, 128  ;;  %p3985_p6 = scmp.lt.s32.totalorder %s245_s21, %s245_s21 }
  0x28   : > { %p3978_p0 = scmp.ne.s32.totalorder %s245_s21, %s3977_s25  ;;  %p3986_p1 = scmp.lt.s32.totalorder %s3977_s25, %s3977_s25 }
  0x2a   : > { %p3980_p2 = pnand %p3978_p0, %p4371_p9  ;;  %p3987_p4 = por %p3986_p1, %p3985_p6 }
  0x2c   : > { %p3981_p3 = pneg %p3980_p2 }
  0x2e   : > { %p3988_p5 = pnand %p3987_p4, %p3981_p3 }
  0x30   : > { %3991 = shalt.err (!%p3988_p5)
}
  0x31   : > { %3872 = dma.hbm_to_vmem [thread:$0]  (!%p4355_p7), %s4999_s2, 128, %s245_s21, [#allocation10]  }
  0x32   : > { %s5001_s4 = sld [smem:[#allocation33_spill]] }
  0x38   : > { %s3992_s10 = scalar_lea.hbm %s5001_s4, 64 }
  0x39   : > { %p3993_p8 = scmp.ne.s32.totalorder %s5001_s4, %s3992_s10  ;;  %p3999_p4 = scmp.lt.u32.totalorder %s3992_s10, %s5001_s4 }
  0x3b   : > { %p3995_p10 = pnand %p3993_p8, %p4371_p9 }
  0x3d   : > { %p3996_p1 = pneg %p3995_p10 }
  0x3f   : > { %p4001_p5 = pnand %p3999_p4, %p3996_p1 }
  0x41   : > { %4004 = shalt.err (!%p4001_p5)
}
  0x42   : > { %s4005_s21 = scalar_lea.vmem %s4359_s23, 64  ;;  %p4013_p0 = scmp.lt.s32.totalorder %s4359_s23, %s4359_s23 }
  0x43   : > { %p4006_p11 = scmp.ne.s32.totalorder %s4359_s23, %s4005_s21  ;;  %p4014_p2 = scmp.lt.s32.totalorder %s4005_s21, %s4005_s21 }
  0x45   : > { %p4008_p12 = pnand %p4006_p11, %p4371_p9  ;;  %p4015_p3 = por %p4014_p2, %p4013_p0 }
  0x47   : > { %p4009_p13 = pneg %p4008_p12 }
  0x49   : > { %p4016_p6 = pnand %p4015_p3, %p4009_p13 }
  0x4b   : > { %4019 = shalt.err (!%p4016_p6)
}
  0x4c   : > { %3875 = dma.hbm_to_vmem [thread:$0]  (!%p4355_p7), %s5001_s4, 64, %s4359_s23, [#allocation13]  }
  0x4d   : > { %s5002_s6 = sld [smem:[#allocation34_spill]] }
  0x53   : > { %s4020_s30 = scalar_lea.hbm %s5002_s6, 16 }
  0x54   : > { %p4021_p8 = scmp.ne.s32.totalorder %s5002_s6, %s4020_s30  ;;  %p4027_p4 = scmp.lt.u32.totalorder %s4020_s30, %s5002_s6 }
  0x56   : > { %p4023_p10 = pnand %p4021_p8, %p4371_p9 }
  0x58   : > { %p4024_p1 = pneg %p4023_p10 }
  0x5a   : > { %p4029_p5 = pnand %p4027_p4, %p4024_p1 }
  0x5c   : > { %4032 = shalt.err (!%p4029_p5)
}
  0x5d   : > { %s4033_s23 = scalar_lea.vmem %s4361_s26, 16  ;;  %s4040_s21 = scalar_lea.vmem %s4361_s26, 32 }
  0x5e   : > { %p4034_p11 = scmp.ne.s32.totalorder %s4361_s26, %s4033_s23  ;;  %p4041_p0 = scmp.lt.s32.totalorder %s4361_s26, %s4361_s26 }
  0x5f   : > { %p4042_p2 = scmp.lt.s32.totalorder %s4040_s21, %s4033_s23 }
  0x60   : > { %p4036_p12 = pnand %p4034_p11, %p4371_p9 }
  0x61   : > { %p4043_p3 = por %p4042_p2, %p4041_p0 }
  0x62   : > { %p4037_p13 = pneg %p4036_p12 }
  0x64   : > { %p4044_p6 = pnand %p4043_p3, %p4037_p13 }
  0x66   : > { %4047 = shalt.err (!%p4044_p6)
}
  0x67   : > { %3878 = dma.hbm_to_vmem [thread:$0]  (!%p4355_p7), %s5002_s6, 16, %s4361_s26, [#allocation13]  }
  0x68   : > { %s4233_s28 = smov [#allocation15]   ;;  %s5003_s7 = sld [smem:[#allocation35_spill]] }
  0x69   : > { %s277_s29 = sshll.u32 %s4233_s28, 4  ;;  %s278_s29 = int_to_ptr.vmem [resolvable:$true] %s277_s29 }
  0x6e   : > { %s4048_s20 = scalar_lea.hbm %s5003_s7, 16 }
  0x6f   : > { %p4049_p8 = scmp.ne.s32.totalorder %s5003_s7, %s4048_s20  ;;  %p4055_p4 = scmp.lt.u32.totalorder %s4048_s20, %s5003_s7 }
  0x71   : > { %p4051_p10 = pnand %p4049_p8, %p4371_p9 }
  0x73   : > { %p4052_p1 = pneg %p4051_p10 }
  0x75   : > { %p4057_p5 = pnand %p4055_p4, %p4052_p1 }
  0x77   : > { %4060 = shalt.err (!%p4057_p5)
}
  0x78   : > { %s4061_s26 = scalar_lea.vmem %s278_s29, 16  ;;  %s4068_s8 = scalar_lea.vmem %s278_s29, 32 }
  0x79   : > { %p4062_p11 = scmp.ne.s32.totalorder %s278_s29, %s4061_s26  ;;  %p4069_p0 = scmp.lt.s32.totalorder %s278_s29, %s278_s29 }
  0x7a   : > { %p4070_p2 = scmp.lt.s32.totalorder %s4068_s8, %s4061_s26 }
  0x7b   : > { %p4064_p12 = pnand %p4062_p11, %p4371_p9 }
  0x7c   : > { %p4071_p3 = por %p4070_p2, %p4069_p0 }
  0x7d   : > { %p4065_p13 = pneg %p4064_p12 }
  0x7f   : > { %p4072_p6 = pnand %p4071_p3, %p4065_p13 }
  0x81   : > { %4075 = shalt.err (!%p4072_p6)
}
  0x82   : > { %3881 = dma.hbm_to_vmem [thread:$0]  (!%p4355_p7), %s5003_s7, 16, %s278_s29, [#allocation16]  }
  0x83   : > { %s38_s11 = sadd.s32 1, %s4224_s15  ;;  %s50_s30 = sadd.s32 1, %s4216_s13 }
  0x84   : > { %p39_p9 = scmp.ge.s32.totalorder %s38_s11, 4  ;;  %p57_p8 = scmp.ne.s32.totalorder %s4216_s13, %s4212_s12 }
  0x85   : > { %p58_p10 = scmp.eq.s32.totalorder %s4228_s16, 0  ;;  %p3893_p1 = scmp.lt.s32.totalorder %s4228_s16, 4 }
  0x86   : > { %s5018_s11 = smov (%p39_p9, %s38_s11), 0  ;;  %s4461_s24 = sand.u32 1, %s4216_s13  }
  0x87   : > { %5004 = sst [smem:[#allocation30_spill]] %s5018_s11  ;;  %p59_p4 = por %p58_p10, %p57_p8 }
  0x88   : > { %s46_s10 = ssub.s32 %s4224_s15, %s5018_s11  ;;  %s3472_s20 = sshll.u32 %s4461_s24, 6 }
  0x89   : > { %p48_p5 = scmp.eq.s32.totalorder %s46_s10, 0  ;;  %s3754_s22 = sshll.u32 %s4224_s15, 9 }
  0x8a   : > { %s5005_s0 = sld [smem:[#allocation31_spill]]  ;;  %s295_s26 = scalar_lea.vmem [#allocation7], %s3472_s20 }
  0x8b   : > { %s4468_s29 = scalar_select %p48_p5, %s4216_s13, %s50_s30  }
  0x8c   : > { %s305_s8 = sshll.u32 %s295_s26, 4  ;;  %p4479_p7 = pnand %p3893_p1, %p59_p4  ;;  %s4475_s8 = int_to_ptr.vmem [resolvable:$true] %s305_s8 }
  0x8d   : > { %s292_s28 = scalar_lea.sflag [#allocation8], %s4461_s24 }
  0x8e   : > { %p4078_p12 = pneg %p4479_p7 }
  0x90   : > { %s4473_s21 = scalar_lea.hbm %s5005_s0, %s3754_s22  ;;  %s4081_s22 = scalar_lea.hbm %s5005_s0, 4096 }
  0x91   : > { %s4076_s30 = scalar_lea.hbm %s4473_s21, 1024  ;;  %p4082_p2 = scmp.lt.u32.totalorder %s4473_s21, %s5005_s0 }
  0x92   : > { %p4077_p11 = scmp.ne.s32.totalorder %s4473_s21, %s4076_s30  ;;  %p4083_p3 = scmp.lt.u32.totalorder %s4081_s22, %s4076_s30 }
  0x93   : > { %p4085_p9 = scmp.lt.u32.totalorder %s4076_s30, %s4473_s21 }
  0x94   : > { %p4079_p13 = pnand %p4078_p12, %p4077_p11  ;;  %p4084_p6 = por %p4083_p3, %p4082_p2 }
  0x96   : > { %p4080_p0 = pneg %p4079_p13  ;;  %p4086_p8 = por %p4085_p9, %p4084_p6 }
  0x98   : > { %p4087_p10 = pnand %p4086_p8, %p4080_p0 }
  0x9a   : > { %4090 = shalt.err (!%p4087_p10)
}
  0x9b   : > { %s4091_s26 = scalar_lea.vmem %s4475_s8, 1024  ;;  %s4234_s10 = smov [#allocation7]  }
  0x9c   : > { %p4092_p1 = scmp.ne.s32.totalorder %s4475_s8, %s4091_s26  ;;  %s4096_s20 = sshll.u32 %s4234_s10, 4  ;;  %s4097_s20 = int_to_ptr.vmem [resolvable:$false] %s4096_s20 }
  0x9d   : > { %s4098_s25 = scalar_lea.vmem %s4097_s20, 2048  ;;  %p4099_p11 = scmp.lt.s32.totalorder %s4475_s8, %s4097_s20 }
  0x9e   : > { %p4094_p4 = pnand %p4092_p1, %p4078_p12  ;;  %p4100_p13 = scmp.lt.s32.totalorder %s4098_s25, %s4091_s26 }
  0xa0   : > { %p4095_p5 = pneg %p4094_p4  ;;  %p4101_p2 = por %p4100_p13, %p4099_p11 }
  0xa2   : > { %p4102_p3 = pnand %p4101_p2, %p4095_p5 }
  0xa4   : > { %4105 = shalt.err (!%p4102_p3)
}
  0xa5   : > { %s4235_s30 = smov 2048   ;;  %s4236_s22 = smov 512  }
  0xa6   : > { %s4237_s23 = smov 32   ;;  %s315_s26 = sand.u32 1, %s4228_s16  }
  0xa7   : > { %3885 = dma.hbm_to_vmem [thread:$0]  (!%p4479_p7), %s4473_s21, 1024, %s4475_s8, %s292_s28, %s4235_s30, %s4236_s22, %s4237_s23  }
  0xa8   : > { %s3475_s10 = sshll.u32 %s4461_s24, 11  ;;  %s3756_s20 = sshll.u32 %s4224_s15, 15 }
  0xa9   : > { %s319_s25 = scalar_lea.vmem [#allocation9], %s3475_s10  ;;  %s4519_s6 = scalar_lea.hbm %s4975_s1, %s3756_s20 }
  0xaa   : > { %s327_s0 = sshll.u32 %s319_s25, 4  ;;  %s4523_s7 = scalar_lea.sflag [#allocation10], %s315_s26  ;;  %s4521_s0 = int_to_ptr.vmem [resolvable:$true] %s327_s0 }
  0xab   : > { %s4106_s11 = scalar_lea.hbm %s4519_s6, 32768  ;;  %s4111_s2 = scalar_lea.hbm %s4975_s1, 131072 }
  0xac   : > { %p4107_p0 = scmp.ne.s32.totalorder %s4519_s6, %s4106_s11  ;;  %p4112_p8 = scmp.lt.u32.totalorder %s4519_s6, %s4975_s1 }
  0xad   : > { %p4113_p10 = scmp.lt.u32.totalorder %s4111_s2, %s4106_s11  ;;  %p4115_p4 = scmp.lt.u32.totalorder %s4106_s11, %s4519_s6 }
  0xae   : > { %p4109_p6 = pnand %p4107_p0, %p4078_p12 }
  0xaf   : > { %p4114_p1 = por %p4113_p10, %p4112_p8 }
  0xb0   : > { %p4110_p9 = pneg %p4109_p6 }
  0xb1   : > { %p4116_p5 = por %p4115_p4, %p4114_p1 }
  0xb3   : > { %p4117_p11 = pnand %p4116_p5, %p4110_p9 }
  0xb5   : > { %4120 = shalt.err (!%p4117_p11)
}
  0xb6   : > { %s4121_s28 = scalar_lea.vmem %s4521_s0, 32768  ;;  %s4238_s30 = smov [#allocation9]  }
  0xb7   : > { %p4122_p13 = scmp.ne.s32.totalorder %s4521_s0, %s4121_s28  ;;  %s4126_s26 = sshll.u32 %s4238_s30, 4  ;;  %s4127_s26 = int_to_ptr.vmem [resolvable:$false] %s4126_s26 }
  0xb8   : > { %s4128_s10 = scalar_lea.vmem %s4127_s26, 65536  ;;  %p4129_p0 = scmp.lt.s32.totalorder %s4521_s0, %s4127_s26 }
  0xb9   : > { %p4124_p2 = pnand %p4122_p13, %p4078_p12  ;;  %p4130_p6 = scmp.lt.s32.totalorder %s4128_s10, %s4121_s28 }
  0xbb   : > { %p4125_p3 = pneg %p4124_p2  ;;  %p4131_p8 = por %p4130_p6, %p4129_p0 }
  0xbd   : > { %p4132_p10 = pnand %p4131_p8, %p4125_p3 }
  0xbf   : > { %4135 = shalt.err (!%p4132_p10)
}
  0xc0   : > { %3888 = dma.hbm_to_vmem [thread:$0]  (!%p4479_p7), %s4519_s6, 32768, %s4521_s0, %s4523_s7, %s4236_s22, %s4236_s22, %s4237_s23  }
  0xc1   : > { %p5007_p12 = scmp.ne.s32.totalorder %s4997_s19, 0 }
  0xc2   : > { %s341_s11 = sand.u32 (!%p5007_p12), 1, %s4212_s12   ;;  %p5008_p9 = scmp.ne.s32.totalorder (!%p5007_p12), %s4996_s18, 0 }
  0xc3   : > { %339 = sbr.rel (%p5007_p12) target bundleno = 1626 (0x65a), region = 48  ;;  %s3480_s20 = sshll.u32 (!%p5007_p12), %s341_s11, 6 }
  0xc4   : > { %s342_s25 = scalar_lea.sflag (!%p5007_p12), [#allocation8], %s341_s11  ;;  %s4555_s24 = scalar_lea.vmem (!%p5007_p12), [#allocation7], %s3480_s20 }
  0xca   : > { %4183 = dma.done.wait (%p5008_p9), %s342_s25, 1024  }
  0xcb   : > { %4185 = vsyncadd (%p5008_p9), %s342_s25, 4294966272  ;;  %s5009_s27 = sadd.s32 4294967295, %s4228_s16   ;;  %s3481_s0 = sshll.u32 %s341_s11, 11 }
  0xcc   : > { %s350_s21 = sand.u32 1, %s5009_s27   ;;  %s4563_s7 = scalar_lea.vmem [#allocation9], %s3481_s0 }
  0xcd   : > { %s351_s6 = scalar_lea.sflag [#allocation10], %s350_s21 }
  0xce   : > { %4187 = dma.done.wait (%p5008_p9), %s351_s6, 32768  }
  0xcf   : > { %4189 = vsyncadd (%p5008_p9), %s351_s6, 4294934528  ;;  %p5010_p7 = scmp.ne.s32.totalorder %s4995_s17, 0 }
  0xd1   : > { %4191 = dma.done.wait (%p5010_p7), [#allocation10], 128  }
  0xd2   : > { %4193 = vsyncadd (%p5010_p7), [#allocation10], 4294967168 }
  0xd3   : > { %4195 = dma.done.wait (%p5010_p7), [#allocation13], 80  }
  0xd4   : > { %4197 = vsyncadd (%p5010_p7), [#allocation13], 4294967216 }
  0xd5   : > { %4199 = dma.done.wait (%p5010_p7), [#allocation16], 16  }
  0xd6   : > { %4201 = vsyncadd (%p5010_p7), [#allocation16], 4294967280  ;;  %p3486_p1 = scmp.ne.s32.totalorder %s4220_s14, 0 }
  0xd8   : > { %419 = sbr.rel (%p3486_p1) target bundleno = 251 (0xfb), region = 76 }
  0xdf   : > { %s4582_s18 = sld [smem:[#allocation0]]   ;;  %v4239_v1 = vmov 0.0   ;;  %s4240_s17 = smov [#allocation3]  }
  0xe0   : > { %420 = vst [vmem:[#allocation2] sm:$0xff] %v4239_v1  ;;  %421 = vst [vmem:[#allocation2 + $0x8] sm:$0xff] %v4239_v1  ;;  %s448_s19 = sshll.u32 %s4240_s17, 4  ;;  %s4241_s22 = smov 512   ;;  %s449_s19 = int_to_ptr.vmem [resolvable:$true] %s448_s19 }
  0xe1   : > { %422 = vst [vmem:[#allocation2 + $0x10] sm:$0xff] %v4239_v1  ;;  %423 = vst [vmem:[#allocation2 + $0x18] sm:$0xff] %v4239_v1  ;;  %452 = sst [smem:[#allocation18]] %s4241_s22  ;;  %s4242_s23 = smov 4  }
  0xe2   : > { %424 = vst [vmem:[#allocation2 + $0x20] sm:$0xff] %v4239_v1  ;;  %425 = vst [vmem:[#allocation2 + $0x28] sm:$0xff] %v4239_v1  ;;  %454 = sst [smem:[#allocation18 + $0x1]] %s4241_s22  ;;  %s4243_s2 = smov 64  }
  0xe3   : > { %426 = vst [vmem:[#allocation2 + $0x30] sm:$0xff] %v4239_v1  ;;  %427 = vst [vmem:[#allocation2 + $0x38] sm:$0xff] %v4239_v1  ;;  %456 = sst [smem:[#allocation18 + $0x2]] %s4242_s23  ;;  %s4244_s8 = smov 128  }
  0xe4   : > { %428 = vst [vmem:[#allocation2 + $0x40] sm:$0xff] %v4239_v1  ;;  %429 = vst [vmem:[#allocation2 + $0x48] sm:$0xff] %v4239_v1  ;;  %458 = sst [smem:[#allocation18 + $0x3]] %s4243_s2  ;;  %s4245_s30 = smov 2  }
  0xe5   : > { %430 = vst [vmem:[#allocation2 + $0x50] sm:$0xff] %v4239_v1  ;;  %431 = vst [vmem:[#allocation2 + $0x58] sm:$0xff] %v4239_v1  ;;  %s3487_s4 = sshll.u32 %s4582_s18, 26  ;;  %460 = sst [smem:[#allocation18 + $0x4]] %s4244_s8 }
  0xe6   : > { %432 = vst [vmem:[#allocation2 + $0x60] sm:$0xff] %v4239_v1  ;;  %433 = vst [vmem:[#allocation2 + $0x68] sm:$0xff] %v4239_v1  ;;  %s3488_s28 = sadd.s32 134217728, %s3487_s4  ;;  %462 = sst [smem:[#allocation18 + $0x5]] %s4245_s30 }
  0xe7   : > { %434 = vst [vmem:[#allocation2 + $0x70] sm:$0xff] %v4239_v1  ;;  %435 = vst [vmem:[#allocation2 + $0x78] sm:$0xff] %v4239_v1  ;;  %s4246_s26 = smov 256   ;;  %466 = sst [smem:[#allocation18 + $0x7]] %s4243_s2 }
  0xe8   : > { %464 = sst [smem:[#allocation18 + $0x6]] %s4246_s26  ;;  %s4247_s10 = smov [#allocation5]  }
  0xe9   : > { %468 = sst [smem:[#allocation18 + $0x8]] %s4242_s23  ;;  %s4248_s11 = smov [#allocation17]  }
  0xea   : > { %470 = dma.general %s4977_s3, 32768, %s449_s19, %s4247_s10, %s4248_s11, [#allocation18], %s3488_s28, 0  }
  0xeb   : > { %s4249_s27 = smov [#allocation4]   ;;  %s4136_s18 = scalar_lea.hbm %s4979_s5, 4096 }
  0xec   : > { %s479_s21 = sshll.u32 %s4249_s27, 4  ;;  %p4137_p4 = scmp.ne.s32.totalorder %s4979_s5, %s4136_s18  ;;  %s480_s21 = int_to_ptr.vmem [resolvable:$true] %s479_s21 }
  0xed   : > { %p4140_p5 = scmp.lt.u32.totalorder %s4136_s18, %s4979_s5 }
  0xef   : > { %p4142_p11 = pnand %p4140_p5, %p4137_p4 }
  0xf1   : > { %4145 = shalt.err (!%p4142_p11)  }
  0xf2   : > { %s4146_s23 = scalar_lea.vmem %s480_s21, 4096  ;;  %p4151_p2 = scmp.lt.s32.totalorder %s480_s21, %s480_s21 }
  0xf3   : > { %p4147_p13 = scmp.ne.s32.totalorder %s480_s21, %s4146_s23  ;;  %p4152_p3 = scmp.lt.s32.totalorder %s4146_s23, %s4146_s23 }
  0xf5   : > { %p4153_p0 = por %p4152_p3, %p4151_p2 }
  0xf7   : > { %p4154_p6 = pnand %p4153_p0, %p4147_p13 }
  0xf9   : > { %4157 = shalt.err (!%p4154_p6)  }
  0xfa   : > { %482 = dma.hbm_to_vmem [thread:$0]  %s4979_s5, 4096, %s480_s21, [#allocation5 + $0x1] }
  0xfb PF: > { %v511_v2 = vld [vmem:[%s4563_s7] sm:$0xff]  ;;  %v512_v4 = vld [vmem:[%s4563_s7 + $0x8] sm:$0xff]  ;;  %p3745_p8 = scmp.ne.s32.totalorder %s4220_s14, 3 }
  0xfc   : > { %v515_v3 = vld [vmem:[%s4563_s7 + $0x20] sm:$0xff]  ;;  %v516_v6 = vld [vmem:[%s4563_s7 + $0x28] sm:$0xff] }
  0xfd   : > { %v3490_v5 = vcombine.high %v511_v2, %v515_v3  ;;  %v3489_v7 = vcombine.low %v511_v2, %v515_v3  ;;  %v519_v8 = vld [vmem:[%s4563_s7 + $0x40] sm:$0xff]  ;;  %v3492_v10 = vcombine.high %v512_v4, %v516_v6  ;;  %v3491_v11 = vcombine.low %v512_v4, %v516_v6  ;;  %v520_v13 = vld [vmem:[%s4563_s7 + $0x48] sm:$0xff] }
  0xfe   : > { %v523_v9 = vld [vmem:[%s4563_s7 + $0x60] sm:$0xff]  ;;  %v524_v14 = vld [vmem:[%s4563_s7 + $0x68] sm:$0xff] }
  0xff   : > { %v3498_v12 = vcombine.high %v519_v8, %v523_v9  ;;  %v527_v15 = vld [vmem:[%s4563_s7 + $0x80] sm:$0xff]  ;;  %2047 = vmatprep.subr.bf16.mxu0 %v3490_v5  ;;  %v3500_v16 = vcombine.high %v520_v13, %v524_v14  ;;  %v528_v18 = vld [vmem:[%s4563_s7 + $0x88] sm:$0xff]  ;;  %2133 = vmatprep.subr.bf16.mxu1 %v3492_v10  ;;  %v3497_v20 = vcombine.low %v519_v8, %v523_v9 }
 0x100   : > { %v531_v17 = vld [vmem:[%s4563_s7 + $0xa0] sm:$0xff]  ;;  %v532_v19 = vld [vmem:[%s4563_s7 + $0xa8] sm:$0xff]  ;;  %2048 = vmatpush1.bf16.msra.mxu0 %v3489_v7  ;;  %2134 = vmatpush1.bf16.msra.mxu1 %v3491_v11  ;;  %v3499_v21 = vcombine.low %v520_v13, %v524_v14 }
 0x101   : > { %2049 = vmatprep.subr.bf16.mxu0 %v3498_v12  ;;  %v3506_v22 = vcombine.high %v527_v15, %v531_v17  ;;  %2135 = vmatprep.subr.bf16.mxu1 %v3500_v16  ;;  %v3508_v23 = vcombine.high %v528_v18, %v532_v19  ;;  %v535_v24 = vld [vmem:[%s4563_s7 + $0xc0] sm:$0xff]  ;;  %v536_v26 = vld [vmem:[%s4563_s7 + $0xc8] sm:$0xff]  ;;  %v3505_v28 = vcombine.low %v527_v15, %v531_v17 }
 0x102   : > { %v539_v25 = vld [vmem:[%s4563_s7 + $0xe0] sm:$0xff]  ;;  %v540_v27 = vld [vmem:[%s4563_s7 + $0xe8] sm:$0xff]  ;;  %v3507_v29 = vcombine.low %v528_v18, %v532_v19 }
 0x103   : > { %v3514_v30 = vcombine.high %v535_v24, %v539_v25  ;;  %v3516_v31 = vcombine.high %v536_v26, %v540_v27  ;;  %v543_v32 = vld [vmem:[%s4563_s7 + $0x100] sm:$0xff]  ;;  %v544_v34 = vld [vmem:[%s4563_s7 + $0x108] sm:$0xff]  ;;  %v3513_v36 = vcombine.low %v535_v24, %v539_v25  ;;  %v3515_v37 = vcombine.low %v536_v26, %v540_v27 }
 0x104   : > { %2050 = vmatpush1.bf16.msra.mxu0 %v3497_v20  ;;  %2136 = vmatpush1.bf16.msra.mxu1 %v3499_v21  ;;  %v547_v33 = vld [vmem:[%s4563_s7 + $0x120] sm:$0xff]  ;;  %v548_v35 = vld [vmem:[%s4563_s7 + $0x128] sm:$0xff] }
 0x105   : > { %2051 = vmatprep.subr.bf16.mxu0 %v3506_v22  ;;  %2137 = vmatprep.subr.bf16.mxu1 %v3508_v23  ;;  %v3522_v38 = vcombine.high %v543_v32, %v547_v33  ;;  %v3524_v39 = vcombine.high %v544_v34, %v548_v35  ;;  %v551_v40 = vld [vmem:[%s4563_s7 + $0x140] sm:$0xff]  ;;  %v552_v42 = vld [vmem:[%s4563_s7 + $0x148] sm:$0xff]  ;;  %v3521_v44 = vcombine.low %v543_v32, %v547_v33 }
 0x106   : > { %v555_v41 = vld [vmem:[%s4563_s7 + $0x160] sm:$0xff]  ;;  %v556_v43 = vld [vmem:[%s4563_s7 + $0x168] sm:$0xff]  ;;  %v3523_v45 = vcombine.low %v544_v34, %v548_v35 }
 0x107   : > { %v3530_v46 = vcombine.high %v551_v40, %v555_v41  ;;  %v3532_v47 = vcombine.high %v552_v42, %v556_v43  ;;  %v559_v48 = vld [vmem:[%s4563_s7 + $0x180] sm:$0xff]  ;;  %v560_v50 = vld [vmem:[%s4563_s7 + $0x188] sm:$0xff]  ;;  %v3529_v52 = vcombine.low %v551_v40, %v555_v41  ;;  %v3531_v53 = vcombine.low %v552_v42, %v556_v43 }
 0x108   : > { %2052 = vmatpush1.bf16.msra.mxu0 %v3505_v28  ;;  %2138 = vmatpush1.bf16.msra.mxu1 %v3507_v29  ;;  %v563_v49 = vld [vmem:[%s4563_s7 + $0x1a0] sm:$0xff]  ;;  %v564_v51 = vld [vmem:[%s4563_s7 + $0x1a8] sm:$0xff] }
 0x109   : > { %2053 = vmatprep.subr.bf16.mxu0 %v3514_v30  ;;  %2139 = vmatprep.subr.bf16.mxu1 %v3516_v31  ;;  %v3538_v54 = vcombine.high %v559_v48, %v563_v49  ;;  %v500_v55 = vld [vmem:[%s4555_s24 + $0x8] sm:$0xff]  ;;  %v3540_v57 = vcombine.high %v560_v50, %v564_v51  ;;  %v567_v58 = vld [vmem:[%s4563_s7 + $0x1c0] sm:$0xff]  ;;  %v3537_v63 = vcombine.low %v559_v48, %v563_v49 }
 0x10a   : > { %v504_v56 = vld [vmem:[%s4555_s24 + $0x28] sm:$0xff]  ;;  %v571_v59 = vld [vmem:[%s4563_s7 + $0x1e0] sm:$0xff]  ;;  %v3539_v0 = vcombine.low %v560_v50, %v564_v51 }
 0x10b   : > { %v4632_v60 = vpack.c.bf16 %v504_v56, %v500_v55  ;;  %v568_v61 = vld [vmem:[%s4563_s7 + $0x1c8] sm:$0xff]  ;;  %v3546_v1 = vcombine.high %v567_v58, %v571_v59  ;;  %v575_v3 = vld [vmem:[%s4563_s7 + $0x200] sm:$0xff]  ;;  %v3545_v7 = vcombine.low %v567_v58, %v571_v59 }
 0x10c   : > { %2054 = vmatpush1.bf16.msra.mxu0 %v3513_v36  ;;  %2140 = vmatpush1.bf16.msra.mxu1 %v3515_v37  ;;  %v572_v62 = vld [vmem:[%s4563_s7 + $0x1e8] sm:$0xff]  ;;  %v579_v4 = vld [vmem:[%s4563_s7 + $0x220] sm:$0xff] }
 0x10d   : > { %2055 = vmatprep.subr.bf16.mxu0 %v3522_v38  ;;  %2141 = vmatprep.subr.bf16.mxu1 %v3524_v39  ;;  %v3548_v2 = vcombine.high %v568_v61, %v572_v62  ;;  %v576_v5 = vld [vmem:[%s4563_s7 + $0x208] sm:$0xff]  ;;  %v3547_v8 = vcombine.low %v568_v61, %v572_v62  ;;  %v3554_v9 = vcombine.high %v575_v3, %v579_v4  ;;  %v583_v11 = vld [vmem:[%s4563_s7 + $0x240] sm:$0xff] }
 0x10e   : > { %2079 = vmatprep.mubr.bf16.mxu0 %v4632_v60  ;;  %2165 = vmatprep.mubr.bf16.mxu1 %v4632_v60  ;;  %v580_v6 = vld [vmem:[%s4563_s7 + $0x228] sm:$0xff]  ;;  %v587_v12 = vld [vmem:[%s4563_s7 + $0x260] sm:$0xff]  ;;  %v3553_v15 = vcombine.low %v575_v3, %v579_v4 }
 0x10f   : > { %v3556_v10 = vcombine.high %v576_v5, %v580_v6  ;;  %v584_v13 = vld [vmem:[%s4563_s7 + $0x248] sm:$0xff]  ;;  %v3555_v16 = vcombine.low %v576_v5, %v580_v6  ;;  %v3562_v17 = vcombine.high %v583_v11, %v587_v12  ;;  %v591_v19 = vld [vmem:[%s4563_s7 + $0x280] sm:$0xff]  ;;  %v3561_v23 = vcombine.low %v583_v11, %v587_v12 }
 0x110   : > { %2056 = vmatpush1.bf16.msra.mxu0 %v3521_v44  ;;  %2142 = vmatpush1.bf16.msra.mxu1 %v3523_v45  ;;  %v588_v14 = vld [vmem:[%s4563_s7 + $0x268] sm:$0xff]  ;;  %v595_v20 = vld [vmem:[%s4563_s7 + $0x2a0] sm:$0xff] }
 0x111   : > { %2057 = vmatprep.subr.bf16.mxu0 %v3530_v46  ;;  %2143 = vmatprep.subr.bf16.mxu1 %v3532_v47  ;;  %v3564_v18 = vcombine.high %v584_v13, %v588_v14  ;;  %v592_v21 = vld [vmem:[%s4563_s7 + $0x288] sm:$0xff]  ;;  %v3563_v24 = vcombine.low %v584_v13, %v588_v14  ;;  %v3570_v25 = vcombine.high %v591_v19, %v595_v20  ;;  %v599_v27 = vld [vmem:[%s4563_s7 + $0x2c0] sm:$0xff] }
 0x112   : > { %v596_v22 = vld [vmem:[%s4563_s7 + $0x2a8] sm:$0xff]  ;;  %v603_v28 = vld [vmem:[%s4563_s7 + $0x2e0] sm:$0xff]  ;;  %v3569_v31 = vcombine.low %v591_v19, %v595_v20  ;;  %v502_v19 = vld [vmem:[%s4555_s24 + $0x18] sm:$0xff] }
 0x113   : > { %v3572_v26 = vcombine.high %v592_v21, %v596_v22  ;;  %v600_v29 = vld [vmem:[%s4563_s7 + $0x2c8] sm:$0xff]  ;;  %v3571_v32 = vcombine.low %v592_v21, %v596_v22  ;;  %v3578_v33 = vcombine.high %v599_v27, %v603_v28  ;;  %v607_v35 = vld [vmem:[%s4563_s7 + $0x300] sm:$0xff]  ;;  %v3577_v39 = vcombine.low %v599_v27, %v603_v28  ;;  %v506_v20 = vld [vmem:[%s4555_s24 + $0x38] sm:$0xff] }
 0x114   : > { %2058 = vmatpush1.bf16.msra.mxu0 %v3529_v52  ;;  %2144 = vmatpush1.bf16.msra.mxu1 %v3531_v53  ;;  %v604_v30 = vld [vmem:[%s4563_s7 + $0x2e8] sm:$0xff]  ;;  %v611_v36 = vld [vmem:[%s4563_s7 + $0x320] sm:$0xff]  ;;  %v4686_v27 = vpack.c.bf16 %v506_v20, %v502_v19 }
 0x115   : > { %2059 = vmatprep.subr.bf16.mxu0 %v3538_v54  ;;  %2145 = vmatprep.subr.bf16.mxu1 %v3540_v57  ;;  %v3580_v34 = vcombine.high %v600_v29, %v604_v30  ;;  %v608_v37 = vld [vmem:[%s4563_s7 + $0x308] sm:$0xff]  ;;  %v3579_v40 = vcombine.low %v600_v29, %v604_v30  ;;  %v3586_v41 = vcombine.high %v607_v35, %v611_v36  ;;  %v615_v43 = vld [vmem:[%s4563_s7 + $0x340] sm:$0xff] }
 0x116   : > { %v612_v38 = vld [vmem:[%s4563_s7 + $0x328] sm:$0xff]  ;;  %v619_v44 = vld [vmem:[%s4563_s7 + $0x360] sm:$0xff]  ;;  %v3585_v47 = vcombine.low %v607_v35, %v611_v36 }
 0x117   : > { %v3588_v42 = vcombine.high %v608_v37, %v612_v38  ;;  %v616_v45 = vld [vmem:[%s4563_s7 + $0x348] sm:$0xff]  ;;  %v3587_v48 = vcombine.low %v608_v37, %v612_v38  ;;  %v3594_v49 = vcombine.high %v615_v43, %v619_v44  ;;  %v623_v51 = vld [vmem:[%s4563_s7 + $0x380] sm:$0xff]  ;;  %v3593_v55 = vcombine.low %v615_v43, %v619_v44 }
 0x118   : > { %2060 = vmatpush1.bf16.msra.mxu0 %v3537_v63  ;;  %2146 = vmatpush1.bf16.msra.mxu1 %v3539_v0  ;;  %v620_v46 = vld [vmem:[%s4563_s7 + $0x368] sm:$0xff]  ;;  %v627_v52 = vld [vmem:[%s4563_s7 + $0x3a0] sm:$0xff] }
 0x119   : > { %2061 = vmatprep.subr.bf16.mxu0 %v3546_v1  ;;  %2147 = vmatprep.subr.bf16.mxu1 %v3548_v2  ;;  %v3596_v50 = vcombine.high %v616_v45, %v620_v46  ;;  %v624_v53 = vld [vmem:[%s4563_s7 + $0x388] sm:$0xff]  ;;  %v3595_v56 = vcombine.low %v616_v45, %v620_v46  ;;  %v3602_v57 = vcombine.high %v623_v51, %v627_v52  ;;  %v631_v59 = vld [vmem:[%s4563_s7 + $0x3c0] sm:$0xff] }
 0x11a   : > { %v628_v54 = vld [vmem:[%s4563_s7 + $0x3a8] sm:$0xff]  ;;  %v635_v61 = vld [vmem:[%s4563_s7 + $0x3e0] sm:$0xff]  ;;  %v3601_v0 = vcombine.low %v623_v51, %v627_v52 }
 0x11b   : > { %v3604_v58 = vcombine.high %v624_v53, %v628_v54  ;;  %v632_v62 = vld [vmem:[%s4563_s7 + $0x3c8] sm:$0xff]  ;;  %v3603_v1 = vcombine.low %v624_v53, %v628_v54  ;;  %v3610_v2 = vcombine.high %v631_v59, %v635_v61  ;;  %v639_v4 = vld [vmem:[%s4563_s7 + $0x400] sm:$0xff] }
 0x11c   : > { %2062 = vmatpush1.bf16.msra.mxu0 %v3545_v7  ;;  %2148 = vmatpush1.bf16.msra.mxu1 %v3547_v8  ;;  %v636_v63 = vld [vmem:[%s4563_s7 + $0x3e8] sm:$0xff]  ;;  %v643_v5 = vld [vmem:[%s4563_s7 + $0x420] sm:$0xff]  ;;  %v3609_v8 = vcombine.low %v631_v59, %v635_v61 }
 0x11d   : > { %2063 = vmatprep.subr.bf16.mxu0 %v3554_v9  ;;  %2149 = vmatprep.subr.bf16.mxu1 %v3556_v10  ;;  %v3612_v3 = vcombine.high %v632_v62, %v636_v63  ;;  %v640_v6 = vld [vmem:[%s4563_s7 + $0x408] sm:$0xff]  ;;  %v499_v9 = vld [vmem:[%s4555_s24] sm:$0xff]  ;;  %v3611_v11 = vcombine.low %v632_v62, %v636_v63  ;;  %v3618_v12 = vcombine.high %v639_v4, %v643_v5 }
 0x11e   : > { %v644_v7 = vld [vmem:[%s4563_s7 + $0x428] sm:$0xff]  ;;  %v503_v10 = vld [vmem:[%s4555_s24 + $0x20] sm:$0xff]  ;;  %v3617_v21 = vcombine.low %v639_v4, %v643_v5 }
 0x11f   : > { %v3620_v13 = vcombine.high %v640_v6, %v644_v7  ;;  %v647_v14 = vld [vmem:[%s4563_s7 + $0x440] sm:$0xff]  ;;  %v3619_v22 = vcombine.low %v640_v6, %v644_v7  ;;  %v656_v28 = vld [vmem:[%s4563_s7 + $0x488] sm:$0xff] }
 0x120   : > { %2064 = vmatpush1.bf16.msra.mxu0 %v3553_v15  ;;  %2150 = vmatpush1.bf16.msra.mxu1 %v3555_v16  ;;  %v651_v15 = vld [vmem:[%s4563_s7 + $0x460] sm:$0xff]  ;;  %v648_v16 = vld [vmem:[%s4563_s7 + $0x448] sm:$0xff] }
 0x121   : > { %2065 = vmatprep.subr.bf16.mxu0 %v3562_v17  ;;  %2151 = vmatprep.subr.bf16.mxu1 %v3564_v18  ;;  %v4679_v17 = vpack.c.bf16 %v503_v10, %v499_v9  ;;  %v652_v18 = vld [vmem:[%s4563_s7 + $0x468] sm:$0xff]  ;;  %v3625_v30 = vcombine.low %v647_v14, %v651_v15  ;;  %v667_v35 = vld [vmem:[%s4563_s7 + $0x4e0] sm:$0xff] }
 0x122   : > { %v660_v29 = vld [vmem:[%s4563_s7 + $0x4a8] sm:$0xff]  ;;  %v675_v43 = vld [vmem:[%s4563_s7 + $0x520] sm:$0xff] }
 0x123   : > { %v664_v36 = vld [vmem:[%s4563_s7 + $0x4c8] sm:$0xff]  ;;  %v683_v51 = vld [vmem:[%s4563_s7 + $0x560] sm:$0xff] }
 0x124   : > { %2066 = vmatpush1.bf16.msra.mxu0 %v3561_v23  ;;  %2152 = vmatpush1.bf16.msra.mxu1 %v3563_v24  ;;  %v3626_v23 = vcombine.high %v647_v14, %v651_v15  ;;  %v3628_v24 = vcombine.high %v648_v16, %v652_v18  ;;  %v668_v37 = vld [vmem:[%s4563_s7 + $0x4e8] sm:$0xff]  ;;  %v691_v59 = vld [vmem:[%s4563_s7 + $0x5a0] sm:$0xff] }
 0x125   : > { %2067 = vmatprep.subr.bf16.mxu0 %v3570_v25  ;;  %2153 = vmatprep.subr.bf16.mxu1 %v3572_v26  ;;  %v655_v25 = vld [vmem:[%s4563_s7 + $0x480] sm:$0xff]  ;;  %v672_v44 = vld [vmem:[%s4563_s7 + $0x508] sm:$0xff] }
 0x126   : > { %v659_v26 = vld [vmem:[%s4563_s7 + $0x4a0] sm:$0xff]  ;;  %v676_v45 = vld [vmem:[%s4563_s7 + $0x528] sm:$0xff] }
 0x127   : > { %v3633_v38 = vcombine.low %v655_v25, %v659_v26  ;;  %v680_v52 = vld [vmem:[%s4563_s7 + $0x548] sm:$0xff]  ;;  %v699_v4 = vld [vmem:[%s4563_s7 + $0x5e0] sm:$0xff] }
 0x128   : > { %2068 = vmatpush1.bf16.msra.mxu0 %v3569_v31  ;;  %2154 = vmatpush1.bf16.msra.mxu1 %v3571_v32  ;;  %v3627_v31 = vcombine.low %v648_v16, %v652_v18  ;;  %v3634_v32 = vcombine.high %v655_v25, %v659_v26  ;;  %v684_v53 = vld [vmem:[%s4563_s7 + $0x568] sm:$0xff]  ;;  %v711_v20 = vld [vmem:[%s4563_s7 + $0x640] sm:$0xff] }
 0x129   : > { %2069 = vmatprep.subr.bf16.mxu0 %v3578_v33  ;;  %2155 = vmatprep.subr.bf16.mxu1 %v3580_v34  ;;  %v3636_v33 = vcombine.high %v656_v28, %v660_v29  ;;  %v663_v34 = vld [vmem:[%s4563_s7 + $0x4c0] sm:$0xff]  ;;  %v688_v61 = vld [vmem:[%s4563_s7 + $0x588] sm:$0xff] }
 0x12a   : > { %v3641_v46 = vcombine.low %v663_v34, %v667_v35  ;;  %v692_v62 = vld [vmem:[%s4563_s7 + $0x5a8] sm:$0xff] }
 0x12b   : > { %v696_v5 = vld [vmem:[%s4563_s7 + $0x5c8] sm:$0xff] }
 0x12c   : > { %2070 = vmatpush1.bf16.msra.mxu0 %v3577_v39  ;;  %2156 = vmatpush1.bf16.msra.mxu1 %v3579_v40  ;;  %v3635_v39 = vcombine.low %v656_v28, %v660_v29  ;;  %v3642_v40 = vcombine.high %v663_v34, %v667_v35  ;;  %v700_v6 = vld [vmem:[%s4563_s7 + $0x5e8] sm:$0xff]  ;;  %v719_v29 = vld [vmem:[%s4563_s7 + $0x680] sm:$0xff] }
 0x12d   : > { %2071 = vmatprep.subr.bf16.mxu0 %v3586_v41  ;;  %2157 = vmatprep.subr.bf16.mxu1 %v3588_v42  ;;  %v3644_v41 = vcombine.high %v664_v36, %v668_v37  ;;  %v671_v42 = vld [vmem:[%s4563_s7 + $0x500] sm:$0xff]  ;;  %v3676_v10 = vcombine.high %v696_v5, %v700_v6  ;;  %v708_v14 = vld [vmem:[%s4563_s7 + $0x628] sm:$0xff]  ;;  %v3675_v16 = vcombine.low %v696_v5, %v700_v6 }
 0x12e   : > { %v3649_v54 = vcombine.low %v671_v42, %v675_v43  ;;  %v759_v6 = vld [vmem:[%s4563_s7 + $0x7c0] sm:$0xff] }
 0x130   : > { %2072 = vmatpush1.bf16.msra.mxu0 %v3585_v47  ;;  %2158 = vmatpush1.bf16.msra.mxu1 %v3587_v48  ;;  %v3643_v47 = vcombine.low %v664_v36, %v668_v37  ;;  %v3650_v48 = vcombine.high %v671_v42, %v675_v43  ;;  %v727_v37 = vld [vmem:[%s4563_s7 + $0x6c0] sm:$0xff] }
 0x131   : > { %2073 = vmatprep.subr.bf16.mxu0 %v3594_v49  ;;  %2159 = vmatprep.subr.bf16.mxu1 %v3596_v50  ;;  %v3652_v49 = vcombine.high %v672_v44, %v676_v45  ;;  %v679_v50 = vld [vmem:[%s4563_s7 + $0x540] sm:$0xff] }
 0x132   : > { %v3657_v63 = vcombine.low %v679_v50, %v683_v51 }
 0x134   : > { %2074 = vmatpush1.bf16.msra.mxu0 %v3593_v55  ;;  %2160 = vmatpush1.bf16.msra.mxu1 %v3595_v56  ;;  %v3651_v55 = vcombine.low %v672_v44, %v676_v45  ;;  %v3658_v56 = vcombine.high %v679_v50, %v683_v51  ;;  %v735_v45 = vld [vmem:[%s4563_s7 + $0x700] sm:$0xff] }
 0x135   : > { %2075 = vmatprep.subr.bf16.mxu0 %v3602_v57  ;;  %2161 = vmatprep.subr.bf16.mxu1 %v3604_v58  ;;  %v3660_v57 = vcombine.high %v680_v52, %v684_v53  ;;  %v687_v58 = vld [vmem:[%s4563_s7 + $0x580] sm:$0xff] }
 0x136   : > { %v3665_v7 = vcombine.low %v687_v58, %v691_v59 }
 0x138   : > { %2076 = vmatpush1.bf16.msra.mxu0 %v3601_v0  ;;  %2162 = vmatpush1.bf16.msra.mxu1 %v3603_v1  ;;  %v3659_v0 = vcombine.low %v680_v52, %v684_v53  ;;  %v3666_v1 = vcombine.high %v687_v58, %v691_v59  ;;  %v743_v53 = vld [vmem:[%s4563_s7 + $0x740] sm:$0xff] }
 0x139   : > { %2077 = vmatprep.subr.bf16.mxu0 %v3610_v2  ;;  %2163 = vmatprep.subr.bf16.mxu1 %v3612_v3  ;;  %v3668_v2 = vcombine.high %v688_v61, %v692_v62  ;;  %v695_v3 = vld [vmem:[%s4563_s7 + $0x5c0] sm:$0xff] }
 0x13a   : > { %v3674_v9 = vcombine.high %v695_v3, %v699_v4  ;;  %v3673_v15 = vcombine.low %v695_v3, %v699_v4 }
 0x13c   : > { %2078 = vmatpush1.bf16.msra.mxu0 %v3609_v8  ;;  %2164 = vmatpush1.bf16.msra.mxu1 %v3611_v11  ;;  %v3667_v8 = vcombine.low %v688_v61, %v692_v62  ;;  %v703_v11 = vld [vmem:[%s4563_s7 + $0x600] sm:$0xff] }
 0x13d   : > { %2090 = vmatprep.subr.bf16.mxu0 %v3618_v12  ;;  %2176 = vmatprep.subr.bf16.mxu1 %v3620_v13  ;;  %v707_v12 = vld [vmem:[%s4563_s7 + $0x620] sm:$0xff]  ;;  %v704_v13 = vld [vmem:[%s4563_s7 + $0x608] sm:$0xff] }
 0x13e   : > { %v3682_v18 = vcombine.high %v703_v11, %v707_v12  ;;  %v3684_v19 = vcombine.high %v704_v13, %v708_v14  ;;  %v3683_v25 = vcombine.low %v704_v13, %v708_v14  ;;  %v751_v62 = vld [vmem:[%s4563_s7 + $0x780] sm:$0xff]  ;;  %v513_v14 = vld [vmem:[%s4563_s7 + $0x10] sm:$0xff] }
 0x13f   : > { %2080 = vmatmul.mubr.bf16.vlgmr.msra.gmra.mrb[0].mxu0 %v4679_v17  ;;  %2166 = vmatmul.mubr.bf16.vlgmr.msra.gmra.mrb[0].mxu1 %v4679_v17 }
 0x140   : > { %2091 = vmatpush1.bf16.msra.mxu0 %v3617_v21  ;;  %2177 = vmatpush1.bf16.msra.mxu1 %v3619_v22  ;;  %v715_v21 = vld [vmem:[%s4563_s7 + $0x660] sm:$0xff]  ;;  %v712_v22 = vld [vmem:[%s4563_s7 + $0x648] sm:$0xff] }
 0x141   : > { %2092 = vmatprep.subr.bf16.mxu0 %v3626_v23  ;;  %2178 = vmatprep.subr.bf16.mxu1 %v3628_v24  ;;  %v716_v23 = vld [vmem:[%s4563_s7 + $0x668] sm:$0xff]  ;;  %v3681_v24 = vcombine.low %v703_v11, %v707_v12  ;;  %v3690_v26 = vcombine.high %v711_v20, %v715_v21 }
 0x142   : > { %2122 = vmatprep.mubr.bf16.mxu0 %v4686_v27  ;;  %2208 = vmatprep.mubr.bf16.mxu1 %v4686_v27  ;;  %v3692_v28 = vcombine.high %v712_v22, %v716_v23  ;;  %v3691_v34 = vcombine.low %v712_v22, %v716_v23 }
 0x144   : > { %2093 = vmatpush1.bf16.msra.mxu0 %v3625_v30  ;;  %2179 = vmatpush1.bf16.msra.mxu1 %v3627_v31  ;;  %v723_v30 = vld [vmem:[%s4563_s7 + $0x6a0] sm:$0xff]  ;;  %v720_v31 = vld [vmem:[%s4563_s7 + $0x688] sm:$0xff] }
 0x145   : > { %2094 = vmatprep.subr.bf16.mxu0 %v3634_v32  ;;  %2180 = vmatprep.subr.bf16.mxu1 %v3636_v33  ;;  %v724_v32 = vld [vmem:[%s4563_s7 + $0x6a8] sm:$0xff]  ;;  %v3689_v33 = vcombine.low %v711_v20, %v715_v21  ;;  %v3698_v35 = vcombine.high %v719_v29, %v723_v30  ;;  %v501_v20 = vld [vmem:[%s4555_s24 + $0x10] sm:$0xff] }
 0x146   : > { %v3700_v36 = vcombine.high %v720_v31, %v724_v32  ;;  %v3699_v42 = vcombine.low %v720_v31, %v724_v32  ;;  %v505_v21 = vld [vmem:[%s4555_s24 + $0x30] sm:$0xff] }
 0x148   : > { %2095 = vmatpush1.bf16.msra.mxu0 %v3633_v38  ;;  %2181 = vmatpush1.bf16.msra.mxu1 %v3635_v39  ;;  %v731_v38 = vld [vmem:[%s4563_s7 + $0x6e0] sm:$0xff]  ;;  %v728_v39 = vld [vmem:[%s4563_s7 + $0x6c8] sm:$0xff] }
 0x149   : > { %2096 = vmatprep.subr.bf16.mxu0 %v3642_v40  ;;  %2182 = vmatprep.subr.bf16.mxu1 %v3644_v41  ;;  %v732_v40 = vld [vmem:[%s4563_s7 + $0x6e8] sm:$0xff]  ;;  %v3697_v41 = vcombine.low %v719_v29, %v723_v30  ;;  %v3706_v43 = vcombine.high %v727_v37, %v731_v38  ;;  %v522_v29 = vld [vmem:[%s4563_s7 + $0x58] sm:$0xff] }
 0x14a   : > { %v3708_v44 = vcombine.high %v728_v39, %v732_v40  ;;  %v3707_v50 = vcombine.low %v728_v39, %v732_v40  ;;  %v526_v30 = vld [vmem:[%s4563_s7 + $0x78] sm:$0xff] }
 0x14b   : > { %v3503_v40 = vcombine.low %v522_v29, %v526_v30 }
 0x14c   : > { %2097 = vmatpush1.bf16.msra.mxu0 %v3641_v46  ;;  %2183 = vmatpush1.bf16.msra.mxu1 %v3643_v47  ;;  %v739_v46 = vld [vmem:[%s4563_s7 + $0x720] sm:$0xff]  ;;  %v736_v47 = vld [vmem:[%s4563_s7 + $0x708] sm:$0xff] }
 0x14d   : > { %2098 = vmatprep.subr.bf16.mxu0 %v3650_v48  ;;  %2184 = vmatprep.subr.bf16.mxu1 %v3652_v49  ;;  %v740_v48 = vld [vmem:[%s4563_s7 + $0x728] sm:$0xff]  ;;  %v3705_v49 = vcombine.low %v727_v37, %v731_v38  ;;  %v3714_v51 = vcombine.high %v735_v45, %v739_v46  ;;  %v530_v37 = vld [vmem:[%s4563_s7 + $0x98] sm:$0xff] }
 0x14e   : > { %v3716_v52 = vcombine.high %v736_v47, %v740_v48  ;;  %v3715_v58 = vcombine.low %v736_v47, %v740_v48  ;;  %v534_v38 = vld [vmem:[%s4563_s7 + $0xb8] sm:$0xff] }
 0x14f   : > { %v3511_v48 = vcombine.low %v530_v37, %v534_v38 }
 0x150   : > { %2099 = vmatpush1.bf16.msra.mxu0 %v3649_v54  ;;  %2185 = vmatpush1.bf16.msra.mxu1 %v3651_v55  ;;  %v747_v54 = vld [vmem:[%s4563_s7 + $0x760] sm:$0xff]  ;;  %v744_v55 = vld [vmem:[%s4563_s7 + $0x748] sm:$0xff] }
 0x151   : > { %2100 = vmatprep.subr.bf16.mxu0 %v3658_v56  ;;  %2186 = vmatprep.subr.bf16.mxu1 %v3660_v57  ;;  %v748_v56 = vld [vmem:[%s4563_s7 + $0x768] sm:$0xff]  ;;  %v3713_v57 = vcombine.low %v735_v45, %v739_v46  ;;  %v3722_v59 = vcombine.high %v743_v53, %v747_v54  ;;  %v538_v45 = vld [vmem:[%s4563_s7 + $0xd8] sm:$0xff] }
 0x152   : > { %v3724_v61 = vcombine.high %v744_v55, %v748_v56  ;;  %v3723_v3 = vcombine.low %v744_v55, %v748_v56  ;;  %v542_v46 = vld [vmem:[%s4563_s7 + $0xf8] sm:$0xff] }
 0x154   : > { %2101 = vmatpush1.bf16.msra.mxu0 %v3657_v63  ;;  %2187 = vmatpush1.bf16.msra.mxu1 %v3659_v0  ;;  %v755_v63 = vld [vmem:[%s4563_s7 + $0x7a0] sm:$0xff]  ;;  %v752_v0 = vld [vmem:[%s4563_s7 + $0x788] sm:$0xff] }
 0x155   : > { %2102 = vmatprep.subr.bf16.mxu0 %v3666_v1  ;;  %2188 = vmatprep.subr.bf16.mxu1 %v3668_v2  ;;  %v756_v1 = vld [vmem:[%s4563_s7 + $0x7a8] sm:$0xff]  ;;  %v3721_v2 = vcombine.low %v743_v53, %v747_v54  ;;  %v3730_v4 = vcombine.high %v751_v62, %v755_v63  ;;  %v546_v53 = vld [vmem:[%s4563_s7 + $0x118] sm:$0xff] }
 0x156   : > { %v3732_v5 = vcombine.high %v752_v0, %v756_v1  ;;  %v3731_v11 = vcombine.low %v752_v0, %v756_v1  ;;  %v550_v54 = vld [vmem:[%s4563_s7 + $0x138] sm:$0xff] }
 0x157   : > { %v3527_v0 = vcombine.low %v546_v53, %v550_v54 }
 0x158   : > { %2103 = vmatpush1.bf16.msra.mxu0 %v3665_v7  ;;  %2189 = vmatpush1.bf16.msra.mxu1 %v3667_v8  ;;  %v763_v7 = vld [vmem:[%s4563_s7 + $0x7e0] sm:$0xff]  ;;  %v760_v8 = vld [vmem:[%s4563_s7 + $0x7c8] sm:$0xff] }
 0x159   : > { %2104 = vmatprep.subr.bf16.mxu0 %v3674_v9  ;;  %2190 = vmatprep.subr.bf16.mxu1 %v3676_v10  ;;  %v764_v9 = vld [vmem:[%s4563_s7 + $0x7e8] sm:$0xff]  ;;  %v3729_v10 = vcombine.low %v751_v62, %v755_v63  ;;  %v3738_v12 = vcombine.high %v759_v6, %v763_v7  ;;  %v558_v62 = vld [vmem:[%s4563_s7 + $0x178] sm:$0xff] }
 0x15a   : > { %v3740_v13 = vcombine.high %v760_v8, %v764_v9  ;;  %v3739_v22 = vcombine.low %v760_v8, %v764_v9 }
 0x15c   : > { %2105 = vmatpush1.bf16.msra.mxu0 %v3673_v15  ;;  %2191 = vmatpush1.bf16.msra.mxu1 %v3675_v16  ;;  %v517_v15 = vld [vmem:[%s4563_s7 + $0x30] sm:$0xff]  ;;  %v514_v16 = vld [vmem:[%s4563_s7 + $0x18] sm:$0xff] }
 0x15d   : > { %2106 = vmatprep.subr.bf16.mxu0 %v3682_v18  ;;  %2192 = vmatprep.subr.bf16.mxu1 %v3684_v19  ;;  %v518_v18 = vld [vmem:[%s4563_s7 + $0x38] sm:$0xff]  ;;  %v3737_v19 = vcombine.low %v759_v6, %v763_v7  ;;  %v3494_v23 = vcombine.high %v513_v14, %v517_v15  ;;  %v3493_v31 = vcombine.low %v513_v14, %v517_v15 }
 0x15e   : > { %v3495_v32 = vcombine.low %v514_v16, %v518_v18  ;;  %v566_v6 = vld [vmem:[%s4563_s7 + $0x1b8] sm:$0xff] }
 0x15f   : > { %v574_v14 = vld [vmem:[%s4563_s7 + $0x1f8] sm:$0xff] }
 0x160   : > { %2107 = vmatpush1.bf16.msra.mxu0 %v3681_v24  ;;  %2193 = vmatpush1.bf16.msra.mxu1 %v3683_v25  ;;  %v3496_v24 = vcombine.high %v514_v16, %v518_v18  ;;  %v521_v25 = vld [vmem:[%s4563_s7 + $0x50] sm:$0xff] }
 0x161   : > { %2108 = vmatprep.subr.bf16.mxu0 %v3690_v26  ;;  %2194 = vmatprep.subr.bf16.mxu1 %v3692_v28  ;;  %v525_v26 = vld [vmem:[%s4563_s7 + $0x70] sm:$0xff]  ;;  %v4754_v28 = vpack.c.bf16 %v505_v21, %v501_v20 }
 0x162   : > { %v3501_v39 = vcombine.low %v521_v25, %v525_v26  ;;  %v577_v20 = vld [vmem:[%s4563_s7 + $0x210] sm:$0xff] }
 0x163   : > { %v581_v21 = vld [vmem:[%s4563_s7 + $0x230] sm:$0xff] }
 0x164   : > { %2109 = vmatpush1.bf16.msra.mxu0 %v3689_v33  ;;  %2195 = vmatpush1.bf16.msra.mxu1 %v3691_v34  ;;  %v3502_v33 = vcombine.high %v521_v25, %v525_v26  ;;  %v3504_v34 = vcombine.high %v522_v29, %v526_v30  ;;  %v3558_v26 = vcombine.high %v577_v20, %v581_v21  ;;  %v585_v30 = vld [vmem:[%s4563_s7 + $0x250] sm:$0xff] }
 0x165   : > { %2110 = vmatprep.subr.bf16.mxu0 %v3698_v35  ;;  %2196 = vmatprep.subr.bf16.mxu1 %v3700_v36  ;;  %v529_v35 = vld [vmem:[%s4563_s7 + $0x90] sm:$0xff] }
 0x166   : > { %v533_v36 = vld [vmem:[%s4563_s7 + $0xb0] sm:$0xff] }
 0x167   : > { %v3509_v47 = vcombine.low %v529_v35, %v533_v36 }
 0x168   : > { %2111 = vmatpush1.bf16.msra.mxu0 %v3697_v41  ;;  %2197 = vmatpush1.bf16.msra.mxu1 %v3699_v42  ;;  %v3510_v41 = vcombine.high %v529_v35, %v533_v36  ;;  %v3512_v42 = vcombine.high %v530_v37, %v534_v38  ;;  %v593_v38 = vld [vmem:[%s4563_s7 + $0x290] sm:$0xff] }
 0x169   : > { %2112 = vmatprep.subr.bf16.mxu0 %v3706_v43  ;;  %2198 = vmatprep.subr.bf16.mxu1 %v3708_v44  ;;  %v537_v43 = vld [vmem:[%s4563_s7 + $0xd0] sm:$0xff] }
 0x16a   : > { %v541_v44 = vld [vmem:[%s4563_s7 + $0xf0] sm:$0xff] }
 0x16b   : > { %v3517_v55 = vcombine.low %v537_v43, %v541_v44 }
 0x16c   : > { %2113 = vmatpush1.bf16.msra.mxu0 %v3705_v49  ;;  %2199 = vmatpush1.bf16.msra.mxu1 %v3707_v50  ;;  %v3518_v49 = vcombine.high %v537_v43, %v541_v44  ;;  %v3520_v50 = vcombine.high %v538_v45, %v542_v46 }
 0x16d   : > { %2114 = vmatprep.subr.bf16.mxu0 %v3714_v51  ;;  %2200 = vmatprep.subr.bf16.mxu1 %v3716_v52  ;;  %v545_v51 = vld [vmem:[%s4563_s7 + $0x110] sm:$0xff] }
 0x16e   : > { %v549_v52 = vld [vmem:[%s4563_s7 + $0x130] sm:$0xff] }
 0x16f   : > { %v3526_v56 = vcombine.high %v545_v51, %v549_v52  ;;  %v3525_v63 = vcombine.low %v545_v51, %v549_v52 }
 0x170   : > { %2115 = vmatpush1.bf16.msra.mxu0 %v3713_v57  ;;  %2201 = vmatpush1.bf16.msra.mxu1 %v3715_v58  ;;  %v3528_v57 = vcombine.high %v546_v53, %v550_v54  ;;  %v553_v58 = vld [vmem:[%s4563_s7 + $0x150] sm:$0xff] }
 0x171   : > { %2116 = vmatprep.subr.bf16.mxu0 %v3722_v59  ;;  %2202 = vmatprep.subr.bf16.mxu1 %v3724_v61  ;;  %v557_v59 = vld [vmem:[%s4563_s7 + $0x170] sm:$0xff]  ;;  %v554_v61 = vld [vmem:[%s4563_s7 + $0x158] sm:$0xff] }
 0x172   : > { %v3534_v1 = vcombine.high %v553_v58, %v557_v59  ;;  %v3533_v7 = vcombine.low %v553_v58, %v557_v59  ;;  %v3535_v8 = vcombine.low %v554_v61, %v558_v62  ;;  %v609_v54 = vld [vmem:[%s4563_s7 + $0x310] sm:$0xff] }
 0x174   : > { %2117 = vmatpush1.bf16.msra.mxu0 %v3721_v2  ;;  %2203 = vmatpush1.bf16.msra.mxu1 %v3723_v3  ;;  %v3536_v2 = vcombine.high %v554_v61, %v558_v62  ;;  %v561_v3 = vld [vmem:[%s4563_s7 + $0x190] sm:$0xff] }
 0x175   : > { %2118 = vmatprep.subr.bf16.mxu0 %v3730_v4  ;;  %2204 = vmatprep.subr.bf16.mxu1 %v3732_v5  ;;  %v565_v4 = vld [vmem:[%s4563_s7 + $0x1b0] sm:$0xff]  ;;  %v562_v5 = vld [vmem:[%s4563_s7 + $0x198] sm:$0xff] }
 0x176   : > { %v3542_v9 = vcombine.high %v561_v3, %v565_v4  ;;  %v3541_v15 = vcombine.low %v561_v3, %v565_v4  ;;  %v3543_v16 = vcombine.low %v562_v5, %v566_v6  ;;  %v617_v62 = vld [vmem:[%s4563_s7 + $0x350] sm:$0xff] }
 0x178   : > { %2119 = vmatpush1.bf16.msra.mxu0 %v3729_v10  ;;  %2205 = vmatpush1.bf16.msra.mxu1 %v3731_v11  ;;  %v3544_v10 = vcombine.high %v562_v5, %v566_v6  ;;  %v569_v11 = vld [vmem:[%s4563_s7 + $0x1d0] sm:$0xff] }
 0x179   : > { %2120 = vmatprep.subr.bf16.mxu0 %v3738_v12  ;;  %2206 = vmatprep.subr.bf16.mxu1 %v3740_v13  ;;  %v573_v12 = vld [vmem:[%s4563_s7 + $0x1f0] sm:$0xff]  ;;  %v570_v13 = vld [vmem:[%s4563_s7 + $0x1d8] sm:$0xff] }
 0x17a   : > { %v3550_v18 = vcombine.high %v569_v11, %v573_v12  ;;  %v3551_v25 = vcombine.low %v570_v13, %v574_v14  ;;  %v625_v6 = vld [vmem:[%s4563_s7 + $0x390] sm:$0xff] }
 0x17c   : > { %2121 = vmatpush1.bf16.msra.mxu0 %v3737_v19  ;;  %2207 = vmatpush1.bf16.msra.mxu1 %v3739_v22  ;;  %v3552_v19 = vcombine.high %v570_v13, %v574_v14  ;;  %v578_v22 = vld [vmem:[%s4563_s7 + $0x218] sm:$0xff]  ;;  %v633_v14 = vld [vmem:[%s4563_s7 + $0x3d0] sm:$0xff] }
 0x17d   : > { %2219 = vmatprep.subr.bf16.mxu0 %v3494_v23  ;;  %2305 = vmatprep.subr.bf16.mxu1 %v3496_v24  ;;  %v582_v23 = vld [vmem:[%s4563_s7 + $0x238] sm:$0xff]  ;;  %v3549_v24 = vcombine.low %v569_v11, %v573_v12 }
 0x17e   : > { %v3560_v29 = vcombine.high %v578_v22, %v582_v23  ;;  %v3559_v35 = vcombine.low %v578_v22, %v582_v23  ;;  %v641_v23 = vld [vmem:[%s4563_s7 + $0x410] sm:$0xff] }
 0x17f   : > { %2123 = vmatmul.mubr.bf16.vlgmr.msra.gmra.mrb[0].mxu0 %v4754_v28  ;;  %2209 = vmatmul.mubr.bf16.vlgmr.msra.gmra.mrb[0].mxu1 %v4754_v28 }
 0x180   : > { %2220 = vmatpush1.bf16.msra.mxu0 %v3493_v31  ;;  %2306 = vmatpush1.bf16.msra.mxu1 %v3495_v32  ;;  %v589_v31 = vld [vmem:[%s4563_s7 + $0x270] sm:$0xff]  ;;  %v586_v32 = vld [vmem:[%s4563_s7 + $0x258] sm:$0xff] }
 0x181   : > { %2221 = vmatprep.subr.bf16.mxu0 %v3502_v33  ;;  %2307 = vmatprep.subr.bf16.mxu1 %v3504_v34  ;;  %v590_v33 = vld [vmem:[%s4563_s7 + $0x278] sm:$0xff]  ;;  %v3557_v34 = vcombine.low %v577_v20, %v581_v21  ;;  %v3566_v36 = vcombine.high %v585_v30, %v589_v31 }
 0x182   : > { %2251 = vmatprep.mubr.bf16.mxu0 %v4632_v60  ;;  %2337 = vmatprep.mubr.bf16.mxu1 %v4632_v60  ;;  %v3519_v60 = vcombine.low %v538_v45, %v542_v46  ;;  %v3568_v37 = vcombine.high %v586_v32, %v590_v33  ;;  %v3567_v43 = vcombine.low %v586_v32, %v590_v33  ;;  %v601_v46 = vld [vmem:[%s4563_s7 + $0x2d0] sm:$0xff] }
 0x183   : > { %v649_v33 = vld [vmem:[%s4563_s7 + $0x450] sm:$0xff] }
 0x184   : > { %2222 = vmatpush1.bf16.msra.mxu0 %v3501_v39  ;;  %2308 = vmatpush1.bf16.msra.mxu1 %v3503_v40  ;;  %v597_v39 = vld [vmem:[%s4563_s7 + $0x2b0] sm:$0xff]  ;;  %v594_v40 = vld [vmem:[%s4563_s7 + $0x298] sm:$0xff] }
 0x185   : > { %2223 = vmatprep.subr.bf16.mxu0 %v3510_v41  ;;  %2309 = vmatprep.subr.bf16.mxu1 %v3512_v42  ;;  %v598_v41 = vld [vmem:[%s4563_s7 + $0x2b8] sm:$0xff]  ;;  %v3565_v42 = vcombine.low %v585_v30, %v589_v31  ;;  %v3574_v44 = vcombine.high %v593_v38, %v597_v39 }
 0x186   : > { %v3576_v45 = vcombine.high %v594_v40, %v598_v41  ;;  %v3575_v51 = vcombine.low %v594_v40, %v598_v41  ;;  %v657_v41 = vld [vmem:[%s4563_s7 + $0x490] sm:$0xff] }
 0x188   : > { %2224 = vmatpush1.bf16.msra.mxu0 %v3509_v47  ;;  %2310 = vmatpush1.bf16.msra.mxu1 %v3511_v48  ;;  %v605_v47 = vld [vmem:[%s4563_s7 + $0x2f0] sm:$0xff]  ;;  %v602_v48 = vld [vmem:[%s4563_s7 + $0x2d8] sm:$0xff] }
 0x189   : > { %2225 = vmatprep.subr.bf16.mxu0 %v3518_v49  ;;  %2311 = vmatprep.subr.bf16.mxu1 %v3520_v50  ;;  %v606_v49 = vld [vmem:[%s4563_s7 + $0x2f8] sm:$0xff]  ;;  %v3573_v50 = vcombine.low %v593_v38, %v597_v39  ;;  %v3582_v52 = vcombine.high %v601_v46, %v605_v47 }
 0x18a   : > { %v3584_v53 = vcombine.high %v602_v48, %v606_v49  ;;  %v3583_v58 = vcombine.low %v602_v48, %v606_v49  ;;  %v665_v49 = vld [vmem:[%s4563_s7 + $0x4d0] sm:$0xff] }
 0x18c   : > { %2226 = vmatpush1.bf16.msra.mxu0 %v3517_v55  ;;  %2312 = vmatpush1.bf16.msra.mxu1 %v3519_v60  ;;  %v613_v55 = vld [vmem:[%s4563_s7 + $0x330] sm:$0xff]  ;;  %v610_v60 = vld [vmem:[%s4563_s7 + $0x318] sm:$0xff] }
 0x18d   : > { %2227 = vmatprep.subr.bf16.mxu0 %v3526_v56  ;;  %2313 = vmatprep.subr.bf16.mxu1 %v3528_v57  ;;  %v614_v56 = vld [vmem:[%s4563_s7 + $0x338] sm:$0xff]  ;;  %v3581_v57 = vcombine.low %v601_v46, %v605_v47  ;;  %v3590_v59 = vcombine.high %v609_v54, %v613_v55 }
 0x18e   : > { %v3592_v61 = vcombine.high %v610_v60, %v614_v56  ;;  %v3591_v3 = vcombine.low %v610_v60, %v614_v56  ;;  %v673_v60 = vld [vmem:[%s4563_s7 + $0x510] sm:$0xff] }
 0x18f   : > { %v677_v56 = vld [vmem:[%s4563_s7 + $0x530] sm:$0xff] }
 0x190   : > { %2228 = vmatpush1.bf16.msra.mxu0 %v3525_v63  ;;  %2314 = vmatpush1.bf16.msra.mxu1 %v3527_v0  ;;  %v621_v63 = vld [vmem:[%s4563_s7 + $0x370] sm:$0xff]  ;;  %v618_v0 = vld [vmem:[%s4563_s7 + $0x358] sm:$0xff] }
 0x191   : > { %2229 = vmatprep.subr.bf16.mxu0 %v3534_v1  ;;  %2315 = vmatprep.subr.bf16.mxu1 %v3536_v2  ;;  %v622_v1 = vld [vmem:[%s4563_s7 + $0x378] sm:$0xff]  ;;  %v3589_v2 = vcombine.low %v609_v54, %v613_v55  ;;  %v3598_v4 = vcombine.high %v617_v62, %v621_v63 }
 0x192   : > { %v3600_v5 = vcombine.high %v618_v0, %v622_v1  ;;  %v3599_v11 = vcombine.low %v618_v0, %v622_v1  ;;  %v685_v0 = vld [vmem:[%s4563_s7 + $0x570] sm:$0xff]  ;;  %v682_v1 = vld [vmem:[%s4563_s7 + $0x558] sm:$0xff] }
 0x194   : > { %2230 = vmatpush1.bf16.msra.mxu0 %v3533_v7  ;;  %2316 = vmatpush1.bf16.msra.mxu1 %v3535_v8  ;;  %v629_v7 = vld [vmem:[%s4563_s7 + $0x3b0] sm:$0xff]  ;;  %v626_v8 = vld [vmem:[%s4563_s7 + $0x398] sm:$0xff] }
 0x195   : > { %2231 = vmatprep.subr.bf16.mxu0 %v3542_v9  ;;  %2317 = vmatprep.subr.bf16.mxu1 %v3544_v10  ;;  %v630_v9 = vld [vmem:[%s4563_s7 + $0x3b8] sm:$0xff]  ;;  %v3597_v10 = vcombine.low %v617_v62, %v621_v63  ;;  %v3606_v12 = vcombine.high %v625_v6, %v629_v7  ;;  %v681_v63 = vld [vmem:[%s4563_s7 + $0x550] sm:$0xff] }
 0x196   : > { %v3608_v13 = vcombine.high %v626_v8, %v630_v9  ;;  %v3607_v20 = vcombine.low %v626_v8, %v630_v9  ;;  %v693_v8 = vld [vmem:[%s4563_s7 + $0x5b0] sm:$0xff]  ;;  %v690_v9 = vld [vmem:[%s4563_s7 + $0x598] sm:$0xff] }
 0x198   : > { %2232 = vmatpush1.bf16.msra.mxu0 %v3541_v15  ;;  %2318 = vmatpush1.bf16.msra.mxu1 %v3543_v16  ;;  %v637_v15 = vld [vmem:[%s4563_s7 + $0x3f0] sm:$0xff]  ;;  %v634_v16 = vld [vmem:[%s4563_s7 + $0x3d8] sm:$0xff] }
 0x199   : > { %2233 = vmatprep.subr.bf16.mxu0 %v3550_v18  ;;  %2319 = vmatprep.subr.bf16.mxu1 %v3552_v19  ;;  %v638_v18 = vld [vmem:[%s4563_s7 + $0x3f8] sm:$0xff]  ;;  %v3605_v19 = vcombine.low %v625_v6, %v629_v7  ;;  %v3614_v21 = vcombine.high %v633_v14, %v637_v15  ;;  %v689_v7 = vld [vmem:[%s4563_s7 + $0x590] sm:$0xff] }
 0x19a   : > { %v3616_v22 = vcombine.high %v634_v16, %v638_v18  ;;  %v3615_v30 = vcombine.low %v634_v16, %v638_v18  ;;  %v701_v16 = vld [vmem:[%s4563_s7 + $0x5f0] sm:$0xff]  ;;  %v698_v18 = vld [vmem:[%s4563_s7 + $0x5d8] sm:$0xff] }
 0x19c   : > { %2234 = vmatpush1.bf16.msra.mxu0 %v3549_v24  ;;  %2320 = vmatpush1.bf16.msra.mxu1 %v3551_v25  ;;  %v645_v24 = vld [vmem:[%s4563_s7 + $0x430] sm:$0xff]  ;;  %v642_v25 = vld [vmem:[%s4563_s7 + $0x418] sm:$0xff] }
 0x19d   : > { %2235 = vmatprep.subr.bf16.mxu0 %v3558_v26  ;;  %2321 = vmatprep.subr.bf16.mxu1 %v3560_v29  ;;  %v646_v26 = vld [vmem:[%s4563_s7 + $0x438] sm:$0xff]  ;;  %v3613_v29 = vcombine.low %v633_v14, %v637_v15  ;;  %v3622_v31 = vcombine.high %v641_v23, %v645_v24  ;;  %v697_v15 = vld [vmem:[%s4563_s7 + $0x5d0] sm:$0xff] }
 0x19e   : > { %v3624_v32 = vcombine.high %v642_v25, %v646_v26  ;;  %v3623_v38 = vcombine.low %v642_v25, %v646_v26  ;;  %v709_v25 = vld [vmem:[%s4563_s7 + $0x630] sm:$0xff]  ;;  %v706_v26 = vld [vmem:[%s4563_s7 + $0x618] sm:$0xff] }
 0x1a0   : > { %2236 = vmatpush1.bf16.msra.mxu0 %v3557_v34  ;;  %2322 = vmatpush1.bf16.msra.mxu1 %v3559_v35  ;;  %v653_v34 = vld [vmem:[%s4563_s7 + $0x470] sm:$0xff]  ;;  %v650_v35 = vld [vmem:[%s4563_s7 + $0x458] sm:$0xff] }
 0x1a1   : > { %2237 = vmatprep.subr.bf16.mxu0 %v3566_v36  ;;  %2323 = vmatprep.subr.bf16.mxu1 %v3568_v37  ;;  %v654_v36 = vld [vmem:[%s4563_s7 + $0x478] sm:$0xff]  ;;  %v3621_v37 = vcombine.low %v641_v23, %v645_v24  ;;  %v3630_v39 = vcombine.high %v649_v33, %v653_v34  ;;  %v705_v24 = vld [vmem:[%s4563_s7 + $0x610] sm:$0xff] }
 0x1a2   : > { %v3632_v40 = vcombine.high %v650_v35, %v654_v36  ;;  %v3631_v46 = vcombine.low %v650_v35, %v654_v36  ;;  %v717_v35 = vld [vmem:[%s4563_s7 + $0x670] sm:$0xff]  ;;  %v714_v36 = vld [vmem:[%s4563_s7 + $0x658] sm:$0xff] }
 0x1a4   : > { %2238 = vmatpush1.bf16.msra.mxu0 %v3565_v42  ;;  %2324 = vmatpush1.bf16.msra.mxu1 %v3567_v43  ;;  %v661_v42 = vld [vmem:[%s4563_s7 + $0x4b0] sm:$0xff]  ;;  %v658_v43 = vld [vmem:[%s4563_s7 + $0x498] sm:$0xff] }
 0x1a5   : > { %2239 = vmatprep.subr.bf16.mxu0 %v3574_v44  ;;  %2325 = vmatprep.subr.bf16.mxu1 %v3576_v45  ;;  %v662_v44 = vld [vmem:[%s4563_s7 + $0x4b8] sm:$0xff]  ;;  %v3629_v45 = vcombine.low %v649_v33, %v653_v34  ;;  %v3638_v47 = vcombine.high %v657_v41, %v661_v42  ;;  %v713_v34 = vld [vmem:[%s4563_s7 + $0x650] sm:$0xff] }
 0x1a6   : > { %v3640_v48 = vcombine.high %v658_v43, %v662_v44 }
 0x1a8   : > { %2240 = vmatpush1.bf16.msra.mxu0 %v3573_v50  ;;  %2326 = vmatpush1.bf16.msra.mxu1 %v3575_v51  ;;  %v669_v50 = vld [vmem:[%s4563_s7 + $0x4f0] sm:$0xff]  ;;  %v666_v51 = vld [vmem:[%s4563_s7 + $0x4d8] sm:$0xff] }
 0x1a9   : > { %2241 = vmatprep.subr.bf16.mxu0 %v3582_v52  ;;  %2327 = vmatprep.subr.bf16.mxu1 %v3584_v53  ;;  %v670_v52 = vld [vmem:[%s4563_s7 + $0x4f8] sm:$0xff]  ;;  %v3639_v53 = vcombine.low %v658_v43, %v662_v44  ;;  %v3646_v54 = vcombine.high %v665_v49, %v669_v50  ;;  %v725_v43 = vld [vmem:[%s4563_s7 + $0x6b0] sm:$0xff] }
 0x1aa   : > { %v3648_v55 = vcombine.high %v666_v51, %v670_v52  ;;  %v722_v44 = vld [vmem:[%s4563_s7 + $0x698] sm:$0xff] }
 0x1ac   : > { %2242 = vmatpush1.bf16.msra.mxu0 %v3581_v57  ;;  %2328 = vmatpush1.bf16.msra.mxu1 %v3583_v58  ;;  %v674_v57 = vld [vmem:[%s4563_s7 + $0x518] sm:$0xff] }
 0x1ad   : > { %2243 = vmatprep.subr.bf16.mxu0 %v3590_v59  ;;  %2329 = vmatprep.subr.bf16.mxu1 %v3592_v61  ;;  %v678_v58 = vld [vmem:[%s4563_s7 + $0x538] sm:$0xff]  ;;  %v3645_v59 = vcombine.low %v665_v49, %v669_v50  ;;  %v3654_v61 = vcombine.high %v673_v60, %v677_v56  ;;  %v729_v50 = vld [vmem:[%s4563_s7 + $0x6d0] sm:$0xff] }
 0x1ae   : > { %v3656_v62 = vcombine.high %v674_v57, %v678_v58 }
 0x1b0   : > { %2244 = vmatpush1.bf16.msra.mxu0 %v3589_v2  ;;  %2330 = vmatpush1.bf16.msra.mxu1 %v3591_v3  ;;  %v686_v2 = vld [vmem:[%s4563_s7 + $0x578] sm:$0xff]  ;;  %v3653_v3 = vcombine.low %v673_v60, %v677_v56  ;;  %v737_v56 = vld [vmem:[%s4563_s7 + $0x710] sm:$0xff] }
 0x1b1   : > { %2245 = vmatprep.subr.bf16.mxu0 %v3598_v4  ;;  %2331 = vmatprep.subr.bf16.mxu1 %v3600_v5  ;;  %v3655_v4 = vcombine.low %v674_v57, %v678_v58  ;;  %v3662_v5 = vcombine.high %v681_v63, %v685_v0  ;;  %v3664_v6 = vcombine.high %v682_v1, %v686_v2  ;;  %v741_v57 = vld [vmem:[%s4563_s7 + $0x730] sm:$0xff]  ;;  %v738_v58 = vld [vmem:[%s4563_s7 + $0x718] sm:$0xff] }
 0x1b4   : > { %2246 = vmatpush1.bf16.msra.mxu0 %v3597_v10  ;;  %2332 = vmatpush1.bf16.msra.mxu1 %v3599_v11  ;;  %v694_v10 = vld [vmem:[%s4563_s7 + $0x5b8] sm:$0xff]  ;;  %v3661_v11 = vcombine.low %v681_v63, %v685_v0  ;;  %v745_v0 = vld [vmem:[%s4563_s7 + $0x750] sm:$0xff] }
 0x1b5   : > { %2247 = vmatprep.subr.bf16.mxu0 %v3606_v12  ;;  %2333 = vmatprep.subr.bf16.mxu1 %v3608_v13  ;;  %v3663_v12 = vcombine.low %v682_v1, %v686_v2  ;;  %v3670_v13 = vcombine.high %v689_v7, %v693_v8  ;;  %v3672_v14 = vcombine.high %v690_v9, %v694_v10  ;;  %v749_v1 = vld [vmem:[%s4563_s7 + $0x770] sm:$0xff]  ;;  %v746_v2 = vld [vmem:[%s4563_s7 + $0x758] sm:$0xff] }
 0x1b8   : > { %2248 = vmatpush1.bf16.msra.mxu0 %v3605_v19  ;;  %2334 = vmatpush1.bf16.msra.mxu1 %v3607_v20  ;;  %v702_v19 = vld [vmem:[%s4563_s7 + $0x5f8] sm:$0xff]  ;;  %v3669_v20 = vcombine.low %v689_v7, %v693_v8  ;;  %v753_v8 = vld [vmem:[%s4563_s7 + $0x790] sm:$0xff] }
 0x1b9   : > { %2249 = vmatprep.subr.bf16.mxu0 %v3614_v21  ;;  %2335 = vmatprep.subr.bf16.mxu1 %v3616_v22  ;;  %v3671_v21 = vcombine.low %v690_v9, %v694_v10  ;;  %v3678_v22 = vcombine.high %v697_v15, %v701_v16  ;;  %v3680_v23 = vcombine.high %v698_v18, %v702_v19  ;;  %v757_v9 = vld [vmem:[%s4563_s7 + $0x7b0] sm:$0xff]  ;;  %v754_v10 = vld [vmem:[%s4563_s7 + $0x798] sm:$0xff] }
 0x1bc   : > { %2250 = vmatpush1.bf16.msra.mxu0 %v3613_v29  ;;  %2336 = vmatpush1.bf16.msra.mxu1 %v3615_v30  ;;  %v710_v29 = vld [vmem:[%s4563_s7 + $0x638] sm:$0xff]  ;;  %v3677_v30 = vcombine.low %v697_v15, %v701_v16  ;;  %v761_v16 = vld [vmem:[%s4563_s7 + $0x7d0] sm:$0xff] }
 0x1bd   : > { %2262 = vmatprep.subr.bf16.mxu0 %v3622_v31  ;;  %2348 = vmatprep.subr.bf16.mxu1 %v3624_v32  ;;  %v3679_v31 = vcombine.low %v698_v18, %v702_v19  ;;  %v3686_v32 = vcombine.high %v705_v24, %v709_v25  ;;  %v3688_v33 = vcombine.high %v706_v26, %v710_v29  ;;  %v765_v18 = vld [vmem:[%s4563_s7 + $0x7f0] sm:$0xff]  ;;  %v762_v19 = vld [vmem:[%s4563_s7 + $0x7d8] sm:$0xff] }
 0x1bf   : > { %2252 = vmatmul.mubr.bf16.vlgmr.msra.gmra.mrb[4].mxu0 %v4679_v17  ;;  %2338 = vmatmul.mubr.bf16.vlgmr.msra.gmra.mrb[4].mxu1 %v4679_v17  ;;  %v3637_v17 = vcombine.low %v657_v41, %v661_v42  ;;  %v721_v42 = vld [vmem:[%s4563_s7 + $0x690] sm:$0xff] }
 0x1c0   : > { %2263 = vmatpush1.bf16.msra.mxu0 %v3621_v37  ;;  %2349 = vmatpush1.bf16.msra.mxu1 %v3623_v38  ;;  %v718_v37 = vld [vmem:[%s4563_s7 + $0x678] sm:$0xff]  ;;  %v3685_v38 = vcombine.low %v705_v24, %v709_v25  ;;  %v3741_v25 = vcombine.low %v761_v16, %v765_v18 }
 0x1c1   : > { %2264 = vmatprep.subr.bf16.mxu0 %v3630_v39  ;;  %2350 = vmatprep.subr.bf16.mxu1 %v3632_v40  ;;  %v3687_v39 = vcombine.low %v706_v26, %v710_v29  ;;  %v3694_v40 = vcombine.high %v713_v34, %v717_v35  ;;  %v3696_v41 = vcombine.high %v714_v36, %v718_v37  ;;  %v483_v29 = vld [vmem:[#allocation2] sm:$0xff] }
 0x1c2   : > { %2294 = vmatprep.mubr.bf16.mxu0 %v4686_v27  ;;  %2380 = vmatprep.mubr.bf16.mxu1 %v4686_v27  ;;  %v3647_v27 = vcombine.low %v666_v51, %v670_v52  ;;  %v733_v51 = vld [vmem:[%s4563_s7 + $0x6f0] sm:$0xff]  ;;  %v730_v52 = vld [vmem:[%s4563_s7 + $0x6d8] sm:$0xff] }
 0x1c4   : > { %2265 = vmatpush1.bf16.msra.mxu0 %v3629_v45  ;;  %2351 = vmatpush1.bf16.msra.mxu1 %v3631_v46  ;;  %v726_v45 = vld [vmem:[%s4563_s7 + $0x6b8] sm:$0xff]  ;;  %v3693_v46 = vcombine.low %v713_v34, %v717_v35 }
 0x1c5   : > { %2266 = vmatprep.subr.bf16.mxu0 %v3638_v47  ;;  %2352 = vmatprep.subr.bf16.mxu1 %v3640_v48  ;;  %v3695_v47 = vcombine.low %v714_v36, %v718_v37  ;;  %v3702_v48 = vcombine.high %v721_v42, %v725_v43  ;;  %v3704_v49 = vcombine.high %v722_v44, %v726_v45  ;;  %v491_v34 = vld [vmem:[#allocation2 + $0x40] sm:$0xff] }
 0x1c8   : > { %2267 = vmatpush1.bf16.msra.mxu0 %v3637_v17  ;;  %2353 = vmatpush1.bf16.msra.mxu1 %v3639_v53  ;;  %v734_v17 = vld [vmem:[%s4563_s7 + $0x6f8] sm:$0xff]  ;;  %v3701_v53 = vcombine.low %v721_v42, %v725_v43 }
 0x1c9   : > { %2268 = vmatprep.subr.bf16.mxu0 %v3646_v54  ;;  %2354 = vmatprep.subr.bf16.mxu1 %v3648_v55  ;;  %v3703_v54 = vcombine.low %v722_v44, %v726_v45  ;;  %v3710_v55 = vcombine.high %v729_v50, %v733_v51  ;;  %v3712_v60 = vcombine.high %v730_v52, %v734_v17  ;;  %v494_v44 = vld [vmem:[#allocation2 + $0x58] sm:$0xff] }
 0x1cc   : > { %2269 = vmatpush1.bf16.msra.mxu0 %v3645_v59  ;;  %2355 = vmatpush1.bf16.msra.mxu1 %v3647_v27  ;;  %v742_v59 = vld [vmem:[%s4563_s7 + $0x738] sm:$0xff]  ;;  %v3709_v27 = vcombine.low %v729_v50, %v733_v51 }
 0x1cd   : > { %2270 = vmatprep.subr.bf16.mxu0 %v3654_v61  ;;  %2356 = vmatprep.subr.bf16.mxu1 %v3656_v62  ;;  %v3711_v61 = vcombine.low %v730_v52, %v734_v17  ;;  %v3718_v62 = vcombine.high %v737_v56, %v741_v57  ;;  %v3720_v63 = vcombine.high %v738_v58, %v742_v59  ;;  %v487_v52 = vld [vmem:[#allocation2 + $0x20] sm:$0xff]  ;;  %v489_v17 = vld [vmem:[#allocation2 + $0x30] sm:$0xff] }
 0x1d0   : > { %2271 = vmatpush1.bf16.msra.mxu0 %v3653_v3  ;;  %2357 = vmatpush1.bf16.msra.mxu1 %v3655_v4  ;;  %v750_v3 = vld [vmem:[%s4563_s7 + $0x778] sm:$0xff]  ;;  %v3717_v4 = vcombine.low %v737_v56, %v741_v57 }
 0x1d1   : > { %2272 = vmatprep.subr.bf16.mxu0 %v3662_v5  ;;  %2358 = vmatprep.subr.bf16.mxu1 %v3664_v6  ;;  %v3719_v5 = vcombine.low %v738_v58, %v742_v59  ;;  %v3726_v6 = vcombine.high %v745_v0, %v749_v1  ;;  %v3728_v7 = vcombine.high %v746_v2, %v750_v3  ;;  %v497_v59 = vld [vmem:[#allocation2 + $0x70] sm:$0xff] }
 0x1d4   : > { %2273 = vmatpush1.bf16.msra.mxu0 %v3661_v11  ;;  %2359 = vmatpush1.bf16.msra.mxu1 %v3663_v12  ;;  %v758_v11 = vld [vmem:[%s4563_s7 + $0x7b8] sm:$0xff]  ;;  %v3725_v12 = vcombine.low %v745_v0, %v749_v1 }
 0x1d5   : > { %2274 = vmatprep.subr.bf16.mxu0 %v3670_v13  ;;  %2360 = vmatprep.subr.bf16.mxu1 %v3672_v14  ;;  %v3727_v13 = vcombine.low %v746_v2, %v750_v3  ;;  %v3734_v14 = vcombine.high %v753_v8, %v757_v9  ;;  %v3736_v15 = vcombine.high %v754_v10, %v758_v11  ;;  %v498_v1 = vld [vmem:[#allocation2 + $0x78] sm:$0xff] }
 0x1d8   : > { %2275 = vmatpush1.bf16.msra.mxu0 %v3669_v20  ;;  %2361 = vmatpush1.bf16.msra.mxu1 %v3671_v21  ;;  %v766_v20 = vld [vmem:[%s4563_s7 + $0x7f8] sm:$0xff]  ;;  %v3733_v21 = vcombine.low %v753_v8, %v757_v9 }
 0x1d9   : > { %2276 = vmatprep.subr.bf16.mxu0 %v3678_v22  ;;  %2362 = vmatprep.subr.bf16.mxu1 %v3680_v23  ;;  %v3735_v22 = vcombine.low %v754_v10, %v758_v11  ;;  %v3742_v23 = vcombine.high %v761_v16, %v765_v18  ;;  %v3744_v24 = vcombine.high %v762_v19, %v766_v20  ;;  %v2445_v10 = vlaneseq (!%p3745_p8) }
 0x1da   : > { %v3743_v26 = vcombine.low %v762_v19, %v766_v20 }
 0x1db   : > { %v4889_v11 = vshrl.u32 (!%p3745_p8), %v2445_v10, 7 }
 0x1dc   : > { %2277 = vmatpush1.bf16.msra.mxu0 %v3677_v30  ;;  %2363 = vmatpush1.bf16.msra.mxu1 %v3679_v31  ;;  %v485_v30 = vld [vmem:[#allocation2 + $0x10] sm:$0xff]  ;;  %v484_v31 = vld [vmem:[#allocation2 + $0x8] sm:$0xff] }
 0x1dd   : > { %2278 = vmatprep.subr.bf16.mxu0 %v3686_v32  ;;  %2364 = vmatprep.subr.bf16.mxu1 %v3688_v33  ;;  %v486_v33 = vld [vmem:[#allocation2 + $0x18] sm:$0xff]  ;;  %v4892_v18 = vsub.s32 (!%p3745_p8), 0, %v4889_v11  ;;  %v2451_v19 = vsub.s32 (!%p3745_p8), 1, %v4889_v11  ;;  %v2455_v20 = vsub.s32 (!%p3745_p8), 2, %v4889_v11 }
 0x1e0   : > { %2279 = vmatpush1.bf16.msra.mxu0 %v3685_v38  ;;  %2365 = vmatpush1.bf16.msra.mxu1 %v3687_v39  ;;  %v493_v38 = vld [vmem:[#allocation2 + $0x50] sm:$0xff]  ;;  %v492_v39 = vld [vmem:[#allocation2 + $0x48] sm:$0xff] }
 0x1e1   : > { %2280 = vmatprep.subr.bf16.mxu0 %v3694_v40  ;;  %2366 = vmatprep.subr.bf16.mxu1 %v3696_v41 }
 0x1e4   : > { %2281 = vmatpush1.bf16.msra.mxu0 %v3693_v46  ;;  %2367 = vmatpush1.bf16.msra.mxu1 %v3695_v47 }
 0x1e5   : > { %2282 = vmatprep.subr.bf16.mxu0 %v3702_v48  ;;  %2368 = vmatprep.subr.bf16.mxu1 %v3704_v49 }
 0x1e8   : > { %2283 = vmatpush1.bf16.msra.mxu0 %v3701_v53  ;;  %2369 = vmatpush1.bf16.msra.mxu1 %v3703_v54  ;;  %v488_v53 = vld [vmem:[#allocation2 + $0x28] sm:$0xff] }
 0x1e9   : > { %2284 = vmatprep.subr.bf16.mxu0 %v3710_v55  ;;  %2370 = vmatprep.subr.bf16.mxu1 %v3712_v60  ;;  %v490_v55 = vld [vmem:[#allocation2 + $0x38] sm:$0xff]  ;;  %v495_v60 = vld [vmem:[#allocation2 + $0x60] sm:$0xff] }
 0x1ec   : > { %2285 = vmatpush1.bf16.msra.mxu0 %v3709_v27  ;;  %2371 = vmatpush1.bf16.msra.mxu1 %v3711_v61  ;;  %v496_v27 = vld [vmem:[#allocation2 + $0x68] sm:$0xff] }
 0x1ed   : > { %2286 = vmatprep.subr.bf16.mxu0 %v3718_v62  ;;  %2372 = vmatprep.subr.bf16.mxu1 %v3720_v63 }
 0x1f0   : > { %2287 = vmatpush1.bf16.msra.mxu0 %v3717_v4  ;;  %2373 = vmatpush1.bf16.msra.mxu1 %v3719_v5 }
 0x1f1   : > { %2288 = vmatprep.subr.bf16.mxu0 %v3726_v6  ;;  %2374 = vmatprep.subr.bf16.mxu1 %v3728_v7 }
 0x1f4   : > { %2289 = vmatpush1.bf16.msra.mxu0 %v3725_v12  ;;  %2375 = vmatpush1.bf16.msra.mxu1 %v3727_v13 }
 0x1f5   : > { %2290 = vmatprep.subr.bf16.mxu0 %v3734_v14  ;;  %2376 = vmatprep.subr.bf16.mxu1 %v3736_v15 }
 0x1f8   : > { %2291 = vmatpush1.bf16.msra.mxu0 %v3733_v21  ;;  %2377 = vmatpush1.bf16.msra.mxu1 %v3735_v22  ;;  %v2443_v22 = vld [vmem:[#allocation11] sm:$0xff] (!%p3745_p8) }
 0x1f9   : > { %2292 = vmatprep.subr.bf16.mxu0 %v3742_v23  ;;  %2378 = vmatprep.subr.bf16.mxu1 %v3744_v24  ;;  %v2459_v23 = vsub.s32 (!%p3745_p8), 3, %v4889_v11  ;;  %v2463_v24 = vsub.s32 (!%p3745_p8), 4, %v4889_v11 }
 0x1fc   : > { %2293 = vmatpush1.bf16.msra.mxu0 %v3741_v25  ;;  %2379 = vmatpush1.bf16.msra.mxu1 %v3743_v26  ;;  %v2467_v25 = vsub.s32 (!%p3745_p8), 5, %v4889_v11  ;;  %v2471_v26 = vsub.s32 (!%p3745_p8), 6, %v4889_v11 }
 0x1ff   : > { %2295 = vmatmul.mubr.bf16.vlgmr.msra.gmra.mrb[4].mxu0 %v4754_v28  ;;  %2381 = vmatmul.mubr.bf16.vlgmr.msra.gmra.mrb[4].mxu1 %v4754_v28 }
 0x252   : > { %v2124_v32 = vpop.f32.mrb[0].mxu0  ;;  %v2210_v36 = vpop.f32.mrb[0].mxu1 }
 0x253   : > { %v2391_v35 = vadd.f32 %v2124_v32, %v483_v29  ;;  %v2126_v37 = vpop.f32.mrb[1].mxu0  ;;  %v2393_v40 = vadd.f32 %v2210_v36, %v485_v30  ;;  %v2212_v42 = vpop.f32.mrb[1].mxu1  ;;  %v2448_v32 = vrot.slane (!%p3745_p8), %v2443_v22, %v4892_v18 }
 0x254   : > { %v2392_v41 = vadd.f32 %v2126_v37, %v484_v31  ;;  %v2128_v43 = vpop.f32.mrb[2].mxu0  ;;  %v2394_v45 = vadd.f32 %v2212_v42, %v486_v33  ;;  %v2214_v28 = vpop.f32.mrb[2].mxu1  ;;  %v2452_v33 = vrot.slane (!%p3745_p8), %v2443_v22, %v2451_v19  ;;  %v2472_v42 = vrot.slane (!%p3745_p8), %v2443_v22, %v2471_v26 }
 0x255   : > { %2407 = vst [vmem:[#allocation2] sm:$0xff] %v2391_v35  ;;  %v2399_v46 = vadd.f32 %v2128_v43, %v491_v34  ;;  %v2130_v47 = vpop.f32.mrb[3].mxu0  ;;  %2409 = vst [vmem:[#allocation2 + $0x10] sm:$0xff] %v2393_v40  ;;  %v2401_v48 = vadd.f32 %v2214_v28, %v493_v38  ;;  %v2216_v50 = vpop.f32.mrb[3].mxu1  ;;  %v2456_v34 = vrot.slane (!%p3745_p8), %v2443_v22, %v2455_v20  ;;  %v2475_v35 = vsub.s32 (!%p3745_p8), 7, %v4889_v11 }
 0x256   : > { %2408 = vst [vmem:[#allocation2 + $0x8] sm:$0xff] %v2392_v41  ;;  %v2400_v49 = vadd.f32 %v2130_v47, %v492_v39  ;;  %2410 = vst [vmem:[#allocation2 + $0x18] sm:$0xff] %v2394_v45  ;;  %v2402_v51 = vadd.f32 %v2216_v50, %v494_v44  ;;  %v2460_v39 = vrot.slane (!%p3745_p8), %v2443_v22, %v2459_v23 }
 0x257   : > { %2415 = vst [vmem:[#allocation2 + $0x40] sm:$0xff] %v2399_v46  ;;  %2417 = vst [vmem:[#allocation2 + $0x50] sm:$0xff] %v2401_v48  ;;  %v2464_v40 = vrot.slane (!%p3745_p8), %v2443_v22, %v2463_v24  ;;  %v2468_v41 = vrot.slane (!%p3745_p8), %v2443_v22, %v2467_v25  ;;  %v2476_v46 = vrot.slane (!%p3745_p8), %v2443_v22, %v2475_v35 }
 0x258   : > { %2416 = vst [vmem:[#allocation2 + $0x48] sm:$0xff] %v2400_v49  ;;  %2418 = vst [vmem:[#allocation2 + $0x58] sm:$0xff] %v2402_v51 }
 0x25c   : > { %v2427_v12 = vld [vmem:[#allocation2] sm:$0xff] (!%p3745_p8)  ;;  %v2429_v14 = vld [vmem:[#allocation2 + $0x10] sm:$0xff] (!%p3745_p8) }
 0x25d   : > { %v2428_v13 = vld [vmem:[#allocation2 + $0x8] sm:$0xff] (!%p3745_p8)  ;;  %v2430_v15 = vld [vmem:[#allocation2 + $0x18] sm:$0xff] (!%p3745_p8)  ;;  %v2485_v28 = vadd.f32 (!%p3745_p8), %v2448_v32, %v2427_v12  ;;  %v2487_v48 = vadd.f32 (!%p3745_p8), %v2456_v34, %v2429_v14 }
 0x25e   : > { %v2435_v31 = vld [vmem:[#allocation2 + $0x40] sm:$0xff] (!%p3745_p8)  ;;  %v2437_v37 = vld [vmem:[#allocation2 + $0x50] sm:$0xff] (!%p3745_p8)  ;;  %v2486_v47 = vadd.f32 (!%p3745_p8), %v2452_v33, %v2428_v13  ;;  %v2488_v50 = vadd.f32 (!%p3745_p8), %v2460_v39, %v2430_v15 }
 0x25f   : > { %v2436_v36 = vld [vmem:[#allocation2 + $0x48] sm:$0xff] (!%p3745_p8)  ;;  %v2438_v38 = vld [vmem:[#allocation2 + $0x58] sm:$0xff] (!%p3745_p8) }
 0x2d2   : > { %v2296_v54 = vpop.f32.mrb[4].mxu0  ;;  %v2382_v57 = vpop.f32.mrb[4].mxu1  ;;  %2426 = sbr.rel (%p3745_p8) target bundleno = 1626 (0x65a), region = 84 }
 0x2d3   : > { %v2395_v56 = vadd.f32 %v2296_v54, %v487_v52  ;;  %v2298_v58 = vpop.f32.mrb[5].mxu0  ;;  %v2397_v61 = vadd.f32 %v2382_v57, %v489_v17  ;;  %v2384_v63 = vpop.f32.mrb[5].mxu1  ;;  %v2493_v54 = vadd.f32 (!%p3745_p8), %v2448_v32, %v2435_v31 }
 0x2d4   : > { %v2396_v62 = vadd.f32 %v2298_v58, %v488_v53  ;;  %v2300_v0 = vpop.f32.mrb[6].mxu0  ;;  %v2398_v2 = vadd.f32 %v2384_v63, %v490_v55  ;;  %v2386_v4 = vpop.f32.mrb[6].mxu1  ;;  %v2494_v55 = vadd.f32 (!%p3745_p8), %v2452_v33, %v2436_v36  ;;  %v2503_v63 = vmax.f32 (!%p3745_p8), %v2487_v48, 0.0 }
 0x2d5   : > { %2411 = vst [vmem:[#allocation2 + $0x20] sm:$0xff] %v2395_v56  ;;  %v2403_v3 = vadd.f32 %v2300_v0, %v495_v60  ;;  %v2302_v5 = vpop.f32.mrb[7].mxu0  ;;  %2413 = vst [vmem:[#allocation2 + $0x30] sm:$0xff] %v2397_v61  ;;  %v2405_v6 = vadd.f32 %v2386_v4, %v497_v59  ;;  %v2388_v8 = vpop.f32.mrb[7].mxu1  ;;  %v2495_v60 = vadd.f32 (!%p3745_p8), %v2456_v34, %v2437_v37  ;;  %v2501_v61 = vmax.f32 (!%p3745_p8), %v2485_v28, 0.0 }
 0x2d6   : > { %2412 = vst [vmem:[#allocation2 + $0x28] sm:$0xff] %v2396_v62  ;;  %v2404_v7 = vadd.f32 %v2302_v5, %v496_v27  ;;  %2414 = vst [vmem:[#allocation2 + $0x38] sm:$0xff] %v2398_v2  ;;  %v2406_v9 = vadd.f32 %v2388_v8, %v498_v1  ;;  %v2496_v56 = vadd.f32 (!%p3745_p8), %v2460_v39, %v2438_v38  ;;  %v2502_v62 = vmax.f32 (!%p3745_p8), %v2486_v47, 0.0 }
 0x2d7   : > { %2419 = vst [vmem:[#allocation2 + $0x60] sm:$0xff] %v2403_v3  ;;  %2421 = vst [vmem:[#allocation2 + $0x70] sm:$0xff] %v2405_v6  ;;  %v2504_v0 = vmax.f32 (!%p3745_p8), %v2488_v50, 0.0  ;;  %v2509_v5 = vmax.f32 (!%p3745_p8), %v2493_v54, 0.0  ;;  %v2510_v6 = vmax.f32 (!%p3745_p8), %v2494_v55, 0.0 }
 0x2d8   : > { %2420 = vst [vmem:[#allocation2 + $0x68] sm:$0xff] %v2404_v7  ;;  %2422 = vst [vmem:[#allocation2 + $0x78] sm:$0xff] %v2406_v9  ;;  %v2511_v7 = vmax.f32 (!%p3745_p8), %v2495_v60, 0.0  ;;  %v2512_v8 = vmax.f32 (!%p3745_p8), %v2496_v56, 0.0 }
 0x2d9   : > { %v4908_v14 = vpack.c.bf16 %v2509_v5, %v2501_v61  ;;  %v2518_v15 = vpack.c.bf16 %v2510_v6, %v2502_v62 }
 0x2dc   : > { %v2431_v16 = vld [vmem:[#allocation2 + $0x20] sm:$0xff]  ;;  %v2433_v29 = vld [vmem:[#allocation2 + $0x30] sm:$0xff] }
 0x2dd   : > { %v2432_v21 = vld [vmem:[#allocation2 + $0x28] sm:$0xff]  ;;  %v2434_v30 = vld [vmem:[#allocation2 + $0x38] sm:$0xff]  ;;  %v2489_v51 = vadd.f32 %v2464_v40, %v2431_v16  ;;  %v2491_v17 = vadd.f32 %v2472_v42, %v2433_v29  ;;  %v4910_v16 = vpack.c.bf16 %v2511_v7, %v2503_v63 }
 0x2de   : > { %v2439_v43 = vld [vmem:[#allocation2 + $0x60] sm:$0xff]  ;;  %v2441_v45 = vld [vmem:[#allocation2 + $0x70] sm:$0xff]  ;;  %v2490_v52 = vadd.f32 %v2468_v41, %v2432_v21  ;;  %v2492_v53 = vadd.f32 %v2476_v46, %v2434_v30  ;;  %v4912_v21 = vpack.c.bf16 %v2512_v8, %v2504_v0 }
 0x2df   : > { %v2440_v44 = vld [vmem:[#allocation2 + $0x68] sm:$0xff]  ;;  %v2442_v49 = vld [vmem:[#allocation2 + $0x78] sm:$0xff]  ;;  %v2497_v57 = vadd.f32 %v2464_v40, %v2439_v43  ;;  %v2499_v59 = vadd.f32 %v2472_v42, %v2441_v45  ;;  %v2505_v1 = vmax.f32 %v2489_v51, 0.0  ;;  %v2507_v3 = vmax.f32 %v2491_v17, 0.0 }
 0x2e0   : > { %v2498_v58 = vadd.f32 %v2468_v41, %v2440_v44  ;;  %v2500_v27 = vadd.f32 %v2476_v46, %v2442_v49  ;;  %v2506_v2 = vmax.f32 %v2490_v52, 0.0  ;;  %v2508_v4 = vmax.f32 %v2492_v53, 0.0 }
 0x2e1   : > { %v2513_v9 = vmax.f32 %v2497_v57, 0.0  ;;  %v2515_v12 = vmax.f32 %v2499_v59, 0.0 }
 0x2e2   : > { %v2514_v10 = vmax.f32 %v2498_v58, 0.0  ;;  %v2516_v13 = vmax.f32 %v2500_v27, 0.0 }
 0x2e3   : > { %v4914_v22 = vpack.c.bf16 %v2513_v9, %v2505_v1  ;;  %v4918_v25 = vpack.c.bf16 %v2515_v12, %v2507_v3 }
 0x2e4   : > { %v4916_v24 = vpack.c.bf16 %v2514_v10, %v2506_v2  ;;  %v4920_v26 = vpack.c.bf16 %v2516_v13, %v2508_v4 }
 0x2e5   : > { %4202 = dma.done.wait [#allocation5], 32768 }
 0x2e6   : > { %4203 = vsyncadd [#allocation5], 4294934528  ;;  %2839 = vmatprep.mubr.bf16.mxu0 %v2518_v15  ;;  %3011 = vmatprep.mubr.bf16.mxu1 %v2518_v15  ;;  %v2530_v29 = vld [vmem:[#allocation3 + $0x8] sm:$0xff]  ;;  %v2532_v30 = vld [vmem:[#allocation3 + $0x18] sm:$0xff] }
 0x2e7   : > { %v2529_v31 = vld [vmem:[#allocation3] sm:$0xff]  ;;  %2807 = vmatprep.subr.bf16.mxu0 %v2530_v29  ;;  %2979 = vmatprep.subr.bf16.mxu1 %v2532_v30  ;;  %v2531_v32 = vld [vmem:[#allocation3 + $0x10] sm:$0xff]  ;;  %v2534_v33 = vld [vmem:[#allocation3 + $0x28] sm:$0xff] }
 0x2e8   : > { %v2536_v34 = vld [vmem:[#allocation3 + $0x38] sm:$0xff]  ;;  %2808 = vmatpush1.bf16.msra.mxu0 %v2529_v31  ;;  %2980 = vmatpush1.bf16.msra.mxu1 %v2531_v32  ;;  %v2533_v35 = vld [vmem:[#allocation3 + $0x20] sm:$0xff]  ;;  %v2535_v36 = vld [vmem:[#allocation3 + $0x30] sm:$0xff] }
 0x2e9   : > { %2809 = vmatprep.subr.bf16.mxu0 %v2534_v33  ;;  %2981 = vmatprep.subr.bf16.mxu1 %v2536_v34  ;;  %v2538_v37 = vld [vmem:[#allocation3 + $0x48] sm:$0xff]  ;;  %v2540_v38 = vld [vmem:[#allocation3 + $0x58] sm:$0xff]  ;;  %v2537_v39 = vld [vmem:[#allocation3 + $0x40] sm:$0xff] }
 0x2ea   : > { %v2539_v40 = vld [vmem:[#allocation3 + $0x50] sm:$0xff]  ;;  %v2542_v41 = vld [vmem:[#allocation3 + $0x68] sm:$0xff]  ;;  %v2544_v42 = vld [vmem:[#allocation3 + $0x78] sm:$0xff] }
 0x2eb   : > { %v2541_v43 = vld [vmem:[#allocation3 + $0x60] sm:$0xff]  ;;  %v2543_v44 = vld [vmem:[#allocation3 + $0x70] sm:$0xff]  ;;  %v2546_v45 = vld [vmem:[#allocation3 + $0x88] sm:$0xff] }
 0x2ec   : > { %2810 = vmatpush1.bf16.msra.mxu0 %v2533_v35  ;;  %2982 = vmatpush1.bf16.msra.mxu1 %v2535_v36  ;;  %v2548_v46 = vld [vmem:[#allocation3 + $0x98] sm:$0xff]  ;;  %v2545_v28 = vld [vmem:[#allocation3 + $0x80] sm:$0xff]  ;;  %v2547_v47 = vld [vmem:[#allocation3 + $0x90] sm:$0xff] }
 0x2ed   : > { %2811 = vmatprep.subr.bf16.mxu0 %v2538_v37  ;;  %2983 = vmatprep.subr.bf16.mxu1 %v2540_v38  ;;  %v2550_v48 = vld [vmem:[#allocation3 + $0xa8] sm:$0xff]  ;;  %v2552_v49 = vld [vmem:[#allocation3 + $0xb8] sm:$0xff]  ;;  %v2549_v50 = vld [vmem:[#allocation3 + $0xa0] sm:$0xff] }
 0x2ee   : > { %v2551_v51 = vld [vmem:[#allocation3 + $0xb0] sm:$0xff]  ;;  %v2554_v52 = vld [vmem:[#allocation3 + $0xc8] sm:$0xff]  ;;  %v2556_v17 = vld [vmem:[#allocation3 + $0xd8] sm:$0xff] }
 0x2ef   : > { %v2553_v53 = vld [vmem:[#allocation3 + $0xc0] sm:$0xff]  ;;  %v2555_v54 = vld [vmem:[#allocation3 + $0xd0] sm:$0xff]  ;;  %v2558_v55 = vld [vmem:[#allocation3 + $0xe8] sm:$0xff] }
 0x2f0   : > { %2812 = vmatpush1.bf16.msra.mxu0 %v2537_v39  ;;  %2984 = vmatpush1.bf16.msra.mxu1 %v2539_v40  ;;  %v2560_v60 = vld [vmem:[#allocation3 + $0xf8] sm:$0xff]  ;;  %v2557_v56 = vld [vmem:[#allocation3 + $0xe0] sm:$0xff]  ;;  %v2559_v57 = vld [vmem:[#allocation3 + $0xf0] sm:$0xff] }
 0x2f1   : > { %2813 = vmatprep.subr.bf16.mxu0 %v2542_v41  ;;  %2985 = vmatprep.subr.bf16.mxu1 %v2544_v42  ;;  %v2562_v58 = vld [vmem:[#allocation3 + $0x108] sm:$0xff]  ;;  %v2564_v59 = vld [vmem:[#allocation3 + $0x118] sm:$0xff]  ;;  %v2561_v27 = vld [vmem:[#allocation3 + $0x100] sm:$0xff] }
 0x2f2   : > { %v2563_v61 = vld [vmem:[#allocation3 + $0x110] sm:$0xff]  ;;  %v2566_v62 = vld [vmem:[#allocation3 + $0x128] sm:$0xff]  ;;  %v2568_v63 = vld [vmem:[#allocation3 + $0x138] sm:$0xff] }
 0x2f3   : > { %v2565_v0 = vld [vmem:[#allocation3 + $0x120] sm:$0xff]  ;;  %v2567_v1 = vld [vmem:[#allocation3 + $0x130] sm:$0xff]  ;;  %v2570_v2 = vld [vmem:[#allocation3 + $0x148] sm:$0xff] }
 0x2f4   : > { %2814 = vmatpush1.bf16.msra.mxu0 %v2541_v43  ;;  %2986 = vmatpush1.bf16.msra.mxu1 %v2543_v44  ;;  %v2572_v3 = vld [vmem:[#allocation3 + $0x158] sm:$0xff]  ;;  %v2569_v4 = vld [vmem:[#allocation3 + $0x140] sm:$0xff]  ;;  %v2571_v5 = vld [vmem:[#allocation3 + $0x150] sm:$0xff] }
 0x2f5   : > { %2815 = vmatprep.subr.bf16.mxu0 %v2546_v45  ;;  %2987 = vmatprep.subr.bf16.mxu1 %v2548_v46  ;;  %v2574_v6 = vld [vmem:[#allocation3 + $0x168] sm:$0xff]  ;;  %v2576_v7 = vld [vmem:[#allocation3 + $0x178] sm:$0xff]  ;;  %v2573_v8 = vld [vmem:[#allocation3 + $0x160] sm:$0xff] }
 0x2f6   : > { %v2575_v9 = vld [vmem:[#allocation3 + $0x170] sm:$0xff]  ;;  %v2578_v10 = vld [vmem:[#allocation3 + $0x188] sm:$0xff]  ;;  %v2580_v12 = vld [vmem:[#allocation3 + $0x198] sm:$0xff] }
 0x2f7   : > { %v2577_v13 = vld [vmem:[#allocation3 + $0x180] sm:$0xff]  ;;  %v2579_v15 = vld [vmem:[#allocation3 + $0x190] sm:$0xff]  ;;  %v2582_v29 = vld [vmem:[#allocation3 + $0x1a8] sm:$0xff] }
 0x2f8   : > { %2816 = vmatpush1.bf16.msra.mxu0 %v2545_v28  ;;  %2988 = vmatpush1.bf16.msra.mxu1 %v2547_v47  ;;  %v2584_v30 = vld [vmem:[#allocation3 + $0x1b8] sm:$0xff]  ;;  %v2581_v31 = vld [vmem:[#allocation3 + $0x1a0] sm:$0xff]  ;;  %v2583_v32 = vld [vmem:[#allocation3 + $0x1b0] sm:$0xff] }
 0x2f9   : > { %2817 = vmatprep.subr.bf16.mxu0 %v2550_v48  ;;  %2989 = vmatprep.subr.bf16.mxu1 %v2552_v49  ;;  %v2586_v33 = vld [vmem:[#allocation3 + $0x1c8] sm:$0xff]  ;;  %v2588_v34 = vld [vmem:[#allocation3 + $0x1d8] sm:$0xff]  ;;  %v2585_v35 = vld [vmem:[#allocation3 + $0x1c0] sm:$0xff] }
 0x2fa   : > { %v2587_v36 = vld [vmem:[#allocation3 + $0x1d0] sm:$0xff]  ;;  %v2590_v37 = vld [vmem:[#allocation3 + $0x1e8] sm:$0xff]  ;;  %v2592_v38 = vld [vmem:[#allocation3 + $0x1f8] sm:$0xff] }
 0x2fb   : > { %v2589_v39 = vld [vmem:[#allocation3 + $0x1e0] sm:$0xff]  ;;  %v2591_v40 = vld [vmem:[#allocation3 + $0x1f0] sm:$0xff]  ;;  %v2594_v41 = vld [vmem:[#allocation3 + $0x208] sm:$0xff] }
 0x2fc   : > { %2818 = vmatpush1.bf16.msra.mxu0 %v2549_v50  ;;  %2990 = vmatpush1.bf16.msra.mxu1 %v2551_v51  ;;  %v2596_v42 = vld [vmem:[#allocation3 + $0x218] sm:$0xff]  ;;  %v2593_v43 = vld [vmem:[#allocation3 + $0x200] sm:$0xff]  ;;  %v2595_v44 = vld [vmem:[#allocation3 + $0x210] sm:$0xff] }
 0x2fd   : > { %2819 = vmatprep.subr.bf16.mxu0 %v2554_v52  ;;  %2991 = vmatprep.subr.bf16.mxu1 %v2556_v17  ;;  %v2598_v45 = vld [vmem:[#allocation3 + $0x228] sm:$0xff]  ;;  %v2600_v46 = vld [vmem:[#allocation3 + $0x238] sm:$0xff]  ;;  %v2597_v28 = vld [vmem:[#allocation3 + $0x220] sm:$0xff] }
 0x2fe   : > { %v2599_v47 = vld [vmem:[#allocation3 + $0x230] sm:$0xff]  ;;  %v2602_v48 = vld [vmem:[#allocation3 + $0x248] sm:$0xff]  ;;  %v2604_v49 = vld [vmem:[#allocation3 + $0x258] sm:$0xff] }
 0x2ff   : > { %v2601_v50 = vld [vmem:[#allocation3 + $0x240] sm:$0xff]  ;;  %v2603_v51 = vld [vmem:[#allocation3 + $0x250] sm:$0xff]  ;;  %v2606_v52 = vld [vmem:[#allocation3 + $0x268] sm:$0xff] }
 0x300   : > { %2820 = vmatpush1.bf16.msra.mxu0 %v2553_v53  ;;  %2992 = vmatpush1.bf16.msra.mxu1 %v2555_v54  ;;  %v2605_v17 = vld [vmem:[#allocation3 + $0x260] sm:$0xff]  ;;  %v2607_v53 = vld [vmem:[#allocation3 + $0x270] sm:$0xff]  ;;  %v2610_v54 = vld [vmem:[#allocation3 + $0x288] sm:$0xff] }
 0x301   : > { %2821 = vmatprep.subr.bf16.mxu0 %v2558_v55  ;;  %2993 = vmatprep.subr.bf16.mxu1 %v2560_v60  ;;  %v2612_v55 = vld [vmem:[#allocation3 + $0x298] sm:$0xff]  ;;  %v2611_v60 = vld [vmem:[#allocation3 + $0x290] sm:$0xff] }
 0x304   : > { %2822 = vmatpush1.bf16.msra.mxu0 %v2557_v56  ;;  %2994 = vmatpush1.bf16.msra.mxu1 %v2559_v57  ;;  %v2614_v56 = vld [vmem:[#allocation3 + $0x2a8] sm:$0xff]  ;;  %v2616_v57 = vld [vmem:[#allocation3 + $0x2b8] sm:$0xff] }
 0x305   : > { %2823 = vmatprep.subr.bf16.mxu0 %v2562_v58  ;;  %2995 = vmatprep.subr.bf16.mxu1 %v2564_v59  ;;  %v2613_v58 = vld [vmem:[#allocation3 + $0x2a0] sm:$0xff]  ;;  %v2615_v59 = vld [vmem:[#allocation3 + $0x2b0] sm:$0xff] }
 0x308   : > { %2824 = vmatpush1.bf16.msra.mxu0 %v2561_v27  ;;  %2996 = vmatpush1.bf16.msra.mxu1 %v2563_v61  ;;  %v2618_v27 = vld [vmem:[#allocation3 + $0x2c8] sm:$0xff]  ;;  %v2620_v61 = vld [vmem:[#allocation3 + $0x2d8] sm:$0xff] }
 0x309   : > { %2825 = vmatprep.subr.bf16.mxu0 %v2566_v62  ;;  %2997 = vmatprep.subr.bf16.mxu1 %v2568_v63  ;;  %v2617_v62 = vld [vmem:[#allocation3 + $0x2c0] sm:$0xff]  ;;  %v2619_v63 = vld [vmem:[#allocation3 + $0x2d0] sm:$0xff] }
 0x30c   : > { %2826 = vmatpush1.bf16.msra.mxu0 %v2565_v0  ;;  %2998 = vmatpush1.bf16.msra.mxu1 %v2567_v1  ;;  %v2622_v0 = vld [vmem:[#allocation3 + $0x2e8] sm:$0xff]  ;;  %v2624_v1 = vld [vmem:[#allocation3 + $0x2f8] sm:$0xff] }
 0x30d   : > { %2827 = vmatprep.subr.bf16.mxu0 %v2570_v2  ;;  %2999 = vmatprep.subr.bf16.mxu1 %v2572_v3  ;;  %v2621_v2 = vld [vmem:[#allocation3 + $0x2e0] sm:$0xff]  ;;  %v2623_v3 = vld [vmem:[#allocation3 + $0x2f0] sm:$0xff] }
 0x310   : > { %2828 = vmatpush1.bf16.msra.mxu0 %v2569_v4  ;;  %3000 = vmatpush1.bf16.msra.mxu1 %v2571_v5  ;;  %v2626_v4 = vld [vmem:[#allocation3 + $0x308] sm:$0xff]  ;;  %v2628_v5 = vld [vmem:[#allocation3 + $0x318] sm:$0xff] }
 0x311   : > { %2829 = vmatprep.subr.bf16.mxu0 %v2574_v6  ;;  %3001 = vmatprep.subr.bf16.mxu1 %v2576_v7  ;;  %v2625_v6 = vld [vmem:[#allocation3 + $0x300] sm:$0xff]  ;;  %v2627_v7 = vld [vmem:[#allocation3 + $0x310] sm:$0xff] }
 0x314   : > { %2830 = vmatpush1.bf16.msra.mxu0 %v2573_v8  ;;  %3002 = vmatpush1.bf16.msra.mxu1 %v2575_v9  ;;  %v2630_v8 = vld [vmem:[#allocation3 + $0x328] sm:$0xff]  ;;  %v2632_v9 = vld [vmem:[#allocation3 + $0x338] sm:$0xff] }
 0x315   : > { %2831 = vmatprep.subr.bf16.mxu0 %v2578_v10  ;;  %3003 = vmatprep.subr.bf16.mxu1 %v2580_v12  ;;  %v2629_v10 = vld [vmem:[#allocation3 + $0x320] sm:$0xff]  ;;  %v2631_v12 = vld [vmem:[#allocation3 + $0x330] sm:$0xff] }
 0x318   : > { %2832 = vmatpush1.bf16.msra.mxu0 %v2577_v13  ;;  %3004 = vmatpush1.bf16.msra.mxu1 %v2579_v15  ;;  %v2634_v13 = vld [vmem:[#allocation3 + $0x348] sm:$0xff]  ;;  %v2636_v15 = vld [vmem:[#allocation3 + $0x358] sm:$0xff] }
 0x319   : > { %2833 = vmatprep.subr.bf16.mxu0 %v2582_v29  ;;  %3005 = vmatprep.subr.bf16.mxu1 %v2584_v30  ;;  %v2633_v29 = vld [vmem:[#allocation3 + $0x340] sm:$0xff]  ;;  %v2635_v30 = vld [vmem:[#allocation3 + $0x350] sm:$0xff] }
 0x31c   : > { %2834 = vmatpush1.bf16.msra.mxu0 %v2581_v31  ;;  %3006 = vmatpush1.bf16.msra.mxu1 %v2583_v32  ;;  %v2638_v31 = vld [vmem:[#allocation3 + $0x368] sm:$0xff]  ;;  %v2640_v32 = vld [vmem:[#allocation3 + $0x378] sm:$0xff] }
 0x31d   : > { %2835 = vmatprep.subr.bf16.mxu0 %v2586_v33  ;;  %3007 = vmatprep.subr.bf16.mxu1 %v2588_v34  ;;  %v2637_v33 = vld [vmem:[#allocation3 + $0x360] sm:$0xff]  ;;  %v2639_v34 = vld [vmem:[#allocation3 + $0x370] sm:$0xff] }
 0x320   : > { %2836 = vmatpush1.bf16.msra.mxu0 %v2585_v35  ;;  %3008 = vmatpush1.bf16.msra.mxu1 %v2587_v36  ;;  %v2642_v35 = vld [vmem:[#allocation3 + $0x388] sm:$0xff]  ;;  %v2644_v36 = vld [vmem:[#allocation3 + $0x398] sm:$0xff] }
 0x321   : > { %2837 = vmatprep.subr.bf16.mxu0 %v2590_v37  ;;  %3009 = vmatprep.subr.bf16.mxu1 %v2592_v38  ;;  %v2641_v37 = vld [vmem:[#allocation3 + $0x380] sm:$0xff]  ;;  %v2643_v38 = vld [vmem:[#allocation3 + $0x390] sm:$0xff] }
 0x324   : > { %2838 = vmatpush1.bf16.msra.mxu0 %v2589_v39  ;;  %3010 = vmatpush1.bf16.msra.mxu1 %v2591_v40  ;;  %v2646_v39 = vld [vmem:[#allocation3 + $0x3a8] sm:$0xff]  ;;  %v2648_v40 = vld [vmem:[#allocation3 + $0x3b8] sm:$0xff] }
 0x325   : > { %2850 = vmatprep.subr.bf16.mxu0 %v2594_v41  ;;  %3022 = vmatprep.subr.bf16.mxu1 %v2596_v42  ;;  %v2645_v41 = vld [vmem:[#allocation3 + $0x3a0] sm:$0xff]  ;;  %v2647_v42 = vld [vmem:[#allocation3 + $0x3b0] sm:$0xff] }
 0x327   : > { %2840 = vmatmul.mubr.bf16.vlgmr.msra.gmra.mrb[0].mxu0 %v4908_v14  ;;  %3012 = vmatmul.mubr.bf16.vlgmr.msra.gmra.mrb[0].mxu1 %v4908_v14  ;;  %v2608_v14 = vld [vmem:[#allocation3 + $0x278] sm:$0xff] }
 0x328   : > { %2851 = vmatpush1.bf16.msra.mxu0 %v2593_v43  ;;  %3023 = vmatpush1.bf16.msra.mxu1 %v2595_v44  ;;  %v2650_v43 = vld [vmem:[#allocation3 + $0x3c8] sm:$0xff]  ;;  %v2652_v44 = vld [vmem:[#allocation3 + $0x3d8] sm:$0xff] }
 0x329   : > { %2852 = vmatprep.subr.bf16.mxu0 %v2598_v45  ;;  %3024 = vmatprep.subr.bf16.mxu1 %v2600_v46  ;;  %v2649_v45 = vld [vmem:[#allocation3 + $0x3c0] sm:$0xff]  ;;  %v2651_v46 = vld [vmem:[#allocation3 + $0x3d0] sm:$0xff] }
 0x32a   : > { %2882 = vmatprep.mubr.bf16.mxu0 %v4912_v21  ;;  %3054 = vmatprep.mubr.bf16.mxu1 %v4912_v21  ;;  %v2609_v21 = vld [vmem:[#allocation3 + $0x280] sm:$0xff] }
 0x32c   : > { %2853 = vmatpush1.bf16.msra.mxu0 %v2597_v28  ;;  %3025 = vmatpush1.bf16.msra.mxu1 %v2599_v47  ;;  %v2654_v28 = vld [vmem:[#allocation3 + $0x3e8] sm:$0xff]  ;;  %v2656_v47 = vld [vmem:[#allocation3 + $0x3f8] sm:$0xff] }
 0x32d   : > { %2854 = vmatprep.subr.bf16.mxu0 %v2602_v48  ;;  %3026 = vmatprep.subr.bf16.mxu1 %v2604_v49  ;;  %v2653_v48 = vld [vmem:[#allocation3 + $0x3e0] sm:$0xff]  ;;  %v2655_v49 = vld [vmem:[#allocation3 + $0x3f0] sm:$0xff] }
 0x330   : > { %2855 = vmatpush1.bf16.msra.mxu0 %v2601_v50  ;;  %3027 = vmatpush1.bf16.msra.mxu1 %v2603_v51  ;;  %v2658_v50 = vld [vmem:[#allocation3 + $0x408] sm:$0xff]  ;;  %v2660_v51 = vld [vmem:[#allocation3 + $0x418] sm:$0xff] }
 0x331   : > { %2856 = vmatprep.subr.bf16.mxu0 %v2606_v52  ;;  %3028 = vmatprep.subr.bf16.mxu1 %v2608_v14  ;;  %v2657_v52 = vld [vmem:[#allocation3 + $0x400] sm:$0xff]  ;;  %v2659_v14 = vld [vmem:[#allocation3 + $0x410] sm:$0xff] }
 0x334   : > { %2857 = vmatpush1.bf16.msra.mxu0 %v2605_v17  ;;  %3029 = vmatpush1.bf16.msra.mxu1 %v2607_v53  ;;  %v2662_v17 = vld [vmem:[#allocation3 + $0x428] sm:$0xff]  ;;  %v2664_v53 = vld [vmem:[#allocation3 + $0x438] sm:$0xff] }
 0x335   : > { %2858 = vmatprep.subr.bf16.mxu0 %v2610_v54  ;;  %3030 = vmatprep.subr.bf16.mxu1 %v2612_v55  ;;  %v2661_v54 = vld [vmem:[#allocation3 + $0x420] sm:$0xff]  ;;  %v2663_v55 = vld [vmem:[#allocation3 + $0x430] sm:$0xff] }
 0x338   : > { %2859 = vmatpush1.bf16.msra.mxu0 %v2609_v21  ;;  %3031 = vmatpush1.bf16.msra.mxu1 %v2611_v60  ;;  %v2666_v21 = vld [vmem:[#allocation3 + $0x448] sm:$0xff]  ;;  %v2668_v60 = vld [vmem:[#allocation3 + $0x458] sm:$0xff] }
 0x339   : > { %2860 = vmatprep.subr.bf16.mxu0 %v2614_v56  ;;  %3032 = vmatprep.subr.bf16.mxu1 %v2616_v57  ;;  %v2665_v56 = vld [vmem:[#allocation3 + $0x440] sm:$0xff]  ;;  %v2667_v57 = vld [vmem:[#allocation3 + $0x450] sm:$0xff] }
 0x33c   : > { %2861 = vmatpush1.bf16.msra.mxu0 %v2613_v58  ;;  %3033 = vmatpush1.bf16.msra.mxu1 %v2615_v59  ;;  %v2670_v58 = vld [vmem:[#allocation3 + $0x468] sm:$0xff]  ;;  %v2669_v59 = vld [vmem:[#allocation3 + $0x460] sm:$0xff] }
 0x33d   : > { %2862 = vmatprep.subr.bf16.mxu0 %v2618_v27  ;;  %3034 = vmatprep.subr.bf16.mxu1 %v2620_v61  ;;  %v2671_v27 = vld [vmem:[#allocation3 + $0x470] sm:$0xff]  ;;  %v2674_v61 = vld [vmem:[#allocation3 + $0x488] sm:$0xff] }
 0x340   : > { %2863 = vmatpush1.bf16.msra.mxu0 %v2617_v62  ;;  %3035 = vmatpush1.bf16.msra.mxu1 %v2619_v63  ;;  %v2676_v62 = vld [vmem:[#allocation3 + $0x498] sm:$0xff]  ;;  %v2675_v63 = vld [vmem:[#allocation3 + $0x490] sm:$0xff] }
 0x341   : > { %2864 = vmatprep.subr.bf16.mxu0 %v2622_v0  ;;  %3036 = vmatprep.subr.bf16.mxu1 %v2624_v1  ;;  %v2678_v0 = vld [vmem:[#allocation3 + $0x4a8] sm:$0xff]  ;;  %v2680_v1 = vld [vmem:[#allocation3 + $0x4b8] sm:$0xff] }
 0x344   : > { %2865 = vmatpush1.bf16.msra.mxu0 %v2621_v2  ;;  %3037 = vmatpush1.bf16.msra.mxu1 %v2623_v3  ;;  %v2677_v2 = vld [vmem:[#allocation3 + $0x4a0] sm:$0xff]  ;;  %v2679_v3 = vld [vmem:[#allocation3 + $0x4b0] sm:$0xff] }
 0x345   : > { %2866 = vmatprep.subr.bf16.mxu0 %v2626_v4  ;;  %3038 = vmatprep.subr.bf16.mxu1 %v2628_v5  ;;  %v2682_v4 = vld [vmem:[#allocation3 + $0x4c8] sm:$0xff]  ;;  %v2684_v5 = vld [vmem:[#allocation3 + $0x4d8] sm:$0xff] }
 0x348   : > { %2867 = vmatpush1.bf16.msra.mxu0 %v2625_v6  ;;  %3039 = vmatpush1.bf16.msra.mxu1 %v2627_v7  ;;  %v2681_v6 = vld [vmem:[#allocation3 + $0x4c0] sm:$0xff]  ;;  %v2683_v7 = vld [vmem:[#allocation3 + $0x4d0] sm:$0xff] }
 0x349   : > { %2868 = vmatprep.subr.bf16.mxu0 %v2630_v8  ;;  %3040 = vmatprep.subr.bf16.mxu1 %v2632_v9  ;;  %v2686_v8 = vld [vmem:[#allocation3 + $0x4e8] sm:$0xff]  ;;  %v2688_v9 = vld [vmem:[#allocation3 + $0x4f8] sm:$0xff] }
 0x34c   : > { %2869 = vmatpush1.bf16.msra.mxu0 %v2629_v10  ;;  %3041 = vmatpush1.bf16.msra.mxu1 %v2631_v12  ;;  %v2685_v10 = vld [vmem:[#allocation3 + $0x4e0] sm:$0xff]  ;;  %v2687_v12 = vld [vmem:[#allocation3 + $0x4f0] sm:$0xff] }
 0x34d   : > { %2870 = vmatprep.subr.bf16.mxu0 %v2634_v13  ;;  %3042 = vmatprep.subr.bf16.mxu1 %v2636_v15  ;;  %v2690_v13 = vld [vmem:[#allocation3 + $0x508] sm:$0xff]  ;;  %v2692_v15 = vld [vmem:[#allocation3 + $0x518] sm:$0xff] }
 0x350   : > { %2871 = vmatpush1.bf16.msra.mxu0 %v2633_v29  ;;  %3043 = vmatpush1.bf16.msra.mxu1 %v2635_v30  ;;  %v2689_v29 = vld [vmem:[#allocation3 + $0x500] sm:$0xff]  ;;  %v2691_v30 = vld [vmem:[#allocation3 + $0x510] sm:$0xff] }
 0x351   : > { %2872 = vmatprep.subr.bf16.mxu0 %v2638_v31  ;;  %3044 = vmatprep.subr.bf16.mxu1 %v2640_v32  ;;  %v2694_v31 = vld [vmem:[#allocation3 + $0x528] sm:$0xff]  ;;  %v2696_v32 = vld [vmem:[#allocation3 + $0x538] sm:$0xff] }
 0x354   : > { %2873 = vmatpush1.bf16.msra.mxu0 %v2637_v33  ;;  %3045 = vmatpush1.bf16.msra.mxu1 %v2639_v34  ;;  %v2693_v33 = vld [vmem:[#allocation3 + $0x520] sm:$0xff]  ;;  %v2695_v34 = vld [vmem:[#allocation3 + $0x530] sm:$0xff] }
 0x355   : > { %2874 = vmatprep.subr.bf16.mxu0 %v2642_v35  ;;  %3046 = vmatprep.subr.bf16.mxu1 %v2644_v36  ;;  %v2698_v35 = vld [vmem:[#allocation3 + $0x548] sm:$0xff]  ;;  %v2700_v36 = vld [vmem:[#allocation3 + $0x558] sm:$0xff] }
 0x358   : > { %2875 = vmatpush1.bf16.msra.mxu0 %v2641_v37  ;;  %3047 = vmatpush1.bf16.msra.mxu1 %v2643_v38  ;;  %v2697_v37 = vld [vmem:[#allocation3 + $0x540] sm:$0xff]  ;;  %v2699_v38 = vld [vmem:[#allocation3 + $0x550] sm:$0xff] }
 0x359   : > { %2876 = vmatprep.subr.bf16.mxu0 %v2646_v39  ;;  %3048 = vmatprep.subr.bf16.mxu1 %v2648_v40  ;;  %v2702_v39 = vld [vmem:[#allocation3 + $0x568] sm:$0xff]  ;;  %v2704_v40 = vld [vmem:[#allocation3 + $0x578] sm:$0xff] }
 0x35c   : > { %2877 = vmatpush1.bf16.msra.mxu0 %v2645_v41  ;;  %3049 = vmatpush1.bf16.msra.mxu1 %v2647_v42  ;;  %v2701_v41 = vld [vmem:[#allocation3 + $0x560] sm:$0xff]  ;;  %v2703_v42 = vld [vmem:[#allocation3 + $0x570] sm:$0xff] }
 0x35d   : > { %2878 = vmatprep.subr.bf16.mxu0 %v2650_v43  ;;  %3050 = vmatprep.subr.bf16.mxu1 %v2652_v44  ;;  %v2706_v43 = vld [vmem:[#allocation3 + $0x588] sm:$0xff]  ;;  %v2708_v44 = vld [vmem:[#allocation3 + $0x598] sm:$0xff] }
 0x360   : > { %2879 = vmatpush1.bf16.msra.mxu0 %v2649_v45  ;;  %3051 = vmatpush1.bf16.msra.mxu1 %v2651_v46  ;;  %v2705_v45 = vld [vmem:[#allocation3 + $0x580] sm:$0xff]  ;;  %v2707_v46 = vld [vmem:[#allocation3 + $0x590] sm:$0xff] }
 0x361   : > { %2880 = vmatprep.subr.bf16.mxu0 %v2654_v28  ;;  %3052 = vmatprep.subr.bf16.mxu1 %v2656_v47  ;;  %v2710_v28 = vld [vmem:[#allocation3 + $0x5a8] sm:$0xff]  ;;  %v2712_v47 = vld [vmem:[#allocation3 + $0x5b8] sm:$0xff] }
 0x364   : > { %2881 = vmatpush1.bf16.msra.mxu0 %v2653_v48  ;;  %3053 = vmatpush1.bf16.msra.mxu1 %v2655_v49  ;;  %v2709_v48 = vld [vmem:[#allocation3 + $0x5a0] sm:$0xff]  ;;  %v2711_v49 = vld [vmem:[#allocation3 + $0x5b0] sm:$0xff] }
 0x365   : > { %2893 = vmatprep.subr.bf16.mxu0 %v2658_v50  ;;  %3065 = vmatprep.subr.bf16.mxu1 %v2660_v51  ;;  %v2714_v50 = vld [vmem:[#allocation3 + $0x5c8] sm:$0xff]  ;;  %v2716_v51 = vld [vmem:[#allocation3 + $0x5d8] sm:$0xff] }
 0x367   : > { %2883 = vmatmul.mubr.bf16.vlgmr.msra.gmra.mrb[0].mxu0 %v4910_v16  ;;  %3055 = vmatmul.mubr.bf16.vlgmr.msra.gmra.mrb[0].mxu1 %v4910_v16  ;;  %v2672_v16 = vld [vmem:[#allocation3 + $0x478] sm:$0xff] }
 0x368   : > { %2894 = vmatpush1.bf16.msra.mxu0 %v2657_v52  ;;  %3066 = vmatpush1.bf16.msra.mxu1 %v2659_v14  ;;  %v2713_v52 = vld [vmem:[#allocation3 + $0x5c0] sm:$0xff]  ;;  %v2715_v14 = vld [vmem:[#allocation3 + $0x5d0] sm:$0xff] }
 0x369   : > { %2895 = vmatprep.subr.bf16.mxu0 %v2662_v17  ;;  %3067 = vmatprep.subr.bf16.mxu1 %v2664_v53  ;;  %v2718_v17 = vld [vmem:[#allocation3 + $0x5e8] sm:$0xff]  ;;  %v2720_v53 = vld [vmem:[#allocation3 + $0x5f8] sm:$0xff] }
 0x36a   : > { %2925 = vmatprep.mubr.bf16.mxu0 %v4916_v24  ;;  %3097 = vmatprep.mubr.bf16.mxu1 %v4916_v24  ;;  %v2673_v24 = vld [vmem:[#allocation3 + $0x480] sm:$0xff] }
 0x36c   : > { %2896 = vmatpush1.bf16.msra.mxu0 %v2661_v54  ;;  %3068 = vmatpush1.bf16.msra.mxu1 %v2663_v55  ;;  %v2717_v54 = vld [vmem:[#allocation3 + $0x5e0] sm:$0xff]  ;;  %v2719_v55 = vld [vmem:[#allocation3 + $0x5f0] sm:$0xff] }
 0x36d   : > { %2897 = vmatprep.subr.bf16.mxu0 %v2666_v21  ;;  %3069 = vmatprep.subr.bf16.mxu1 %v2668_v60  ;;  %v2722_v21 = vld [vmem:[#allocation3 + $0x608] sm:$0xff]  ;;  %v2724_v60 = vld [vmem:[#allocation3 + $0x618] sm:$0xff] }
 0x370   : > { %2898 = vmatpush1.bf16.msra.mxu0 %v2665_v56  ;;  %3070 = vmatpush1.bf16.msra.mxu1 %v2667_v57  ;;  %v2721_v56 = vld [vmem:[#allocation3 + $0x600] sm:$0xff]  ;;  %v2723_v57 = vld [vmem:[#allocation3 + $0x610] sm:$0xff] }
 0x371   : > { %2899 = vmatprep.subr.bf16.mxu0 %v2670_v58  ;;  %3071 = vmatprep.subr.bf16.mxu1 %v2672_v16  ;;  %v2726_v58 = vld [vmem:[#allocation3 + $0x628] sm:$0xff]  ;;  %v2728_v16 = vld [vmem:[#allocation3 + $0x638] sm:$0xff] }
 0x374   : > { %2900 = vmatpush1.bf16.msra.mxu0 %v2669_v59  ;;  %3072 = vmatpush1.bf16.msra.mxu1 %v2671_v27  ;;  %v2725_v59 = vld [vmem:[#allocation3 + $0x620] sm:$0xff]  ;;  %v2727_v27 = vld [vmem:[#allocation3 + $0x630] sm:$0xff] }
 0x375   : > { %2901 = vmatprep.subr.bf16.mxu0 %v2674_v61  ;;  %3073 = vmatprep.subr.bf16.mxu1 %v2676_v62  ;;  %v2730_v61 = vld [vmem:[#allocation3 + $0x648] sm:$0xff]  ;;  %v2732_v62 = vld [vmem:[#allocation3 + $0x658] sm:$0xff] }
 0x378   : > { %2902 = vmatpush1.bf16.msra.mxu0 %v2673_v24  ;;  %3074 = vmatpush1.bf16.msra.mxu1 %v2675_v63  ;;  %v2729_v24 = vld [vmem:[#allocation3 + $0x640] sm:$0xff]  ;;  %v2731_v63 = vld [vmem:[#allocation3 + $0x650] sm:$0xff] }
 0x379   : > { %2903 = vmatprep.subr.bf16.mxu0 %v2678_v0  ;;  %3075 = vmatprep.subr.bf16.mxu1 %v2680_v1  ;;  %v2734_v0 = vld [vmem:[#allocation3 + $0x668] sm:$0xff]  ;;  %v2733_v1 = vld [vmem:[#allocation3 + $0x660] sm:$0xff] }
 0x37c   : > { %2904 = vmatpush1.bf16.msra.mxu0 %v2677_v2  ;;  %3076 = vmatpush1.bf16.msra.mxu1 %v2679_v3  ;;  %v2735_v2 = vld [vmem:[#allocation3 + $0x670] sm:$0xff]  ;;  %v2738_v3 = vld [vmem:[#allocation3 + $0x688] sm:$0xff] }
 0x37d   : > { %2905 = vmatprep.subr.bf16.mxu0 %v2682_v4  ;;  %3077 = vmatprep.subr.bf16.mxu1 %v2684_v5  ;;  %v2740_v4 = vld [vmem:[#allocation3 + $0x698] sm:$0xff]  ;;  %v2739_v5 = vld [vmem:[#allocation3 + $0x690] sm:$0xff] }
 0x380   : > { %2906 = vmatpush1.bf16.msra.mxu0 %v2681_v6  ;;  %3078 = vmatpush1.bf16.msra.mxu1 %v2683_v7  ;;  %v2742_v6 = vld [vmem:[#allocation3 + $0x6a8] sm:$0xff]  ;;  %v2744_v7 = vld [vmem:[#allocation3 + $0x6b8] sm:$0xff] }
 0x381   : > { %2907 = vmatprep.subr.bf16.mxu0 %v2686_v8  ;;  %3079 = vmatprep.subr.bf16.mxu1 %v2688_v9  ;;  %v2741_v8 = vld [vmem:[#allocation3 + $0x6a0] sm:$0xff]  ;;  %v2743_v9 = vld [vmem:[#allocation3 + $0x6b0] sm:$0xff] }
 0x384   : > { %2908 = vmatpush1.bf16.msra.mxu0 %v2685_v10  ;;  %3080 = vmatpush1.bf16.msra.mxu1 %v2687_v12  ;;  %v2746_v10 = vld [vmem:[#allocation3 + $0x6c8] sm:$0xff]  ;;  %v2748_v12 = vld [vmem:[#allocation3 + $0x6d8] sm:$0xff] }
 0x385   : > { %2909 = vmatprep.subr.bf16.mxu0 %v2690_v13  ;;  %3081 = vmatprep.subr.bf16.mxu1 %v2692_v15  ;;  %v2745_v13 = vld [vmem:[#allocation3 + $0x6c0] sm:$0xff]  ;;  %v2747_v15 = vld [vmem:[#allocation3 + $0x6d0] sm:$0xff] }
 0x388   : > { %2910 = vmatpush1.bf16.msra.mxu0 %v2689_v29  ;;  %3082 = vmatpush1.bf16.msra.mxu1 %v2691_v30  ;;  %v2750_v29 = vld [vmem:[#allocation3 + $0x6e8] sm:$0xff]  ;;  %v2752_v30 = vld [vmem:[#allocation3 + $0x6f8] sm:$0xff] }
 0x389   : > { %2911 = vmatprep.subr.bf16.mxu0 %v2694_v31  ;;  %3083 = vmatprep.subr.bf16.mxu1 %v2696_v32  ;;  %v2749_v31 = vld [vmem:[#allocation3 + $0x6e0] sm:$0xff]  ;;  %v2751_v32 = vld [vmem:[#allocation3 + $0x6f0] sm:$0xff] }
 0x38c   : > { %2912 = vmatpush1.bf16.msra.mxu0 %v2693_v33  ;;  %3084 = vmatpush1.bf16.msra.mxu1 %v2695_v34  ;;  %v2754_v33 = vld [vmem:[#allocation3 + $0x708] sm:$0xff]  ;;  %v2756_v34 = vld [vmem:[#allocation3 + $0x718] sm:$0xff] }
 0x38d   : > { %2913 = vmatprep.subr.bf16.mxu0 %v2698_v35  ;;  %3085 = vmatprep.subr.bf16.mxu1 %v2700_v36  ;;  %v2753_v35 = vld [vmem:[#allocation3 + $0x700] sm:$0xff]  ;;  %v2755_v36 = vld [vmem:[#allocation3 + $0x710] sm:$0xff] }
 0x390   : > { %2914 = vmatpush1.bf16.msra.mxu0 %v2697_v37  ;;  %3086 = vmatpush1.bf16.msra.mxu1 %v2699_v38  ;;  %v2758_v37 = vld [vmem:[#allocation3 + $0x728] sm:$0xff]  ;;  %v2760_v38 = vld [vmem:[#allocation3 + $0x738] sm:$0xff] }
 0x391   : > { %2915 = vmatprep.subr.bf16.mxu0 %v2702_v39  ;;  %3087 = vmatprep.subr.bf16.mxu1 %v2704_v40  ;;  %v2757_v39 = vld [vmem:[#allocation3 + $0x720] sm:$0xff]  ;;  %v2759_v40 = vld [vmem:[#allocation3 + $0x730] sm:$0xff] }
 0x394   : > { %2916 = vmatpush1.bf16.msra.mxu0 %v2701_v41  ;;  %3088 = vmatpush1.bf16.msra.mxu1 %v2703_v42  ;;  %v2762_v41 = vld [vmem:[#allocation3 + $0x748] sm:$0xff]  ;;  %v2764_v42 = vld [vmem:[#allocation3 + $0x758] sm:$0xff] }
 0x395   : > { %2917 = vmatprep.subr.bf16.mxu0 %v2706_v43  ;;  %3089 = vmatprep.subr.bf16.mxu1 %v2708_v44  ;;  %v2761_v43 = vld [vmem:[#allocation3 + $0x740] sm:$0xff]  ;;  %v2763_v44 = vld [vmem:[#allocation3 + $0x750] sm:$0xff] }
 0x398   : > { %2918 = vmatpush1.bf16.msra.mxu0 %v2705_v45  ;;  %3090 = vmatpush1.bf16.msra.mxu1 %v2707_v46  ;;  %v2766_v45 = vld [vmem:[#allocation3 + $0x768] sm:$0xff]  ;;  %v2768_v46 = vld [vmem:[#allocation3 + $0x778] sm:$0xff] }
 0x399   : > { %2919 = vmatprep.subr.bf16.mxu0 %v2710_v28  ;;  %3091 = vmatprep.subr.bf16.mxu1 %v2712_v47  ;;  %v2765_v28 = vld [vmem:[#allocation3 + $0x760] sm:$0xff]  ;;  %v2767_v47 = vld [vmem:[#allocation3 + $0x770] sm:$0xff] }
 0x39c   : > { %2920 = vmatpush1.bf16.msra.mxu0 %v2709_v48  ;;  %3092 = vmatpush1.bf16.msra.mxu1 %v2711_v49  ;;  %v2770_v48 = vld [vmem:[#allocation3 + $0x788] sm:$0xff]  ;;  %v2772_v49 = vld [vmem:[#allocation3 + $0x798] sm:$0xff] }
 0x39d   : > { %2921 = vmatprep.subr.bf16.mxu0 %v2714_v50  ;;  %3093 = vmatprep.subr.bf16.mxu1 %v2716_v51  ;;  %v2769_v50 = vld [vmem:[#allocation3 + $0x780] sm:$0xff]  ;;  %v2771_v51 = vld [vmem:[#allocation3 + $0x790] sm:$0xff] }
 0x3a0   : > { %2922 = vmatpush1.bf16.msra.mxu0 %v2713_v52  ;;  %3094 = vmatpush1.bf16.msra.mxu1 %v2715_v14  ;;  %v2774_v52 = vld [vmem:[#allocation3 + $0x7a8] sm:$0xff]  ;;  %v2776_v14 = vld [vmem:[#allocation3 + $0x7b8] sm:$0xff] }
 0x3a1   : > { %2923 = vmatprep.subr.bf16.mxu0 %v2718_v17  ;;  %3095 = vmatprep.subr.bf16.mxu1 %v2720_v53  ;;  %v2773_v17 = vld [vmem:[#allocation3 + $0x7a0] sm:$0xff]  ;;  %v2775_v53 = vld [vmem:[#allocation3 + $0x7b0] sm:$0xff] }
 0x3a4   : > { %2924 = vmatpush1.bf16.msra.mxu0 %v2717_v54  ;;  %3096 = vmatpush1.bf16.msra.mxu1 %v2719_v55  ;;  %v2778_v54 = vld [vmem:[#allocation3 + $0x7c8] sm:$0xff]  ;;  %v2780_v55 = vld [vmem:[#allocation3 + $0x7d8] sm:$0xff] }
 0x3a5   : > { %2936 = vmatprep.subr.bf16.mxu0 %v2722_v21  ;;  %3108 = vmatprep.subr.bf16.mxu1 %v2724_v60  ;;  %v2777_v21 = vld [vmem:[#allocation3 + $0x7c0] sm:$0xff]  ;;  %v2779_v60 = vld [vmem:[#allocation3 + $0x7d0] sm:$0xff] }
 0x3a7   : > { %2926 = vmatmul.mubr.bf16.vlgmr.msra.gmra.mrb[0].mxu0 %v4914_v22  ;;  %3098 = vmatmul.mubr.bf16.vlgmr.msra.gmra.mrb[0].mxu1 %v4914_v22  ;;  %v2736_v22 = vld [vmem:[#allocation3 + $0x678] sm:$0xff] }
 0x3a8   : > { %2937 = vmatpush1.bf16.msra.mxu0 %v2721_v56  ;;  %3109 = vmatpush1.bf16.msra.mxu1 %v2723_v57  ;;  %v2782_v56 = vld [vmem:[#allocation3 + $0x7e8] sm:$0xff]  ;;  %v2784_v57 = vld [vmem:[#allocation3 + $0x7f8] sm:$0xff] }
 0x3a9   : > { %2938 = vmatprep.subr.bf16.mxu0 %v2726_v58  ;;  %3110 = vmatprep.subr.bf16.mxu1 %v2728_v16  ;;  %v2781_v58 = vld [vmem:[#allocation3 + $0x7e0] sm:$0xff]  ;;  %v2783_v16 = vld [vmem:[#allocation3 + $0x7f0] sm:$0xff] }
 0x3aa   : > { %2968 = vmatprep.mubr.bf16.mxu0 %v4920_v26  ;;  %3140 = vmatprep.mubr.bf16.mxu1 %v4920_v26  ;;  %v2737_v26 = vld [vmem:[#allocation3 + $0x680] sm:$0xff] }
 0x3ac   : > { %2939 = vmatpush1.bf16.msra.mxu0 %v2725_v59  ;;  %3111 = vmatpush1.bf16.msra.mxu1 %v2727_v27  ;;  %v2785_v59 = vld [vmem:[#allocation12] sm:$0xf] }
 0x3ad   : > { %2940 = vmatprep.subr.bf16.mxu0 %v2730_v61  ;;  %3112 = vmatprep.subr.bf16.mxu1 %v2732_v62  ;;  %v2790_v27 = vrot.slane %v2785_v59, %v4892_v18  ;;  %v2798_v61 = vrot.slane %v2785_v59, %v2455_v20  ;;  %v2794_v62 = vrot.slane %v2785_v59, %v2451_v19 }
 0x3b0   : > { %2941 = vmatpush1.bf16.msra.mxu0 %v2729_v24  ;;  %3113 = vmatpush1.bf16.msra.mxu1 %v2731_v63  ;;  %v2802_v24 = vrot.slane %v2785_v59, %v2459_v23 }
 0x3b1   : > { %2942 = vmatprep.subr.bf16.mxu0 %v2734_v0  ;;  %3114 = vmatprep.subr.bf16.mxu1 %v2736_v22 }
 0x3b4   : > { %2943 = vmatpush1.bf16.msra.mxu0 %v2733_v1  ;;  %3115 = vmatpush1.bf16.msra.mxu1 %v2735_v2 }
 0x3b5   : > { %2944 = vmatprep.subr.bf16.mxu0 %v2738_v3  ;;  %3116 = vmatprep.subr.bf16.mxu1 %v2740_v4 }
 0x3b8   : > { %2945 = vmatpush1.bf16.msra.mxu0 %v2737_v26  ;;  %3117 = vmatpush1.bf16.msra.mxu1 %v2739_v5 }
 0x3b9   : > { %2946 = vmatprep.subr.bf16.mxu0 %v2742_v6  ;;  %3118 = vmatprep.subr.bf16.mxu1 %v2744_v7 }
 0x3bc   : > { %2947 = vmatpush1.bf16.msra.mxu0 %v2741_v8  ;;  %3119 = vmatpush1.bf16.msra.mxu1 %v2743_v9 }
 0x3bd   : > { %2948 = vmatprep.subr.bf16.mxu0 %v2746_v10  ;;  %3120 = vmatprep.subr.bf16.mxu1 %v2748_v12 }
 0x3c0   : > { %2949 = vmatpush1.bf16.msra.mxu0 %v2745_v13  ;;  %3121 = vmatpush1.bf16.msra.mxu1 %v2747_v15 }
 0x3c1   : > { %2950 = vmatprep.subr.bf16.mxu0 %v2750_v29  ;;  %3122 = vmatprep.subr.bf16.mxu1 %v2752_v30 }
 0x3c4   : > { %2951 = vmatpush1.bf16.msra.mxu0 %v2749_v31  ;;  %3123 = vmatpush1.bf16.msra.mxu1 %v2751_v32 }
 0x3c5   : > { %2952 = vmatprep.subr.bf16.mxu0 %v2754_v33  ;;  %3124 = vmatprep.subr.bf16.mxu1 %v2756_v34 }
 0x3c8   : > { %2953 = vmatpush1.bf16.msra.mxu0 %v2753_v35  ;;  %3125 = vmatpush1.bf16.msra.mxu1 %v2755_v36 }
 0x3c9   : > { %2954 = vmatprep.subr.bf16.mxu0 %v2758_v37  ;;  %3126 = vmatprep.subr.bf16.mxu1 %v2760_v38 }
 0x3cc   : > { %2955 = vmatpush1.bf16.msra.mxu0 %v2757_v39  ;;  %3127 = vmatpush1.bf16.msra.mxu1 %v2759_v40 }
 0x3cd   : > { %2956 = vmatprep.subr.bf16.mxu0 %v2762_v41  ;;  %3128 = vmatprep.subr.bf16.mxu1 %v2764_v42 }
 0x3d0   : > { %2957 = vmatpush1.bf16.msra.mxu0 %v2761_v43  ;;  %3129 = vmatpush1.bf16.msra.mxu1 %v2763_v44 }
 0x3d1   : > { %2958 = vmatprep.subr.bf16.mxu0 %v2766_v45  ;;  %3130 = vmatprep.subr.bf16.mxu1 %v2768_v46 }
 0x3d4   : > { %2959 = vmatpush1.bf16.msra.mxu0 %v2765_v28  ;;  %3131 = vmatpush1.bf16.msra.mxu1 %v2767_v47 }
 0x3d5   : > { %2960 = vmatprep.subr.bf16.mxu0 %v2770_v48  ;;  %3132 = vmatprep.subr.bf16.mxu1 %v2772_v49 }
 0x3d8   : > { %2961 = vmatpush1.bf16.msra.mxu0 %v2769_v50  ;;  %3133 = vmatpush1.bf16.msra.mxu1 %v2771_v51 }
 0x3d9   : > { %2962 = vmatprep.subr.bf16.mxu0 %v2774_v52  ;;  %3134 = vmatprep.subr.bf16.mxu1 %v2776_v14 }
 0x3dc   : > { %2963 = vmatpush1.bf16.msra.mxu0 %v2773_v17  ;;  %3135 = vmatpush1.bf16.msra.mxu1 %v2775_v53 }
 0x3dd   : > { %2964 = vmatprep.subr.bf16.mxu0 %v2778_v54  ;;  %3136 = vmatprep.subr.bf16.mxu1 %v2780_v55 }
 0x3e0   : > { %2965 = vmatpush1.bf16.msra.mxu0 %v2777_v21  ;;  %3137 = vmatpush1.bf16.msra.mxu1 %v2779_v60 }
 0x3e1   : > { %2966 = vmatprep.subr.bf16.mxu0 %v2782_v56  ;;  %3138 = vmatprep.subr.bf16.mxu1 %v2784_v57 }
 0x3e4   : > { %2967 = vmatpush1.bf16.msra.mxu0 %v2781_v58  ;;  %3139 = vmatpush1.bf16.msra.mxu1 %v2783_v16 }
 0x3e7   : > { %2969 = vmatmul.mubr.bf16.vlgmr.msra.gmra.mrb[0].mxu0 %v4918_v25  ;;  %3141 = vmatmul.mubr.bf16.vlgmr.msra.gmra.mrb[0].mxu1 %v4918_v25 }
 0x4ba   : > { %v2970_v63 = vpop.f32.mrb[0].mxu0  ;;  %v3142_v0 = vpop.f32.mrb[0].mxu1 }
 0x4bb   : > { %v3817_v22 = vadd.f32 %v2970_v63, %v2790_v27  ;;  %v3821_v1 = vadd.f32 %v3142_v0, %v2798_v61  ;;  %v2972_v2 = vpop.f32.mrb[1].mxu0  ;;  %v3144_v3 = vpop.f32.mrb[1].mxu1 }
 0x4bc   : > { %v3818_v4 = vadd.f32 %v2972_v2, %v2794_v62  ;;  %v3822_v25 = vadd.f32 %v3144_v3, %v2802_v24  ;;  %v2974_v26 = vpop.f32.mrb[2].mxu0  ;;  %v3146_v5 = vpop.f32.mrb[2].mxu1 }
 0x4bd   : > { %v3819_v6 = vadd.f32 %v2974_v26, %v2790_v27  ;;  %v3823_v7 = vadd.f32 %v3146_v5, %v2798_v61  ;;  %v2976_v8 = vpop.f32.mrb[3].mxu0  ;;  %v3148_v20 = vpop.f32.mrb[3].mxu1  ;;  %v3151_v19 = vmax.f32 %v3817_v22, 0.0  ;;  %v3153_v12 = vmax.f32 %v3821_v1, 0.0 }
 0x4be   : > { %v3820_v9 = vadd.f32 %v2976_v8, %v2794_v62  ;;  %v3824_v10 = vadd.f32 %v3148_v20, %v2802_v24  ;;  %v3152_v13 = vmax.f32 %v3818_v4, 0.0  ;;  %v3154_v15 = vmax.f32 %v3822_v25, 0.0 }
 0x4bf   : > { %v3155_v11 = vmax.f32 %v3819_v6, 0.0  ;;  %v3157_v23 = vmax.f32 %v3823_v7, 0.0 }
 0x4c0   : > { %v3156_v29 = vmax.f32 %v3820_v9, 0.0  ;;  %v3158_v30 = vmax.f32 %v3824_v10, 0.0 }
 0x4c1   : > { %v4943_v31 = vpack.c.bf16 %v3155_v11, %v3151_v19  ;;  %v4945_v32 = vpack.c.bf16 %v3157_v23, %v3153_v12 }
 0x4c2   : > { %v3160_v33 = vpack.c.bf16 %v3156_v29, %v3152_v13  ;;  %v3162_v34 = vpack.c.bf16 %v3158_v30, %v3154_v15 }
 0x4c3   : > { %4204 = dma.done.wait [#allocation5 + $0x1], 4096 }
 0x4c4   : > { %4205 = vsyncadd [#allocation5 + $0x1], 4294963200  ;;  %3239 = vmatprep.mubr.bf16.mxu0 %v3160_v33  ;;  %3280 = vmatprep.mubr.bf16.mxu1 %v3162_v34  ;;  %v3176_v35 = vld [vmem:[#allocation4 + $0x40] sm:$0xff]  ;;  %v3177_v39 = vld [vmem:[#allocation4 + $0x48] sm:$0xff]  ;;  %vm3312_vm0 = vcmask 7168  }
 0x4c5   : > { %v3192_v36 = vld [vmem:[#allocation4 + $0xc0] sm:$0xff]  ;;  %3757 = vmatprep.subr.bf16.mxu0 %v3176_v35  ;;  %v3193_v40 = vld [vmem:[#allocation4 + $0xc8] sm:$0xff]  ;;  %v3178_v43 = vld [vmem:[#allocation4 + $0x50] sm:$0xff] }
 0x4c6   : > { %v3168_v37 = vld [vmem:[#allocation4] sm:$0xff]  ;;  %3779 = vmatprep.subr.bf16.mxu1 %v3192_v36  ;;  %v3169_v41 = vld [vmem:[#allocation4 + $0x8] sm:$0xff]  ;;  %v3194_v44 = vld [vmem:[#allocation4 + $0xd0] sm:$0xff] }
 0x4c7   : > { %v3184_v38 = vld [vmem:[#allocation4 + $0x80] sm:$0xff]  ;;  %3758 = vmatpush3.bf16.msra.mxu0 %v3168_v37  ;;  %v3185_v42 = vld [vmem:[#allocation4 + $0x88] sm:$0xff]  ;;  %v3170_v45 = vld [vmem:[#allocation4 + $0x10] sm:$0xff] }
 0x4c8   : > { %3780 = vmatpush3.bf16.msra.mxu1 %v3184_v38  ;;  %3759 = vmatprep.subr.bf16.mxu0 %v3177_v39  ;;  %v3186_v46 = vld [vmem:[#allocation4 + $0x90] sm:$0xff]  ;;  %v3179_v28 = vld [vmem:[#allocation4 + $0x58] sm:$0xff]  ;;  %v3180_v50 = vld [vmem:[#allocation4 + $0x60] sm:$0xff] }
 0x4c9   : > { %3781 = vmatprep.subr.bf16.mxu1 %v3193_v40  ;;  %v3195_v47 = vld [vmem:[#allocation4 + $0xd8] sm:$0xff]  ;;  %v3196_v51 = vld [vmem:[#allocation4 + $0xe0] sm:$0xff]  ;;  %v3181_v17 = vld [vmem:[#allocation4 + $0x68] sm:$0xff] }
 0x4ca   : > { %v3171_v48 = vld [vmem:[#allocation4 + $0x18] sm:$0xff]  ;;  %v3172_v52 = vld [vmem:[#allocation4 + $0x20] sm:$0xff]  ;;  %v3197_v53 = vld [vmem:[#allocation4 + $0xe8] sm:$0xff] }
 0x4cb   : > { %3760 = vmatpush3.bf16.msra.mxu0 %v3169_v41  ;;  %v3187_v49 = vld [vmem:[#allocation4 + $0x98] sm:$0xff]  ;;  %v3188_v14 = vld [vmem:[#allocation4 + $0xa0] sm:$0xff]  ;;  %v3173_v54 = vld [vmem:[#allocation4 + $0x28] sm:$0xff] }
 0x4cc   : > { %3782 = vmatpush3.bf16.msra.mxu1 %v3185_v42  ;;  %3761 = vmatprep.subr.bf16.mxu0 %v3178_v43  ;;  %v3189_v55 = vld [vmem:[#allocation4 + $0xa8] sm:$0xff]  ;;  %v3182_v21 = vld [vmem:[#allocation4 + $0x70] sm:$0xff]  ;;  %v3183_v58 = vld [vmem:[#allocation4 + $0x78] sm:$0xff] }
 0x4cd   : > { %3783 = vmatprep.subr.bf16.mxu1 %v3194_v44  ;;  %v3198_v60 = vld [vmem:[#allocation4 + $0xf0] sm:$0xff]  ;;  %v3199_v16 = vld [vmem:[#allocation4 + $0xf8] sm:$0xff]  ;;  %v3291_v61 = vld [vmem:[#allocation15] sm:$0x1] }
 0x4ce   : > { %v3174_v56 = vld [vmem:[#allocation4 + $0x30] sm:$0xff]  ;;  %v3175_v59 = vld [vmem:[#allocation4 + $0x38] sm:$0xff]  ;;  %v3746_v63 = vld [vmem:[#allocation14] ss:$0 sm:$0xff]  ;;  %v3292_v25 = vunpack.c.l.bf16 %v3291_v61 }
 0x4cf   : > { %3762 = vmatpush3.bf16.msra.mxu0 %v3170_v45  ;;  %v3190_v57 = vld [vmem:[#allocation4 + $0xb0] sm:$0xff]  ;;  %v3191_v27 = vld [vmem:[#allocation4 + $0xb8] sm:$0xff]  ;;  %v3747_v15 = vld [vmem:[#allocation6] ss:$0 sm:$0xff] }
 0x4d0   : > { %3784 = vmatpush3.bf16.msra.mxu1 %v3186_v46  ;;  %3763 = vmatprep.subr.bf16.mxu0 %v3179_v28  ;;  %v3296_v10 = vrot.slane %v3292_v25, %v4892_v18 }
 0x4d1   : > { %3785 = vmatprep.subr.bf16.mxu1 %v3195_v47 }
 0x4d3   : > { %3764 = vmatpush3.bf16.msra.mxu0 %v3171_v48 }
 0x4d4   : > { %3786 = vmatpush3.bf16.msra.mxu1 %v3187_v49  ;;  %3765 = vmatprep.subr.bf16.mxu0 %v3180_v50 }
 0x4d5   : > { %3787 = vmatprep.subr.bf16.mxu1 %v3196_v51 }
 0x4d7   : > { %3766 = vmatpush3.bf16.msra.mxu0 %v3172_v52 }
 0x4d8   : > { %3788 = vmatpush3.bf16.msra.mxu1 %v3188_v14  ;;  %3767 = vmatprep.subr.bf16.mxu0 %v3181_v17 }
 0x4d9   : > { %3789 = vmatprep.subr.bf16.mxu1 %v3197_v53 }
 0x4db   : > { %3768 = vmatpush3.bf16.msra.mxu0 %v3173_v54 }
 0x4dc   : > { %3790 = vmatpush3.bf16.msra.mxu1 %v3189_v55  ;;  %3769 = vmatprep.subr.bf16.mxu0 %v3182_v21 }
 0x4dd   : > { %3791 = vmatprep.subr.bf16.mxu1 %v3198_v60 }
 0x4df   : > { %3770 = vmatpush3.bf16.msra.mxu0 %v3174_v56 }
 0x4e0   : > { %3792 = vmatpush3.bf16.msra.mxu1 %v3190_v57  ;;  %3771 = vmatprep.subr.bf16.mxu0 %v3183_v58 }
 0x4e1   : > { %3793 = vmatprep.subr.bf16.mxu1 %v3199_v16 }
 0x4e3   : > { %3772 = vmatpush3.bf16.msra.mxu0 %v3175_v59 }
 0x4e4   : > { %3794 = vmatpush3.bf16.msra.mxu1 %v3191_v27 }
 0x4e6   : > { %3240 = vmatmul.mubr.bf16.vlgmr.msra.gmra.mrb[4].mxu0 %v4943_v31 }
 0x4e7   : > { %3281 = vmatmul.mubr.bf16.vlgmr.msra.gmra.mrb[4].mxu1 %v4945_v32 }
 0x5b9   : > { %v3773_v62 = vpop.f32.mrb[4].mxu0 }
 0x5ba   : > { %v3795_v24 = vpop.f32.mrb[4].mxu1  ;;  %v3774_v0 = vpop.f32.mrb[5].mxu0 }
 0x5bb   : > { %v3796_v22 = vpop.f32.mrb[5].mxu1  ;;  %v3775_v1 = vadd.f32 %v3774_v0, %v3773_v62  ;;  %v3776_v3 = vpop.f32.mrb[6].mxu0 }
 0x5bc   : > { %v3797_v2 = vadd.f32 %v3796_v22, %v3795_v24  ;;  %v3798_v4 = vpop.f32.mrb[6].mxu1  ;;  %v3777_v26 = vpop.f32.mrb[7].mxu0 }
 0x5bd   : > { %v3799_v5 = vpop.f32.mrb[7].mxu1  ;;  %v3242_v6 = vadd.f32 %v3775_v1, %v3746_v63  ;;  %v3778_v7 = vadd.f32 %v3777_v26, %v3776_v3 }
 0x5be   : > { %v3800_v8 = vadd.f32 %v3799_v5, %v3798_v4 }
 0x5bf   : > { %v3245_v20 = vadd.f32 %v3778_v7, %v3746_v63  ;;  %v3283_v9 = vadd.f32 %v3797_v2, %v3242_v6 }
 0x5c1   : > { %v3286_v19 = vadd.f32 %v3800_v8, %v3245_v20  ;;  %v3289_v12 = vmax.f32 %v3283_v9, 0.0 }
 0x5c3   : > { %v3290_v11 = vmax.f32 %v3286_v19, 0.0  ;;  %v3297_v23 = vmul.f32 %v3296_v10, %v3289_v12 }
 0x5c5   : > { %3299 = vadd.xlane.f32.xlu0 %v3297_v23  ;;  %v3298_v13 = vmul.f32 %v3296_v10, %v3290_v11 }
 0x5c9   : > { %3301 = vadd.xlane.f32.xlu0 %v3298_v13 }
 0x652   : > { %v3300_v29 = vpop.xlane.xlu0 %3299 }
 0x653   : > { %v3310_v30 = vadd.f32 %v3747_v15, %v3300_v29 }
 0x655   : > { %3313 = vst.msk [vmem:[%s4983_s9] sm:$0xff] %vm3312_vm0, %v3310_v30 }
 0x656   : > { %v3302_v31 = vpop.xlane.xlu0 %3301 }
 0x657   : > { %v3311_v32 = vadd.f32 %v3747_v15, %v3302_v31 }
 0x659   : > { %3314 = vst.msk [vmem:[%s4983_s9 + $0x8] sm:$0xff] %vm3312_vm0, %v3311_v32 }
 0x65a PF: > { %s29_s16 = sadd.s32 1, %s4228_s16   ;;  %s5011_s30 = sld [smem:[#allocation30_spill]] }
 0x65b   : > { %p26_p10 = scmp.ge.s32.totalorder %s29_s16, 6   ;;  %s5012_s11 = smov %s4212_s12 }
 0x65c   : > { %s5013_s12 = smov %s4216_s13  ;;  %s5014_s13 = smov %s4468_s29 }
 0x65d   : > { %s5015_s14 = smov %s4224_s15  ;;  %28 = sbr.rel (!%p26_p10) target bundleno = 14 (0xe), region = 140 }
 0x660   : > { %s5016_s15 = smov %s5011_s30 }
 0x664   :  { %3337 = vsyncpa [#allocation8], 1 }
 0x665   :  { %3339 = vsyncpa [#allocation8 + $0x1], 1 }
 0x666   :  { %3340 = vsyncpa [#allocation10], 1 }
 0x667   :  { %3342 = vsyncpa [#allocation10 + $0x1], 1 }
 0x668   :  { %3343 = vsyncpa [#allocation13], 1 }
 0x669   :  { %3344 = vsyncpa [#allocation16], 1 }
 0x66a   :  { %3345 = vsyncmov [#allocation5] }
 0x66d   :  { %s3346_s26 = vpop.sfrf %3345 }
 0x66e   :  { %p3752_p12 = scmp.ne.s32.totalorder %s3346_s26, 0 }
 0x670   :  { %3350 = shalt.err (%p3752_p12)  }
 0x671   :  { %3352 = vsyncmov [#allocation5 + $0x1] }
 0x674   :  { %s3353_s10 = vpop.sfrf %3352 }
 0x675   :  { %p3753_p9 = scmp.ne.s32.totalorder %s3353_s10, 0 }
 0x677   :  { %3357 = shalt.err (%p3753_p9)  }

</bundles_post_ra>
